<compile_context>
chip_gen: v6e
topology: v6e:2x2x1
jax: 0.10.0
libtpu: 0.0.40
codegen_flags: <defaults>
</compile_context>

<pallas_src>
import jax
import jax.numpy as jnp
from jax.experimental import pallas as pl
from jax.experimental.pallas import tpu as pltpu


# ----------------------------- Pallas kernels ------------------------------ #

def conv1_kernel(p_ref, w_ref, b_ref, o_ref):
    """Conv1 (single im2col matmul over all 4 pool phases) + phase-max + bias + ReLU.

    p_ref: (1, 832, 128) bf16   rows = phase*208 + pooled-position (196 valid / phase),
                                lanes = (ky, kx, cin) features (75 valid)
    w_ref: (128, 128)   bf16    flattened conv1 weight (75 x 6 valid)
    b_ref: (1, 128)     f32     conv1 bias (6 valid)
    o_ref: (1, 208, 128) bf16   pooled feature map, rows = h*14+w (196 valid), lanes = cout
    """
    y = jnp.dot(p_ref[0], w_ref[...], preferred_element_type=jnp.float32)   # (832, 128)
    # 2x2 max-pool == max over the 4 phase row-blocks (aligned 208-row slices).
    m = jnp.maximum(jnp.maximum(y[0:208], y[208:416]),
                    jnp.maximum(y[416:624], y[624:832]))
    m = jnp.maximum(m + b_ref[...], 0.0)          # bias + ReLU hoisted after the phase max
    o_ref[0] = m.astype(o_ref.dtype)


def conv2_mlp_kernel(p_ref, w2_ref, b2_ref, w3_ref, b3_ref, w4_ref, b4_ref,
                     w5_ref, b5_ref, o_ref):
    """Fused conv2 + maxpool + flatten + fc1/ReLU + fc2/ReLU + fc3 + ReLU.

    p_ref : (1, 8, 3840) bf16  rows 0..7 = the 4 pool phases duplicated twice,
                               lanes = q*150 + (ky,kx,cin) feature  (q = conv2 pooled pos)
    w2_ref: (3840, 512) bf16   block-diagonal conv2 weight; columns = c*25 + q (= PyTorch
                               NCHW flatten order of the 16x5x5 map), 400 valid
    b2_ref: (1, 512) f32       conv2 bias repeated per position (c*25 + q order)
    w3/b3 : fc1 (512, 128)/(1, 128);  w4/b4 : fc2 (128, 128)/(1, 128);  w5/b5 : fc3
    o_ref : (1, 8, 128) f32    final activations broadcast over 8 rows (2 valid lanes)
    """
    y = jnp.dot(p_ref[0], w2_ref[...], preferred_element_type=jnp.float32)  # (8, 512)
    # Phase duplication makes the plain 8-row max equal to the 4-phase max-pool.
    x = jnp.max(y, axis=0, keepdims=True) + b2_ref[...]                     # (1, 512)
    x = jnp.maximum(x, 0.0).astype(jnp.bfloat16)                            # = fc1 input

    h = jnp.dot(x, w3_ref[...], preferred_element_type=jnp.float32) + b3_ref[...]
    h = jnp.maximum(h, 0.0).astype(jnp.bfloat16)
    # TODO(synk): nn.Dropout / nn.Dropout2d only act in training mode; inference
    # semantics (identity) are implemented here.
    h = jnp.dot(h, w4_ref[...], preferred_element_type=jnp.float32) + b4_ref[...]
    h = jnp.maximum(h, 0.0).astype(jnp.bfloat16)
    h = jnp.dot(h, w5_ref[...], preferred_element_type=jnp.float32) + b5_ref[...]
    h = jnp.maximum(h, 0.0)                                                 # final ReLU
    o_ref[0] = jnp.broadcast_to(h, (8, 128))


# ------------------------------- JAX glue ---------------------------------- #

def _pool_phase_patches(x, k):
    """x: (B, H, W, C) NHWC -> (B, 4, Hp*Wp, k*k*C) via static strided slices (no gather).

    Phase index = dy*2+dx of the 2x2 max-pool, position index = h*Wp + w (row-major),
    feature index = (ky*k + kx)*C + c.
    """
    B, H, W, C = x.shape
    Hp, Wp = (H - k + 1) // 2, (W - k + 1) // 2
    phases = []
    for dy in range(2):
        for dx in range(2):
            feats = []
            for ky in range(k):
                for kx in range(k):
                    feats.append(x[:, dy + ky: dy + ky + 2 * Hp: 2,
                                      dx + kx: dx + kx + 2 * Wp: 2, :])   # (B,Hp,Wp,C)
            phases.append(jnp.stack(feats, axis=-2))                      # (B,Hp,Wp,k*k,C)
    p = jnp.stack(phases, axis=1)                                         # (B,4,Hp,Wp,k*k,C)
    return p.reshape(B, 4, Hp * Wp, k * k * C)


def gate_cnn_softmax_forward(x_nchw, params):
    B = x_nchw.shape[0]
    x = jnp.transpose(x_nchw, (0, 2, 3, 1)).astype(jnp.float32)           # NCHW -> NHWC

    # ---- conv1 + ReLU + maxpool (one Pallas call) ---------------------------------
    p1 = _pool_phase_patches(x, 5)                                        # (B, 4, 196, 75)
    p1 = jnp.pad(p1, ((0, 0), (0, 0), (0, 208 - 196), (0, 128 - 75)))     # (B, 4, 208, 128)
    p1 = p1.reshape(B, 4 * 208, 128).astype(jnp.bfloat16)                 # (B, 832, 128)

    out1 = pl.pallas_call(
        conv1_kernel,
        out_shape=jax.ShapeDtypeStruct((B, 208, 128), jnp.bfloat16),
        grid=(B,),
        in_specs=[
            pl.BlockSpec((1, 832, 128), lambda i: (i, 0, 0)),
            pl.BlockSpec((128, 128), lambda i: (0, 0)),
            pl.BlockSpec((1, 128), lambda i: (0, 0)),
        ],
        out_specs=pl.BlockSpec((1, 208, 128), lambda i: (i, 0, 0)),
        compiler_params=pltpu.CompilerParams(dimension_semantics=("parallel",)),
    )(p1, params["w1"], params["b1"])

    fm1 = out1[:, :196, :6].reshape(B, 14, 14, 6)                         # (B, 14, 14, 6)

    # ---- conv2 + ReLU + maxpool + flatten + fc1/fc2/fc3 (one fused Pallas call) ---
    p2 = _pool_phase_patches(fm1, 5)                                      # (B, 4, 25, 150)
    p2 = p2.reshape(B, 4, 25 * 150)                                       # (B, 4, 3750)
    p2 = jnp.pad(p2, ((0, 0), (0, 0), (0, 3840 - 3750)))                  # (B, 4, 3840)
    p2 = jnp.concatenate([p2, p2], axis=1).astype(jnp.bfloat16)           # (B, 8, 3840)

    out2 = pl.pallas_call(
        conv2_mlp_kernel,
        out_shape=jax.ShapeDtypeStruct((B, 8, 128), jnp.float32),
        grid=(B,),
        in_specs=[
            pl.BlockSpec((1, 8, 3840), lambda i: (i, 0, 0)),
            pl.BlockSpec((3840, 512), lambda i: (0, 0)),
            pl.BlockSpec((1, 512), lambda i: (0, 0)),
            pl.BlockSpec((512, 128), lambda i: (0, 0)),
            pl.BlockSpec((1, 128), lambda i: (0, 0)),
            pl.BlockSpec((128, 128), lambda i: (0, 0)),
            pl.BlockSpec((1, 128), lambda i: (0, 0)),
            pl.BlockSpec((128, 128), lambda i: (0, 0)),
            pl.BlockSpec((1, 128), lambda i: (0, 0)),
        ],
        out_specs=pl.BlockSpec((1, 8, 128), lambda i: (i, 0, 0)),
        compiler_params=pltpu.CompilerParams(dimension_semantics=("parallel",)),
    )(p2, params["w2bd"], params["b2bd"], params["wf1"], params["bf1"],
      params["wf2"], params["bf2"], params["wf3"], params["bf3"])

    return out2[:, 0, :2]                                                 # (B, 2) f32


# ------------------------------ parameters --------------------------------- #

def init_params(key):
    """Deterministic synthetic parameters (PyTorch-default-like uniform init)."""
    keys = jax.random.split(key, 10)

    def u(k, shape, fan_in):
        bound = 1.0 / jnp.sqrt(float(fan_in))
        return jax.random.uniform(k, shape, jnp.float32, -bound, bound)

    w_conv1_oihw = u(keys[0], (6, 3, 5, 5), 3 * 25)
    b_conv1 = u(keys[1], (6,), 3 * 25)
    w_conv2_oihw = u(keys[2], (16, 6, 5, 5), 6 * 25)
    b_conv2 = u(keys[3], (16,), 6 * 25)
    w_fc1 = u(keys[4], (120, 400), 400)
    b_fc1 = u(keys[5], (120,), 400)
    w_fc2 = u(keys[6], (84, 120), 120)
    b_fc2 = u(keys[7], (84,), 120)
    w_fc3 = u(keys[8], (2, 84), 84)
    b_fc3 = u(keys[9], (2,), 84)

    return dict(
        # conv weights: OIHW -> HWIO, matching the (ky, kx, cin) patch order
        w_conv1=jnp.transpose(w_conv1_oihw, (2, 3, 1, 0)), b_conv1=b_conv1,
        w_conv2=jnp.transpose(w_conv2_oihw, (2, 3, 1, 0)), b_conv2=b_conv2,
        # linear weights: (out, in) -> (in, out)
        w_fc1=w_fc1.T, b_fc1=b_fc1,
        w_fc2=w_fc2.T, b_fc2=b_fc2,
        w_fc3=w_fc3.T, b_fc3=b_fc3,
    )


def prepare_params(raw):
    """One-time padding / bf16 cast / layout folding of the weights for the kernels."""
    # conv1: (5,5,3,6) HWIO -> (75, 6) -> padded (128, 128)
    w1 = jnp.pad(raw["w_conv1"].reshape(75, 6), ((0, 53), (0, 122))).astype(jnp.bfloat16)
    b1 = jnp.pad(raw["b_conv1"], (0, 122)).reshape(1, 128).astype(jnp.float32)

    # conv2: block-diagonal over the 25 pooled positions so the kernel's matmul output is
    # already the PyTorch NCHW flatten (column index = c*25 + q).
    w2f = raw["w_conv2"].reshape(150, 16)                       # (ky,kx,cin) x cout
    eye = jnp.eye(25, dtype=jnp.float32)
    w2bd = jnp.einsum("fc,qr->qfcr", w2f, eye).reshape(25 * 150, 16 * 25)   # (3750, 400)
    w2bd = jnp.pad(w2bd, ((0, 3840 - 3750), (0, 512 - 400))).astype(jnp.bfloat16)
    b2bd = jnp.repeat(raw["b_conv2"], 25)                       # index = c*25 + q
    b2bd = jnp.pad(b2bd, (0, 512 - 400)).reshape(1, 512).astype(jnp.float32)

    # fc layers, zero-padded to 128-multiples (padded lanes stay exactly zero through ReLU).
    wf1 = jnp.pad(raw["w_fc1"], ((0, 112), (0, 8))).astype(jnp.bfloat16)    # (512, 128)
    bf1 = jnp.pad(raw["b_fc1"], (0, 8)).reshape(1, 128).astype(jnp.float32)
    wf2 = jnp.pad(raw["w_fc2"], ((0, 8), (0, 44))).astype(jnp.bfloat16)     # (128, 128)
    bf2 = jnp.pad(raw["b_fc2"], (0, 44)).reshape(1, 128).astype(jnp.float32)
    wf3 = jnp.pad(raw["w_fc3"], ((0, 44), (0, 126))).astype(jnp.bfloat16)   # (128, 128)
    bf3 = jnp.pad(raw["b_fc3"], (0, 126)).reshape(1, 128).astype(jnp.float32)

    return dict(w1=w1, b1=b1, w2bd=w2bd, b2bd=b2bd,
                wf1=wf1, bf1=bf1, wf2=wf2, bf2=bf2, wf3=wf3, bf3=bf3)


if __name__ == "__main__":
    key = jax.random.PRNGKey(0)
    pkey, xkey = jax.random.split(key)
    params = prepare_params(init_params(pkey))
    # NCHW input, like the PyTorch module; 32x32 gives the 16*5*5 flatten.
    x = jax.random.normal(xkey, (2, 3, 32, 32), jnp.float32)

    out = jax.jit(gate_cnn_softmax_forward)(x, params)
    out = jax.block_until_ready(out)
    assert out.shape == (2, 2) and out.dtype == jnp.float32
    print("KERNEL_OK")
</pallas_src>

<mosaic_0001>
module attributes {stable_mosaic.version = 11 : i64} {
  func.func @conv1_kernel(%arg0: i32, %arg1: memref<1x832x128xbf16, #tpu.memory_space<vmem>>, %arg2: memref<128x128xbf16, #tpu.memory_space<vmem>>, %arg3: memref<1x128xf32, #tpu.memory_space<vmem>>, %arg4: memref<1x208x128xbf16, #tpu.memory_space<vmem>>) attributes {dimension_semantics = [#tpu.dimension_semantics<parallel>], iteration_bounds = array<i64: 2>, scalar_prefetch = 0 : i64, scratch_operands = 0 : i64, tpu.core_type = #tpu.core_type<tc>, window_params = [{transform_indices = @transform_0, window_bounds = array<i64: 1, 832, 128>}, {pipeline_mode = #tpu.pipeline_mode<synchronous>, transform_indices = @transform_1, window_bounds = array<i64: 128, 128>}, {pipeline_mode = #tpu.pipeline_mode<synchronous>, transform_indices = @transform_2, window_bounds = array<i64: 1, 128>}, {transform_indices = @transform_3, window_bounds = array<i64: 1, 208, 128>}]} {
    %c0 = arith.constant 0 : index
    %c0_0 = arith.constant 0 : index
    %c0_1 = arith.constant 0 : index
    %0 = vector.load %arg1[%c0, %c0_0, %c0_1] : memref<1x832x128xbf16, #tpu.memory_space<vmem>>, vector<1x832x128xbf16>
    %1 = vector.shape_cast %0 : vector<1x832x128xbf16> to vector<832x128xbf16>
    %c0_2 = arith.constant 0 : index
    %c0_3 = arith.constant 0 : index
    %2 = vector.load %arg2[%c0_2, %c0_3] : memref<128x128xbf16, #tpu.memory_space<vmem>>, vector<128x128xbf16>
    %cst = arith.constant dense<0.000000e+00> : vector<832x128xf32>
    %3 = tpu.matmul %1, %2, %cst {dimension_numbers = #tpu.dot_dimension_numbers<[1], [0], [0], [1], [0, 0, 1, 1], [], []>} : vector<832x128xbf16>, vector<128x128xbf16>, vector<832x128xf32> -> vector<832x128xf32>
    %4 = vector.extract_strided_slice %3 {offsets = [0, 0], sizes = [208, 128], strides = [1, 1]} : vector<832x128xf32> to vector<208x128xf32>
    %5 = vector.extract_strided_slice %3 {offsets = [208, 0], sizes = [208, 128], strides = [1, 1]} : vector<832x128xf32> to vector<208x128xf32>
    %6 = arith.maximumf %4, %5 : vector<208x128xf32>
    %7 = vector.extract_strided_slice %3 {offsets = [416, 0], sizes = [208, 128], strides = [1, 1]} : vector<832x128xf32> to vector<208x128xf32>
    %8 = vector.extract_strided_slice %3 {offsets = [624, 0], sizes = [208, 128], strides = [1, 1]} : vector<832x128xf32> to vector<208x128xf32>
    %9 = arith.maximumf %7, %8 : vector<208x128xf32>
    %10 = arith.maximumf %6, %9 : vector<208x128xf32>
    %c0_4 = arith.constant 0 : index
    %c0_5 = arith.constant 0 : index
    %11 = vector.load %arg3[%c0_4, %c0_5] : memref<1x128xf32, #tpu.memory_space<vmem>>, vector<1x128xf32>
    %12 = vector.broadcast %11 : vector<1x128xf32> to vector<208x128xf32>
    %13 = arith.addf %10, %12 : vector<208x128xf32>
    %cst_6 = arith.constant 0.000000e+00 : f32
    %14 = vector.broadcast %cst_6 : f32 to vector<208x128xf32>
    %15 = arith.maximumf %13, %14 : vector<208x128xf32>
    %16 = arith.truncf %15 : vector<208x128xf32> to vector<208x128xbf16>
    %c0_7 = arith.constant 0 : index
    %c0_8 = arith.constant 0 : index
    %c0_9 = arith.constant 0 : index
    %17 = vector.load %arg4[%c0_7, %c0_8, %c0_9] : memref<1x208x128xbf16, #tpu.memory_space<vmem>>, vector<1x208x128xbf16>
    %18 = vector.shape_cast %17 : vector<1x208x128xbf16> to vector<208x128xbf16>
    %19 = vector.shape_cast %16 : vector<208x128xbf16> to vector<1x208x128xbf16>
    tpu.vector_store %arg4[%c0_7, %c0_8, %c0_9], %19 {strides = array<i32>} : memref<1x208x128xbf16, #tpu.memory_space<vmem>>, vector<1x208x128xbf16>,
    return
  }
  func.func @transform_0(%arg0: i32) -> (i32, i32, i32) {
    %c0_i32 = arith.constant 0 : i32
    %c0_i32_0 = arith.constant 0 : i32
    %c0_i32_1 = arith.constant 0 : i32
    return %arg0, %c0_i32, %c0_i32_0 : i32, i32, i32
  }
  func.func @transform_1(%arg0: i32) -> (i32, i32) {
    %c0_i32 = arith.constant 0 : i32
    %c0_i32_0 = arith.constant 0 : i32
    %c0_i32_1 = arith.constant 0 : i32
    return %c0_i32, %c0_i32_0 : i32, i32
  }
  func.func @transform_2(%arg0: i32) -> (i32, i32) {
    %c0_i32 = arith.constant 0 : i32
    %c0_i32_0 = arith.constant 0 : i32
    %c0_i32_1 = arith.constant 0 : i32
    return %c0_i32, %c0_i32_0 : i32, i32
  }
  func.func @transform_3(%arg0: i32) -> (i32, i32, i32) {
    %c0_i32 = arith.constant 0 : i32
    %c0_i32_0 = arith.constant 0 : i32
    %c0_i32_1 = arith.constant 0 : i32
    return %arg0, %c0_i32, %c0_i32_0 : i32, i32, i32
  }
}

module attributes {stable_mosaic.version = 11 : i64} {
  func.func @conv2_mlp_kernel(%arg0: i32, %arg1: memref<1x8x3840xbf16, #tpu.memory_space<vmem>>, %arg2: memref<3840x512xbf16, #tpu.memory_space<vmem>>, %arg3: memref<1x512xf32, #tpu.memory_space<vmem>>, %arg4: memref<512x128xbf16, #tpu.memory_space<vmem>>, %arg5: memref<1x128xf32, #tpu.memory_space<vmem>>, %arg6: memref<128x128xbf16, #tpu.memory_space<vmem>>, %arg7: memref<1x128xf32, #tpu.memory_space<vmem>>, %arg8: memref<128x128xbf16, #tpu.memory_space<vmem>>, %arg9: memref<1x128xf32, #tpu.memory_space<vmem>>, %arg10: memref<1x8x128xf32, #tpu.memory_space<vmem>>) attributes {dimension_semantics = [#tpu.dimension_semantics<parallel>], iteration_bounds = array<i64: 2>, scalar_prefetch = 0 : i64, scratch_operands = 0 : i64, tpu.core_type = #tpu.core_type<tc>, window_params = [{transform_indices = @transform_0, window_bounds = array<i64: 1, 8, 3840>}, {pipeline_mode = #tpu.pipeline_mode<synchronous>, transform_indices = @transform_1, window_bounds = array<i64: 3840, 512>}, {pipeline_mode = #tpu.pipeline_mode<synchronous>, transform_indices = @transform_2, window_bounds = array<i64: 1, 512>}, {pipeline_mode = #tpu.pipeline_mode<synchronous>, transform_indices = @transform_3, window_bounds = array<i64: 512, 128>}, {pipeline_mode = #tpu.pipeline_mode<synchronous>, transform_indices = @transform_4, window_bounds = array<i64: 1, 128>}, {pipeline_mode = #tpu.pipeline_mode<synchronous>, transform_indices = @transform_5, window_bounds = array<i64: 128, 128>}, {pipeline_mode = #tpu.pipeline_mode<synchronous>, transform_indices = @transform_6, window_bounds = array<i64: 1, 128>}, {pipeline_mode = #tpu.pipeline_mode<synchronous>, transform_indices = @transform_7, window_bounds = array<i64: 128, 128>}, {pipeline_mode = #tpu.pipeline_mode<synchronous>, transform_indices = @transform_8, window_bounds = array<i64: 1, 128>}, {transform_indices = @transform_9, window_bounds = array<i64: 1, 8, 128>}]} {
    %c0 = arith.constant 0 : index
    %c0_0 = arith.constant 0 : index
    %c0_1 = arith.constant 0 : index
    %0 = vector.load %arg1[%c0, %c0_0, %c0_1] : memref<1x8x3840xbf16, #tpu.memory_space<vmem>>, vector<1x8x3840xbf16>
    %1 = vector.shape_cast %0 : vector<1x8x3840xbf16> to vector<8x3840xbf16>
    %c0_2 = arith.constant 0 : index
    %c0_3 = arith.constant 0 : index
    %2 = vector.load %arg2[%c0_2, %c0_3] : memref<3840x512xbf16, #tpu.memory_space<vmem>>, vector<3840x512xbf16>
    %cst = arith.constant dense<0.000000e+00> : vector<8x512xf32>
    %3 = tpu.matmul %1, %2, %cst {dimension_numbers = #tpu.dot_dimension_numbers<[1], [0], [0], [1], [0, 0, 1, 1], [], []>} : vector<8x3840xbf16>, vector<3840x512xbf16>, vector<8x512xf32> -> vector<8x512xf32>
    %cst_4 = arith.constant dense<0xFF800000> : vector<512xf32>
    %4 = vector.multi_reduction <maximumf>, %3, %cst_4 [0] : vector<8x512xf32> to vector<512xf32>
    %5 = vector.shape_cast %4 : vector<512xf32> to vector<1x512xf32>
    %c0_5 = arith.constant 0 : index
    %c0_6 = arith.constant 0 : index
    %6 = vector.load %arg3[%c0_5, %c0_6] : memref<1x512xf32, #tpu.memory_space<vmem>>, vector<1x512xf32>
    %7 = arith.addf %5, %6 : vector<1x512xf32>
    %cst_7 = arith.constant 0.000000e+00 : f32
    %8 = vector.broadcast %cst_7 : f32 to vector<1x512xf32>
    %9 = arith.maximumf %7, %8 : vector<1x512xf32>
    %10 = arith.truncf %9 : vector<1x512xf32> to vector<1x512xbf16>
    %c0_8 = arith.constant 0 : index
    %c0_9 = arith.constant 0 : index
    %11 = vector.load %arg4[%c0_8, %c0_9] : memref<512x128xbf16, #tpu.memory_space<vmem>>, vector<512x128xbf16>
    %cst_10 = arith.constant dense<0.000000e+00> : vector<1x128xf32>
    %12 = tpu.matmul %10, %11, %cst_10 {dimension_numbers = #tpu.dot_dimension_numbers<[1], [0], [0], [1], [0, 0, 1, 1], [], []>} : vector<1x512xbf16>, vector<512x128xbf16>, vector<1x128xf32> -> vector<1x128xf32>
    %c0_11 = arith.constant 0 : index
    %c0_12 = arith.constant 0 : index
    %13 = vector.load %arg5[%c0_11, %c0_12] : memref<1x128xf32, #tpu.memory_space<vmem>>, vector<1x128xf32>
    %14 = arith.addf %12, %13 : vector<1x128xf32>
    %cst_13 = arith.constant 0.000000e+00 : f32
    %15 = vector.broadcast %cst_13 : f32 to vector<1x128xf32>
    %16 = arith.maximumf %14, %15 : vector<1x128xf32>
    %17 = arith.truncf %16 : vector<1x128xf32> to vector<1x128xbf16>
    %c0_14 = arith.constant 0 : index
    %c0_15 = arith.constant 0 : index
    %18 = vector.load %arg6[%c0_14, %c0_15] : memref<128x128xbf16, #tpu.memory_space<vmem>>, vector<128x128xbf16>
    %cst_16 = arith.constant dense<0.000000e+00> : vector<1x128xf32>
    %19 = tpu.matmul %17, %18, %cst_16 {dimension_numbers = #tpu.dot_dimension_numbers<[1], [0], [0], [1], [0, 0, 1, 1], [], []>} : vector<1x128xbf16>, vector<128x128xbf16>, vector<1x128xf32> -> vector<1x128xf32>
    %c0_17 = arith.constant 0 : index
    %c0_18 = arith.constant 0 : index
    %20 = vector.load %arg7[%c0_17, %c0_18] : memref<1x128xf32, #tpu.memory_space<vmem>>, vector<1x128xf32>
    %21 = arith.addf %19, %20 : vector<1x128xf32>
    %cst_19 = arith.constant 0.000000e+00 : f32
    %22 = vector.broadcast %cst_19 : f32 to vector<1x128xf32>
    %23 = arith.maximumf %21, %22 : vector<1x128xf32>
    %24 = arith.truncf %23 : vector<1x128xf32> to vector<1x128xbf16>
    %c0_20 = arith.constant 0 : index
    %c0_21 = arith.constant 0 : index
    %25 = vector.load %arg8[%c0_20, %c0_21] : memref<128x128xbf16, #tpu.memory_space<vmem>>, vector<128x128xbf16>
    %cst_22 = arith.constant dense<0.000000e+00> : vector<1x128xf32>
    %26 = tpu.matmul %24, %25, %cst_22 {dimension_numbers = #tpu.dot_dimension_numbers<[1], [0], [0], [1], [0, 0, 1, 1], [], []>} : vector<1x128xbf16>, vector<128x128xbf16>, vector<1x128xf32> -> vector<1x128xf32>
    %c0_23 = arith.constant 0 : index
    %c0_24 = arith.constant 0 : index
    %27 = vector.load %arg9[%c0_23, %c0_24] : memref<1x128xf32, #tpu.memory_space<vmem>>, vector<1x128xf32>
    %28 = arith.addf %26, %27 : vector<1x128xf32>
    %cst_25 = arith.constant 0.000000e+00 : f32
    %29 = vector.broadcast %cst_25 : f32 to vector<1x128xf32>
    %30 = arith.maximumf %28, %29 : vector<1x128xf32>
    %31 = vector.shape_cast %30 : vector<1x128xf32> to vector<1x128xf32>
    %32 = vector.broadcast %31 : vector<1x128xf32> to vector<8x128xf32>
    %c0_26 = arith.constant 0 : index
    %c0_27 = arith.constant 0 : index
    %c0_28 = arith.constant 0 : index
    %33 = vector.load %arg10[%c0_26, %c0_27, %c0_28] : memref<1x8x128xf32, #tpu.memory_space<vmem>>, vector<1x8x128xf32>
    %34 = vector.shape_cast %33 : vector<1x8x128xf32> to vector<8x128xf32>
    %35 = vector.shape_cast %32 : vector<8x128xf32> to vector<1x8x128xf32>
    tpu.vector_store %arg10[%c0_26, %c0_27, %c0_28], %35 {strides = array<i32>} : memref<1x8x128xf32, #tpu.memory_space<vmem>>, vector<1x8x128xf32>,
    return
  }
  func.func @transform_0(%arg0: i32) -> (i32, i32, i32) {
    %c0_i32 = arith.constant 0 : i32
    %c0_i32_0 = arith.constant 0 : i32
    %c0_i32_1 = arith.constant 0 : i32
    return %arg0, %c0_i32, %c0_i32_0 : i32, i32, i32
  }
  func.func @transform_1(%arg0: i32) -> (i32, i32) {
    %c0_i32 = arith.constant 0 : i32
    %c0_i32_0 = arith.constant 0 : i32
    %c0_i32_1 = arith.constant 0 : i32
    return %c0_i32, %c0_i32_0 : i32, i32
  }
  func.func @transform_2(%arg0: i32) -> (i32, i32) {
    %c0_i32 = arith.constant 0 : i32
    %c0_i32_0 = arith.constant 0 : i32
    %c0_i32_1 = arith.constant 0 : i32
    return %c0_i32, %c0_i32_0 : i32, i32
  }
  func.func @transform_3(%arg0: i32) -> (i32, i32) {
    %c0_i32 = arith.constant 0 : i32
    %c0_i32_0 = arith.constant 0 : i32
    %c0_i32_1 = arith.constant 0 : i32
    return %c0_i32, %c0_i32_0 : i32, i32
  }
  func.func @transform_4(%arg0: i32) -> (i32, i32) {
    %c0_i32 = arith.constant 0 : i32
    %c0_i32_0 = arith.constant 0 : i32
    %c0_i32_1 = arith.constant 0 : i32
    return %c0_i32, %c0_i32_0 : i32, i32
  }
  func.func @transform_5(%arg0: i32) -> (i32, i32) {
    %c0_i32 = arith.constant 0 : i32
    %c0_i32_0 = arith.constant 0 : i32
    %c0_i32_1 = arith.constant 0 : i32
    return %c0_i32, %c0_i32_0 : i32, i32
  }
  func.func @transform_6(%arg0: i32) -> (i32, i32) {
    %c0_i32 = arith.constant 0 : i32
    %c0_i32_0 = arith.constant 0 : i32
    %c0_i32_1 = arith.constant 0 : i32
    return %c0_i32, %c0_i32_0 : i32, i32
  }
  func.func @transform_7(%arg0: i32) -> (i32, i32) {
    %c0_i32 = arith.constant 0 : i32
    %c0_i32_0 = arith.constant 0 : i32
    %c0_i32_1 = arith.constant 0 : i32
    return %c0_i32, %c0_i32_0 : i32, i32
  }
  func.func @transform_8(%arg0: i32) -> (i32, i32) {
    %c0_i32 = arith.constant 0 : i32
    %c0_i32_0 = arith.constant 0 : i32
    %c0_i32_1 = arith.constant 0 : i32
    return %c0_i32, %c0_i32_0 : i32, i32
  }
  func.func @transform_9(%arg0: i32) -> (i32, i32, i32) {
    %c0_i32 = arith.constant 0 : i32
    %c0_i32_0 = arith.constant 0 : i32
    %c0_i32_1 = arith.constant 0 : i32
    return %arg0, %c0_i32, %c0_i32_0 : i32, i32, i32
  }
}

</mosaic_0001>

<bundles_post_ra>
// kernel: gate_cnn_softmax_forward.2
= control target key start
LH: loop header
LB: loop body
LE: loop exit
PB: predicated region body
PF: predicated region fallthrough
CT: control target
= control target key end

     0   :  { %s1916_s12 = smov 0   ;;  %s2205_s0 = inlined_call_operand.vmem [shape: bf16[2,832,128], index: 0, kind: input, shape index: {}]   ;;  %s2206_s1 = inlined_call_operand.vmem [shape: bf16[128,128], index: 1, kind: input, shape index: {}]   ;;  %s2207_s2 = inlined_call_operand.vmem [shape: f32[1,128], index: 2, kind: input, shape index: {}]   ;;  %s2208_s3 = inlined_call_operand.vmem [shape: bf16[2,208,128], index: 3, kind: output, shape index: {}]  }
   0x1 LB: > { %s1423_s13 = sadd.s32 4294967295, %s1894_s12   ;;  %p1427_p0 = scmp.ge.s32.totalorder %s1894_s12, 1  ;;  %s1894_s12 = sphi %s1916_s12, %s13_s12  }
   0x2   : > { %p137_p1 = scmp.lt.s32.totalorder %s1894_s12, 3 }
   0x4   : > { %p138_p2 = pnand %p1427_p0, %p137_p1 }
   0x6   : > { %141 = sbr.rel (%p138_p2) target bundleno = 350 (0x15e), region = 32 }
   0xb   : > { %v1828_v0 = vld [vmem:[%s2206_s1 + $0x38] sm:$0xff]   ;;  %p161_p3 = scmp.lt.s32.totalorder %s1423_s13, 1  ;;  %v1829_v1 = vld [vmem:[%s2206_s1 + $0x30] sm:$0xff]   ;;  %v1830_v2 = vld [vmem:[%s2206_s1 + $0x28] sm:$0xff]  }
   0xc   : > { %1682 = vmatprep.subr.bf16.mxu0 %v1828_v0  ;;  %1802 = vmatprep.subr.bf16.mxu1 %v1828_v0  ;;  %v1831_v3 = vld [vmem:[%s2206_s1 + $0x20] sm:$0xff]   ;;  %v1832_v6 = vld [vmem:[%s2206_s1 + $0x18] sm:$0xff]   ;;  %v1833_v7 = vld [vmem:[%s2206_s1 + $0x10] sm:$0xff]  }
   0xd   : > { %s2212_s13 = smov (!%p161_p3, %s1423_s13), 1  ;;  %1683 = vmatpush3.bf16.msra.mxu0 %v1828_v0  ;;  %1810 = vmatpush3.bf16.msra.mxu1 %v1828_v0  ;;  %v1834_v8 = vld [vmem:[%s2206_s1 + $0x8] sm:$0xff]   ;;  %v1835_v9 = vld [vmem:[%s2206_s1] sm:$0xff]  }
   0xe   : > { %1684 = vmatprep.subr.bf16.mxu0 %v1829_v1  ;;  %1803 = vmatprep.subr.bf16.mxu1 %v1829_v1  ;;  %s1818_s20 = smul.u32 416, %s2212_s13 }
   0xf   : > { %s1819_s9 = smul.u32 104, %s2212_s13 }
  0x10   : > { %s1939_s23 = scalar_lea.vmem %s2205_s0, %s1818_s20 }
  0x11   : > { %1685 = vmatpush3.bf16.msra.mxu0 %v1829_v1  ;;  %1811 = vmatpush3.bf16.msra.mxu1 %v1829_v1  ;;  %v1836_v4 = vld [vmem:[%s1939_s23] sm:$0xff]   ;;  %v1837_v5 = vld [vmem:[%s1939_s23 + $0xd0] sm:$0xff]   ;;  %v1838_v10 = vld [vmem:[%s1939_s23 + $0x8] sm:$0xff]   ;;  %s2119_s13 = scalar_lea.vmem %s2208_s3, %s1819_s9 }
  0x12   : > { %1686 = vmatprep.subr.bf16.mxu0 %v1830_v2  ;;  %1804 = vmatprep.subr.bf16.mxu1 %v1830_v2  ;;  %v1839_v11 = vld [vmem:[%s1939_s23 + $0xd8] sm:$0xff]   ;;  %v1840_v12 = vld [vmem:[%s1939_s23 + $0x10] sm:$0xff]   ;;  %v1841_v13 = vld [vmem:[%s1939_s23 + $0xe0] sm:$0xff]  }
  0x13   : > { %1698 = vmatprep.mubr.bf16.mxu0 %v1836_v4  ;;  %1750 = vmatprep.mubr.bf16.mxu1 %v1837_v5  ;;  %v1842_v14 = vld [vmem:[%s1939_s23 + $0x18] sm:$0xff]   ;;  %v1843_v15 = vld [vmem:[%s1939_s23 + $0xe8] sm:$0xff]   ;;  %v1844_v16 = vld [vmem:[%s1939_s23 + $0x20] sm:$0xff]  }
  0x14   : > { %v1845_v17 = vld [vmem:[%s1939_s23 + $0xf0] sm:$0xff]   ;;  %v1846_v18 = vld [vmem:[%s1939_s23 + $0x28] sm:$0xff]   ;;  %v1847_v19 = vld [vmem:[%s1939_s23 + $0xf8] sm:$0xff]  }
  0x15   : > { %1687 = vmatpush3.bf16.msra.mxu0 %v1830_v2  ;;  %1812 = vmatpush3.bf16.msra.mxu1 %v1830_v2  ;;  %v1848_v20 = vld [vmem:[%s1939_s23 + $0x30] sm:$0xff]   ;;  %v1849_v21 = vld [vmem:[%s1939_s23 + $0x100] sm:$0xff]   ;;  %v1850_v22 = vld [vmem:[%s1939_s23 + $0x38] sm:$0xff]  }
  0x16   : > { %1688 = vmatprep.subr.bf16.mxu0 %v1831_v3  ;;  %1805 = vmatprep.subr.bf16.mxu1 %v1831_v3  ;;  %v1851_v23 = vld [vmem:[%s1939_s23 + $0x108] sm:$0xff]   ;;  %v1852_v24 = vld [vmem:[%s1939_s23 + $0x40] sm:$0xff]   ;;  %v1853_v25 = vld [vmem:[%s1939_s23 + $0x110] sm:$0xff]  }
  0x17   : > { %v1854_v26 = vld [vmem:[%s1939_s23 + $0x48] sm:$0xff]   ;;  %v1855_v27 = vld [vmem:[%s1939_s23 + $0x118] sm:$0xff]   ;;  %v1856_v28 = vld [vmem:[%s1939_s23 + $0x50] sm:$0xff]  }
  0x18   : > { %v1857_v29 = vld [vmem:[%s1939_s23 + $0x120] sm:$0xff]   ;;  %v1858_v30 = vld [vmem:[%s1939_s23 + $0x58] sm:$0xff]   ;;  %v1859_v31 = vld [vmem:[%s1939_s23 + $0x128] sm:$0xff]  }
  0x19   : > { %1689 = vmatpush3.bf16.msra.mxu0 %v1831_v3  ;;  %1813 = vmatpush3.bf16.msra.mxu1 %v1831_v3  ;;  %v1860_v32 = vld [vmem:[%s1939_s23 + $0x60] sm:$0xff]   ;;  %v1861_v33 = vld [vmem:[%s1939_s23 + $0x130] sm:$0xff]   ;;  %v1862_v34 = vld [vmem:[%s1939_s23 + $0x68] sm:$0xff]  }
  0x1a   : > { %1690 = vmatprep.subr.bf16.mxu0 %v1832_v6  ;;  %1806 = vmatprep.subr.bf16.mxu1 %v1832_v6  ;;  %v1863_v35 = vld [vmem:[%s1939_s23 + $0x138] sm:$0xff]   ;;  %v1864_v36 = vld [vmem:[%s1939_s23 + $0x70] sm:$0xff]   ;;  %v1865_v37 = vld [vmem:[%s1939_s23 + $0x140] sm:$0xff]  }
  0x1b   : > { %v1866_v38 = vld [vmem:[%s1939_s23 + $0x78] sm:$0xff]   ;;  %v1867_v39 = vld [vmem:[%s1939_s23 + $0x148] sm:$0xff]   ;;  %v1868_v40 = vld [vmem:[%s1939_s23 + $0x80] sm:$0xff]  }
  0x1c   : > { %v1869_v41 = vld [vmem:[%s1939_s23 + $0x150] sm:$0xff]   ;;  %v1870_v42 = vld [vmem:[%s1939_s23 + $0x88] sm:$0xff]   ;;  %v1871_v43 = vld [vmem:[%s1939_s23 + $0x158] sm:$0xff]  }
  0x1d   : > { %1691 = vmatpush3.bf16.msra.mxu0 %v1832_v6  ;;  %1814 = vmatpush3.bf16.msra.mxu1 %v1832_v6  ;;  %v1872_v44 = vld [vmem:[%s1939_s23 + $0x90] sm:$0xff]   ;;  %v1873_v45 = vld [vmem:[%s1939_s23 + $0x160] sm:$0xff]   ;;  %v1874_v46 = vld [vmem:[%s1939_s23 + $0x98] sm:$0xff]  }
  0x1e   : > { %1692 = vmatprep.subr.bf16.mxu0 %v1833_v7  ;;  %1807 = vmatprep.subr.bf16.mxu1 %v1833_v7  ;;  %v1875_v47 = vld [vmem:[%s1939_s23 + $0x168] sm:$0xff]   ;;  %v1876_v48 = vld [vmem:[%s1939_s23 + $0xa0] sm:$0xff]   ;;  %v1877_v49 = vld [vmem:[%s1939_s23 + $0x170] sm:$0xff]  }
  0x1f   : > { %v1878_v50 = vld [vmem:[%s1939_s23 + $0xa8] sm:$0xff]   ;;  %v1879_v51 = vld [vmem:[%s1939_s23 + $0x178] sm:$0xff]   ;;  %v1880_v52 = vld [vmem:[%s1939_s23 + $0xb0] sm:$0xff]  }
  0x20   : > { %v1881_v53 = vld [vmem:[%s1939_s23 + $0x180] sm:$0xff]   ;;  %v1882_v54 = vld [vmem:[%s1939_s23 + $0xb8] sm:$0xff]   ;;  %v1883_v55 = vld [vmem:[%s1939_s23 + $0x188] sm:$0xff]  }
  0x21   : > { %1693 = vmatpush3.bf16.msra.mxu0 %v1833_v7  ;;  %1815 = vmatpush3.bf16.msra.mxu1 %v1833_v7  ;;  %v1884_v56 = vld [vmem:[%s1939_s23 + $0xc0] sm:$0xff]   ;;  %v1885_v57 = vld [vmem:[%s1939_s23 + $0x190] sm:$0xff]   ;;  %v1886_v58 = vld [vmem:[%s1939_s23 + $0xc8] sm:$0xff]  }
  0x22   : > { %1694 = vmatprep.subr.bf16.mxu0 %v1834_v8  ;;  %1808 = vmatprep.subr.bf16.mxu1 %v1834_v8  ;;  %v1887_v59 = vld [vmem:[%s1939_s23 + $0x198] sm:$0xff]  }
  0x25   : > { %1695 = vmatpush3.bf16.msra.mxu0 %v1834_v8  ;;  %1816 = vmatpush3.bf16.msra.mxu1 %v1834_v8 }
  0x26   : > { %1696 = vmatprep.subr.bf16.mxu0 %v1835_v9  ;;  %1809 = vmatprep.subr.bf16.mxu1 %v1835_v9 }
  0x29   : > { %1697 = vmatpush3.bf16.msra.mxu0 %v1835_v9  ;;  %1817 = vmatpush3.bf16.msra.mxu1 %v1835_v9 }
  0x2c   : > { %1699 = vmatmul.mubr.bf16.vlgmr.msra.gmra.mxu0 %v1838_v10  ;;  %1751 = vmatmul.mubr.bf16.vlgmr.msra.gmra.mxu1 %v1839_v11 }
  0x2d   : > { %1702 = vmatprep.mubr.bf16.mxu0 %v1840_v12  ;;  %1754 = vmatprep.mubr.bf16.mxu1 %v1841_v13 }
  0x34   : > { %1703 = vmatmul.mubr.bf16.gmra.mxu0 %v1842_v14  ;;  %1755 = vmatmul.mubr.bf16.gmra.mxu1 %v1843_v15 }
  0x35   : > { %1706 = vmatprep.mubr.bf16.mxu0 %v1844_v16  ;;  %1758 = vmatprep.mubr.bf16.mxu1 %v1845_v17 }
  0x3c   : > { %1707 = vmatmul.mubr.bf16.gmra.mxu0 %v1846_v18  ;;  %1759 = vmatmul.mubr.bf16.gmra.mxu1 %v1847_v19 }
  0x3d   : > { %1710 = vmatprep.mubr.bf16.mxu0 %v1848_v20  ;;  %1762 = vmatprep.mubr.bf16.mxu1 %v1849_v21 }
  0x44   : > { %1711 = vmatmul.mubr.bf16.gmra.mxu0 %v1850_v22  ;;  %1763 = vmatmul.mubr.bf16.gmra.mxu1 %v1851_v23 }
  0x45   : > { %1714 = vmatprep.mubr.bf16.mxu0 %v1852_v24  ;;  %1766 = vmatprep.mubr.bf16.mxu1 %v1853_v25 }
  0x4c   : > { %1715 = vmatmul.mubr.bf16.gmra.mxu0 %v1854_v26  ;;  %1767 = vmatmul.mubr.bf16.gmra.mxu1 %v1855_v27 }
  0x4d   : > { %1718 = vmatprep.mubr.bf16.mxu0 %v1856_v28  ;;  %1770 = vmatprep.mubr.bf16.mxu1 %v1857_v29 }
  0x54   : > { %1719 = vmatmul.mubr.bf16.gmra.mxu0 %v1858_v30  ;;  %1771 = vmatmul.mubr.bf16.gmra.mxu1 %v1859_v31 }
  0x55   : > { %1722 = vmatprep.mubr.bf16.mxu0 %v1860_v32  ;;  %1774 = vmatprep.mubr.bf16.mxu1 %v1861_v33 }
  0x5c   : > { %1723 = vmatmul.mubr.bf16.gmra.mxu0 %v1862_v34  ;;  %1775 = vmatmul.mubr.bf16.gmra.mxu1 %v1863_v35 }
  0x5d   : > { %1726 = vmatprep.mubr.bf16.mxu0 %v1864_v36  ;;  %1778 = vmatprep.mubr.bf16.mxu1 %v1865_v37 }
  0x64   : > { %1727 = vmatmul.mubr.bf16.gmra.mxu0 %v1866_v38  ;;  %1779 = vmatmul.mubr.bf16.gmra.mxu1 %v1867_v39 }
  0x65   : > { %1730 = vmatprep.mubr.bf16.mxu0 %v1868_v40  ;;  %1782 = vmatprep.mubr.bf16.mxu1 %v1869_v41 }
  0x6c   : > { %1731 = vmatmul.mubr.bf16.gmra.mxu0 %v1870_v42  ;;  %1783 = vmatmul.mubr.bf16.gmra.mxu1 %v1871_v43 }
  0x6d   : > { %1734 = vmatprep.mubr.bf16.mxu0 %v1872_v44  ;;  %1786 = vmatprep.mubr.bf16.mxu1 %v1873_v45 }
  0x74   : > { %1735 = vmatmul.mubr.bf16.gmra.mxu0 %v1874_v46  ;;  %1787 = vmatmul.mubr.bf16.gmra.mxu1 %v1875_v47 }
  0x75   : > { %1738 = vmatprep.mubr.bf16.mxu0 %v1876_v48  ;;  %1790 = vmatprep.mubr.bf16.mxu1 %v1877_v49 }
  0x7c   : > { %1739 = vmatmul.mubr.bf16.gmra.mxu0 %v1878_v50  ;;  %1791 = vmatmul.mubr.bf16.gmra.mxu1 %v1879_v51  ;;  %v2103_v51 = vld [vmem:[%s2207_s2] ss:$0 sm:$0xff] }
  0x7d   : > { %1742 = vmatprep.mubr.bf16.mxu0 %v1880_v52  ;;  %1794 = vmatprep.mubr.bf16.mxu1 %v1881_v53 }
  0x84   : > { %1743 = vmatmul.mubr.bf16.gmra.mxu0 %v1882_v54  ;;  %1795 = vmatmul.mubr.bf16.gmra.mxu1 %v1883_v55 }
  0x85   : > { %1746 = vmatprep.mubr.bf16.mxu0 %v1884_v56  ;;  %1798 = vmatprep.mubr.bf16.mxu1 %v1885_v57 }
  0x8c   : > { %1747 = vmatmul.mubr.bf16.gmra.mxu0 %v1886_v58  ;;  %1799 = vmatmul.mubr.bf16.gmra.mxu1 %v1887_v59 }
  0xec   : > { %v2008_v60 = vpop.f32.mrf.mxu0  ;;  %v2010_v61 = vpop.f32.mrf.mxu1 }
  0xee   : > { %v686_v62 = vpop.f32.mrf.mxu0  ;;  %v894_v63 = vpop.f32.mrf.mxu1 }
  0xf0   : > { %v2012_v0 = vpop.f32.mrf.mxu0  ;;  %v2014_v1 = vpop.f32.mrf.mxu1 }
  0xf2   : > { %v689_v2 = vpop.f32.mrf.mxu0  ;;  %v897_v3 = vpop.f32.mrf.mxu1 }
  0xf4   : > { %v2016_v4 = vpop.f32.mrf.mxu0  ;;  %v2018_v5 = vpop.f32.mrf.mxu1 }
  0xf6   : > { %v2020_v6 = vpop.f32.mrf.mxu0  ;;  %v2022_v7 = vpop.f32.mrf.mxu1 }
  0xf8   : > { %v2024_v8 = vpop.f32.mrf.mxu0  ;;  %v2026_v9 = vpop.f32.mrf.mxu1 }
  0xfa   : > { %v2028_v10 = vpop.f32.mrf.mxu0  ;;  %v2030_v11 = vpop.f32.mrf.mxu1 }
  0xfc   : > { %v2032_v12 = vpop.f32.mrf.mxu0  ;;  %v2034_v13 = vpop.f32.mrf.mxu1 }
  0xfe   : > { %v2036_v14 = vpop.f32.mrf.mxu0  ;;  %v2038_v15 = vpop.f32.mrf.mxu1 }
 0x100   : > { %v2040_v16 = vpop.f32.mrf.mxu0  ;;  %v2042_v17 = vpop.f32.mrf.mxu1 }
 0x102   : > { %v2044_v18 = vpop.f32.mrf.mxu0  ;;  %v2046_v19 = vpop.f32.mrf.mxu1 }
 0x104   : > { %v2048_v20 = vpop.f32.mrf.mxu0  ;;  %v2050_v21 = vpop.f32.mrf.mxu1 }
 0x106   : > { %v2052_v22 = vpop.f32.mrf.mxu0  ;;  %v2054_v23 = vpop.f32.mrf.mxu1 }
 0x108   : > { %v2056_v24 = vpop.f32.mrf.mxu0  ;;  %v2058_v25 = vpop.f32.mrf.mxu1 }
 0x10a   : > { %v2060_v26 = vpop.f32.mrf.mxu0  ;;  %v2062_v27 = vpop.f32.mrf.mxu1 }
 0x10c   : > { %v2064_v28 = vpop.f32.mrf.mxu0  ;;  %v2066_v29 = vpop.f32.mrf.mxu1 }
 0x10e   : > { %v2068_v30 = vpop.f32.mrf.mxu0  ;;  %v2070_v31 = vpop.f32.mrf.mxu1 }
 0x110   : > { %v2072_v32 = vpop.f32.mrf.mxu0  ;;  %v2074_v33 = vpop.f32.mrf.mxu1 }
 0x112   : > { %v2076_v34 = vpop.f32.mrf.mxu0  ;;  %v2078_v35 = vpop.f32.mrf.mxu1 }
 0x114   : > { %v2080_v36 = vpop.f32.mrf.mxu0  ;;  %v2082_v37 = vpop.f32.mrf.mxu1 }
 0x116   : > { %v2084_v38 = vpop.f32.mrf.mxu0  ;;  %v2086_v39 = vpop.f32.mrf.mxu1 }
 0x118   : > { %v2088_v40 = vpop.f32.mrf.mxu0  ;;  %v2090_v41 = vpop.f32.mrf.mxu1 }
 0x119   : > { %2209 = vst [vmem:[#allocation2_spill] sm:$0xff] %v2090_v41 }
 0x11a   : > { %v2092_v42 = vpop.f32.mrf.mxu0  ;;  %v2094_v43 = vpop.f32.mrf.mxu1 }
 0x11c   : > { %v1724_v44 = vpop.f32.mrf.mxu0  ;;  %v1776_v45 = vpop.f32.mrf.mxu1 }
 0x11d   : > { %v1101_v46 = vmax.f32 %v686_v62, %v1724_v44  ;;  %v1127_v47 = vmax.f32 %v894_v63, %v1776_v45 }
 0x11e   : > { %v2096_v48 = vpop.f32.mrf.mxu0  ;;  %v2098_v49 = vpop.f32.mrf.mxu1 }
 0x11f   : > { %v1153_v50 = vmax.f32 %v1101_v46, %v1127_v47 }
 0x120   : > { %v1725_v52 = vpop.f32.mrf.mxu0  ;;  %v1777_v53 = vpop.f32.mrf.mxu1 }
 0x121   : > { %v1102_v54 = vmax.f32 %v689_v2, %v1725_v52  ;;  %v1128_v55 = vmax.f32 %v897_v3, %v1777_v53  ;;  %v1186_v58 = vadd.f32 %v2103_v51, %v1153_v50 }
 0x122   : > { %v2105_v56 = vpop.f32.mrf.mxu0  ;;  %v2107_v57 = vpop.f32.mrf.mxu1 }
 0x123   : > { %v1154_v59 = vmax.f32 %v1102_v54, %v1128_v55  ;;  %v1212_v2 = vmax.f32 %v1186_v58, 0.0 }
 0x124   : > { %v1728_v62 = vpop.f32.mrf.mxu0  ;;  %v1780_v63 = vpop.f32.mrf.mxu1 }
 0x125   : > { %v1187_v44 = vadd.f32 %v2103_v51, %v1154_v59  ;;  %v1105_v45 = vmax.f32 %v2020_v6, %v1728_v62  ;;  %v1131_v46 = vmax.f32 %v2022_v7, %v1780_v63 }
 0x126   : > { %v798_v47 = vpop.f32.mrf.mxu0  ;;  %v1006_v41 = vpop.f32.mrf.mxu1 }
 0x127   : > { %v1213_v3 = vmax.f32 %v1187_v44, 0.0  ;;  %v1103_v52 = vmax.f32 %v2008_v60, %v798_v47  ;;  %v1129_v53 = vmax.f32 %v2010_v61, %v1006_v41  ;;  %v1157_v50 = vmax.f32 %v1105_v45, %v1131_v46 }
 0x128   : > { %v1729_v54 = vpop.f32.mrf.mxu0  ;;  %v1781_v55 = vpop.f32.mrf.mxu1 }
 0x129   : > { %v1548_v6 = vpack.c.bf16 %v1213_v3, %v1212_v2  ;;  %v1155_v59 = vmax.f32 %v1103_v52, %v1129_v53  ;;  %v1106_v7 = vmax.f32 %v2028_v10, %v1729_v54  ;;  %v1132_v58 = vmax.f32 %v2030_v11, %v1781_v55 }
 0x12a   : > { %v801_v62 = vpop.f32.mrf.mxu0  ;;  %v1009_v63 = vpop.f32.mrf.mxu1  ;;  %v1190_v41 = vadd.f32 %v2103_v51, %v1157_v50 }
 0x12b   : > { %1549 = vst [vmem:[%s2119_s13] sm:$0xff] %v1548_v6   ;;  %v1104_v60 = vmax.f32 %v2012_v0, %v801_v62  ;;  %v1130_v61 = vmax.f32 %v2014_v1, %v1009_v63  ;;  %v1158_v44 = vmax.f32 %v1106_v7, %v1132_v58  ;;  %v1188_v46 = vadd.f32 %v2103_v51, %v1155_v59 }
 0x12c   : > { %v1732_v47 = vpop.f32.mrf.mxu0  ;;  %v1784_v45 = vpop.f32.mrf.mxu1  ;;  %v1216_v54 = vmax.f32 %v1190_v41, 0.0 }
 0x12d   : > { %v1156_v2 = vmax.f32 %v1104_v60, %v1130_v61  ;;  %v1109_v3 = vmax.f32 %v2036_v14, %v1732_v47  ;;  %v1135_v10 = vmax.f32 %v2038_v15, %v1784_v45  ;;  %v1191_v11 = vadd.f32 %v2103_v51, %v1158_v44 }
 0x12e   : > { %v814_v52 = vpop.f32.mrf.mxu0  ;;  %v1022_v53 = vpop.f32.mrf.mxu1  ;;  %v1214_v58 = vmax.f32 %v1188_v46, 0.0 }
 0x12f   : > { %v1189_v0 = vadd.f32 %v2103_v51, %v1156_v2  ;;  %v1107_v1 = vmax.f32 %v2016_v4, %v814_v52  ;;  %v1133_v50 = vmax.f32 %v2018_v5, %v1022_v53  ;;  %v1217_v55 = vmax.f32 %v1191_v11, 0.0 }
 0x130   : > { %v1161_v6 = vmax.f32 %v1109_v3, %v1135_v10  ;;  %v1733_v59 = vpop.f32.mrf.mxu0  ;;  %v1785_v7 = vpop.f32.mrf.mxu1 }
 0x131   : > { %v1215_v14 = vmax.f32 %v1189_v0, 0.0  ;;  %v1110_v15 = vmax.f32 %v2044_v18, %v1733_v59  ;;  %v1558_v62 = vpack.c.bf16 %v1217_v55, %v1216_v54  ;;  %v1159_v63 = vmax.f32 %v1107_v1, %v1133_v50 }
 0x132   : > { %v1136_v60 = vmax.f32 %v2046_v19, %v1785_v7  ;;  %v817_v61 = vpop.f32.mrf.mxu0  ;;  %v1025_v44 = vpop.f32.mrf.mxu1  ;;  %v1194_v41 = vadd.f32 %v2103_v51, %v1161_v6 }
 0x133   : > { %v1553_v4 = vpack.c.bf16 %v1215_v14, %v1214_v58  ;;  %v1108_v5 = vmax.f32 %v2024_v8, %v817_v61  ;;  %1611 = vst [vmem:[%s2119_s13 + $0x10] sm:$0xff] %v1558_v62   ;;  %v1134_v45 = vmax.f32 %v2026_v9, %v1025_v44  ;;  %v1192_v19 = vadd.f32 %v2103_v51, %v1159_v63 }
 0x134   : > { %v1162_v47 = vmax.f32 %v1110_v15, %v1136_v60  ;;  %v1736_v46 = vpop.f32.mrf.mxu0  ;;  %v1788_v2 = vpop.f32.mrf.mxu1  ;;  %v1220_v9 = vmax.f32 %v1194_v41, 0.0 }
 0x135   : > { %1610 = vst [vmem:[%s2119_s13 + $0x8] sm:$0xff] %v1553_v4   ;;  %v1113_v18 = vmax.f32 %v2052_v22, %v1736_v46  ;;  %v1139_v3 = vmax.f32 %v2054_v23, %v1788_v2  ;;  %v1160_v11 = vmax.f32 %v1108_v5, %v1134_v45  ;;  %v1218_v59 = vmax.f32 %v1192_v19, 0.0 }
 0x136   : > { %v1195_v10 = vadd.f32 %v2103_v51, %v1162_v47  ;;  %v830_v52 = vpop.f32.mrf.mxu0  ;;  %v1038_v8 = vpop.f32.mrf.mxu1 }
 0x137   : > { %v1165_v53 = vmax.f32 %v1113_v18, %v1139_v3  ;;  %v1111_v0 = vmax.f32 %v2032_v12, %v830_v52  ;;  %v1137_v1 = vmax.f32 %v2034_v13, %v1038_v8  ;;  %v1193_v54 = vadd.f32 %v2103_v51, %v1160_v11 }
 0x138   : > { %v1221_v50 = vmax.f32 %v1195_v10, 0.0  ;;  %v1737_v22 = vpop.f32.mrf.mxu0  ;;  %v1789_v55 = vpop.f32.mrf.mxu1 }
 0x139   : > { %v1114_v23 = vmax.f32 %v2060_v26, %v1737_v22  ;;  %v1140_v6 = vmax.f32 %v2062_v27, %v1789_v55  ;;  %v1219_v58 = vmax.f32 %v1193_v54, 0.0  ;;  %v1163_v14 = vmax.f32 %v1111_v0, %v1137_v1 }
 0x13a   : > { %v1568_v7 = vpack.c.bf16 %v1221_v50, %v1220_v9  ;;  %v833_v15 = vpop.f32.mrf.mxu0  ;;  %v1041_v12 = vpop.f32.mrf.mxu1  ;;  %v1198_v13 = vadd.f32 %v2103_v51, %v1165_v53 }
 0x13b   : > { %v1166_v62 = vmax.f32 %v1114_v23, %v1140_v6  ;;  %v1112_v63 = vmax.f32 %v2040_v16, %v833_v15  ;;  %v1563_v60 = vpack.c.bf16 %v1219_v58, %v1218_v59  ;;  %v1138_v61 = vmax.f32 %v2042_v17, %v1041_v12 }
 0x13c   : > { %1613 = vst [vmem:[%s2119_s13 + $0x20] sm:$0xff] %v1568_v7   ;;  %v1740_v44 = vpop.f32.mrf.mxu0  ;;  %v1792_v26 = vpop.f32.mrf.mxu1  ;;  %v1196_v41 = vadd.f32 %v2103_v51, %v1163_v14  ;;  %v1224_v2 = vmax.f32 %v1198_v13, 0.0 }
 0x13d   : > { %v1199_v27 = vadd.f32 %v2103_v51, %v1166_v62  ;;  %v1117_v4 = vmax.f32 %v2068_v30, %v1740_v44  ;;  %v1143_v5 = vmax.f32 %v2070_v31, %v1792_v26  ;;  %1612 = vst [vmem:[%s2119_s13 + $0x18] sm:$0xff] %v1563_v60   ;;  %v1164_v47 = vmax.f32 %v1112_v63, %v1138_v61 }
 0x13e   : > { %v846_v45 = vpop.f32.mrf.mxu0  ;;  %v1054_v46 = vpop.f32.mrf.mxu1  ;;  %v1222_v8 = vmax.f32 %v1196_v41, 0.0 }
 0x13f   : > { %v1225_v16 = vmax.f32 %v1199_v27, 0.0  ;;  %v1115_v18 = vmax.f32 %v2048_v20, %v846_v45  ;;  %v1141_v17 = vmax.f32 %v2050_v21, %v1054_v46  ;;  %v1197_v3 = vadd.f32 %v2103_v51, %v1164_v47 }
 0x140   : > { %v1169_v19 = vmax.f32 %v1117_v4, %v1143_v5  ;;  %v1741_v10 = vpop.f32.mrf.mxu0  ;;  %v1793_v30 = vpop.f32.mrf.mxu1 }
 0x141   : > { %v1578_v11 = vpack.c.bf16 %v1225_v16, %v1224_v2  ;;  %v1167_v31 = vmax.f32 %v1115_v18, %v1141_v17  ;;  %v1118_v52 = vmax.f32 %v2076_v34, %v1741_v10  ;;  %v1223_v53 = vmax.f32 %v1197_v3, 0.0 }
 0x142   : > { %v1144_v0 = vmax.f32 %v2078_v35, %v1793_v30  ;;  %v849_v1 = vpop.f32.mrf.mxu0  ;;  %v1057_v9 = vpop.f32.mrf.mxu1  ;;  %v1202_v54 = vadd.f32 %v2103_v51, %v1169_v19 }
 0x143   : > { %1615 = vst [vmem:[%s2119_s13 + $0x30] sm:$0xff] %v1578_v11   ;;  %v1116_v20 = vmax.f32 %v2056_v24, %v849_v1  ;;  %v1142_v21 = vmax.f32 %v2058_v25, %v1057_v9  ;;  %v1573_v50 = vpack.c.bf16 %v1223_v53, %v1222_v8  ;;  %v1200_v34 = vadd.f32 %v2103_v51, %v1167_v31 }
 0x144   : > { %v1170_v22 = vmax.f32 %v1118_v52, %v1144_v0  ;;  %v1744_v55 = vpop.f32.mrf.mxu0  ;;  %v1796_v23 = vpop.f32.mrf.mxu1  ;;  %v1228_v12 = vmax.f32 %v1202_v54, 0.0 }
 0x145   : > { %v1168_v6 = vmax.f32 %v1116_v20, %v1142_v21  ;;  %v1121_v59 = vmax.f32 %v2084_v38, %v1744_v55  ;;  %v1147_v35 = vmax.f32 %v2086_v39, %v1796_v23  ;;  %1614 = vst [vmem:[%s2119_s13 + $0x28] sm:$0xff] %v1573_v50   ;;  %v1226_v38 = vmax.f32 %v1200_v34, 0.0 }
 0x146   : > { %v1203_v7 = vadd.f32 %v2103_v51, %v1170_v22  ;;  %v862_v58 = vpop.f32.mrf.mxu0  ;;  %v1070_v24 = vpop.f32.mrf.mxu1  ;;  %v2210_v22 = vld [vmem:[#allocation2_spill] sm:$0xff] }
 0x147   : > { %v1201_v25 = vadd.f32 %v2103_v51, %v1168_v6  ;;  %v1119_v14 = vmax.f32 %v2064_v28, %v862_v58  ;;  %v1145_v15 = vmax.f32 %v2066_v29, %v1070_v24  ;;  %v1173_v62 = vmax.f32 %v1121_v59, %v1147_v35 }
 0x148   : > { %v1229_v13 = vmax.f32 %v1203_v7, 0.0  ;;  %v1745_v63 = vpop.f32.mrf.mxu0  ;;  %v1797_v60 = vpop.f32.mrf.mxu1 }
 0x149   : > { %v1227_v39 = vmax.f32 %v1201_v25, 0.0  ;;  %v1122_v61 = vmax.f32 %v2092_v42, %v1745_v63  ;;  %v1171_v26 = vmax.f32 %v1119_v14, %v1145_v15  ;;  %v1148_v27 = vmax.f32 %v2094_v43, %v1797_v60 }
 0x14a   : > { %v1588_v44 = vpack.c.bf16 %v1229_v13, %v1228_v12  ;;  %v865_v4 = vpop.f32.mrf.mxu0  ;;  %v1073_v5 = vpop.f32.mrf.mxu1  ;;  %v1206_v41 = vadd.f32 %v2103_v51, %v1173_v62 }
 0x14b   : > { %v1583_v28 = vpack.c.bf16 %v1227_v39, %v1226_v38  ;;  %v1120_v29 = vmax.f32 %v2072_v32, %v865_v4  ;;  %v1174_v47 = vmax.f32 %v1122_v61, %v1148_v27  ;;  %v1146_v45 = vmax.f32 %v2074_v33, %v1073_v5 }
 0x14c   : > { %1617 = vst [vmem:[%s2119_s13 + $0x40] sm:$0xff] %v1588_v44   ;;  %v1748_v46 = vpop.f32.mrf.mxu0  ;;  %v1800_v2 = vpop.f32.mrf.mxu1  ;;  %v1204_v43 = vadd.f32 %v2103_v51, %v1171_v26  ;;  %v1232_v33 = vmax.f32 %v1206_v41, 0.0 }
 0x14d   : > { %1616 = vst [vmem:[%s2119_s13 + $0x38] sm:$0xff] %v1583_v28   ;;  %v1125_v42 = vmax.f32 %v2096_v48, %v1748_v46  ;;  %v1151_v16 = vmax.f32 %v2098_v49, %v1800_v2  ;;  %v1207_v18 = vadd.f32 %v2103_v51, %v1174_v47  ;;  %v1172_v17 = vmax.f32 %v1120_v29, %v1146_v45 }
 0x14e   : > { %v878_v3 = vpop.f32.mrf.mxu0  ;;  %v1086_v32 = vpop.f32.mrf.mxu1  ;;  %v1230_v53 = vmax.f32 %v1204_v43, 0.0 }
 0x14f   : > { %v1177_v19 = vmax.f32 %v1125_v42, %v1151_v16  ;;  %v1123_v10 = vmax.f32 %v2080_v36, %v878_v3  ;;  %v1149_v30 = vmax.f32 %v2082_v37, %v1086_v32  ;;  %v1233_v11 = vmax.f32 %v1207_v18, 0.0 }
 0x150   : > { %v1205_v31 = vadd.f32 %v2103_v51, %v1172_v17  ;;  %v1749_v48 = vpop.f32.mrf.mxu0  ;;  %v1801_v52 = vpop.f32.mrf.mxu1 }
 0x151   : > { %v1126_v49 = vmax.f32 %v2105_v56, %v1749_v48  ;;  %v1152_v8 = vmax.f32 %v2107_v57, %v1801_v52  ;;  %v1598_v0 = vpack.c.bf16 %v1233_v11, %v1232_v33  ;;  %v1175_v9 = vmax.f32 %v1123_v10, %v1149_v30 }
 0x152   : > { %v1231_v1 = vmax.f32 %v1205_v31, 0.0  ;;  %v881_v20 = vpop.f32.mrf.mxu0  ;;  %v1089_v36 = vpop.f32.mrf.mxu1  ;;  %v1210_v37 = vadd.f32 %v2103_v51, %v1177_v19 }
 0x153   : > { %v1178_v21 = vmax.f32 %v1126_v49, %v1152_v8  ;;  %v1124_v50 = vmax.f32 %v2088_v40, %v881_v20  ;;  %1619 = vst [vmem:[%s2119_s13 + $0x50] sm:$0xff] %v1598_v0   ;;  %v1150_v55 = vmax.f32 %v2210_v22, %v1089_v36  ;;  %v1208_v57 = vadd.f32 %v2103_v51, %v1175_v9 }
 0x154   : > { %v1593_v54 = vpack.c.bf16 %v1231_v1, %v1230_v53  ;;  %v1236_v34 = vmax.f32 %v1210_v37, 0.0 }
 0x155   : > { %v1211_v56 = vadd.f32 %v2103_v51, %v1178_v21  ;;  %v1176_v23 = vmax.f32 %v1124_v50, %v1150_v55  ;;  %v1234_v7 = vmax.f32 %v1208_v57, 0.0 }
 0x156   : > { %1618 = vst [vmem:[%s2119_s13 + $0x48] sm:$0xff] %v1593_v54  }
 0x157   : > { %v1237_v6 = vmax.f32 %v1211_v56, 0.0  ;;  %v1209_v59 = vadd.f32 %v2103_v51, %v1176_v23 }
 0x159   : > { %v1608_v35 = vpack.c.bf16 %v1237_v6, %v1236_v34  ;;  %v1235_v58 = vmax.f32 %v1209_v59, 0.0 }
 0x15b   : > { %1621 = vst [vmem:[%s2119_s13 + $0x60] sm:$0xff] %v1608_v35   ;;  %v1603_v40 = vpack.c.bf16 %v1235_v58, %v1234_v7 }
 0x15d   : > { %1620 = vst [vmem:[%s2119_s13 + $0x58] sm:$0xff] %v1603_v40  }
 0x15e PF: > { %s13_s12 = sadd.s32 1, %s1894_s12  }
 0x15f   : > { %p10_p4 = scmp.ge.s32.totalorder %s13_s12, 4  }
 0x161   :  { %12 = sbr.rel (!%p10_p4) target bundleno = 1 (0x1), region = 62 }

// kernel: gate_cnn_softmax_forward.3
= control target key start
LH: loop header
LB: loop body
LE: loop exit
PB: predicated region body
PF: predicated region fallthrough
CT: control target
= control target key end

     0   :  { %s10848_s30 = smov 0   ;;  %s14232_s0 = inlined_call_operand.vmem [shape: bf16[2,8,3840], index: 0, kind: input, shape index: {}]   ;;  %s14233_s1 = inlined_call_operand.vmem [shape: bf16[3840,512], index: 1, kind: input, shape index: {}]   ;;  %s14234_s2 = inlined_call_operand.vmem [shape: f32[1,512], index: 2, kind: input, shape index: {}]   ;;  %s14235_s3 = inlined_call_operand.vmem [shape: bf16[512,128], index: 3, kind: input, shape index: {}]   ;;  %s14236_s4 = inlined_call_operand.vmem [shape: f32[1,128], index: 4, kind: input, shape index: {}]   ;;  %s14237_s5 = inlined_call_operand.vmem [shape: bf16[128,128], index: 5, kind: input, shape index: {}]   ;;  %s14238_s6 = inlined_call_operand.vmem [shape: f32[1,128], index: 6, kind: input, shape index: {}]   ;;  %s14239_s7 = inlined_call_operand.vmem [shape: bf16[128,128], index: 7, kind: input, shape index: {}]   ;;  %s14240_s8 = inlined_call_operand.vmem [shape: f32[1,128], index: 8, kind: input, shape index: {}]   ;;  %s14241_s9 = inlined_call_operand.vmem [shape: f32[2,8,128], index: 9, kind: output, shape index: {}]  }
   0x1 LB: > { %s8110_s10 = sadd.s32 4294967295, %s10794_s30   ;;  %p8114_p0 = scmp.ge.s32.totalorder %s10794_s30, 1  ;;  %s10794_s30 = sphi %s10848_s30, %s19_s30  }
   0x2   : > { %p287_p1 = scmp.lt.s32.totalorder %s10794_s30, 3 }
   0x4   : > { %p288_p2 = pnand %p8114_p0, %p287_p1 }
   0x5   : > { %p322_p3 = scmp.lt.s32.totalorder (!%p288_p2), %s8110_s10, 1 }
   0x6   : > { %291 = sbr.rel (%p288_p2) target bundleno = 1792 (0x700), region = 56 }
   0xb   : > { %v9270_v0 = vld [vmem:[%s14233_s1 + $0xe4] ss:$16 sps:$4 sm:$0xff]   ;;  %v9274_v2 = vld [vmem:[%s14233_s1 + $0xe0] ss:$16 sps:$4 sm:$0xff]   ;;  %s14243_s10 = smov (!%p322_p3, %s8110_s10), 1  ;;  %vm10797_vm0 = vmmov 0  }
   0xc   : > { %v9272_v1 = vld [vmem:[%s14233_s1 + $0x2e4] ss:$16 sps:$4 sm:$0xff]   ;;  %6212 = vmatprep.subr.bf16.mxu0 %v9270_v0  ;;  %v9275_v3 = vld [vmem:[%s14233_s1 + $0x2e0] ss:$16 sps:$4 sm:$0xff]   ;;  %s9259_s13 = smul.u32 120, %s14243_s10 }
   0xd   : > { %6253 = vmatprep.subr.bf16.mxu1 %v9272_v1  ;;  %v9276_v4 = vld [vmem:[%s14233_s1 + $0xc4] ss:$16 sps:$4 sm:$0xff]   ;;  %6213 = vmatpush1.bf16.msra.mxu0 %v9274_v2  ;;  %v9280_v6 = vld [vmem:[%s14233_s1 + $0xc0] ss:$16 sps:$4 sm:$0xff]  }
   0xe   : > { %6254 = vmatpush1.bf16.msra.mxu1 %v9275_v3  ;;  %v9278_v5 = vld [vmem:[%s14233_s1 + $0x2c4] ss:$16 sps:$4 sm:$0xff]   ;;  %6214 = vmatprep.subr.bf16.mxu0 %v9276_v4  ;;  %v9281_v7 = vld [vmem:[%s14233_s1 + $0x2c0] ss:$16 sps:$4 sm:$0xff]   ;;  %s10998_s26 = scalar_lea.vmem %s14232_s0, %s9259_s13  ;;  %s8116_s13 = sshll.u32 %s14243_s10, 3 }
   0xf   : > { %6255 = vmatprep.subr.bf16.mxu1 %v9278_v5  ;;  %v9282_v8 = vld [vmem:[%s14233_s1 + $0xa4] ss:$16 sps:$4 sm:$0xff]   ;;  %v9286_v10 = vld [vmem:[%s14233_s1 + $0xa0] ss:$16 sps:$4 sm:$0xff]   ;;  %v333_v48 = vld [vmem:[%s10998_s26 + $0x8] sm:$0xff]  ;;  %s330_s15 = scalar_lea.vmem %s14241_s9, %s8116_s13 }
  0x10   : > { %v9284_v9 = vld [vmem:[%s14233_s1 + $0x2a4] ss:$16 sps:$4 sm:$0xff]   ;;  %v9287_v11 = vld [vmem:[%s14233_s1 + $0x2a0] ss:$16 sps:$4 sm:$0xff]   ;;  %v11016_v51 = vcombine.high %v333_v48, %v333_v48 }
  0x11   : > { %6215 = vmatpush1.bf16.msra.mxu0 %v9280_v6  ;;  %v9288_v12 = vld [vmem:[%s14233_s1 + $0x84] ss:$16 sps:$4 sm:$0xff]   ;;  %v9292_v14 = vld [vmem:[%s14233_s1 + $0x80] ss:$16 sps:$4 sm:$0xff]  }
  0x12   : > { %6256 = vmatpush1.bf16.msra.mxu1 %v9281_v7  ;;  %6216 = vmatprep.subr.bf16.mxu0 %v9282_v8  ;;  %v9290_v13 = vld [vmem:[%s14233_s1 + $0x284] ss:$16 sps:$4 sm:$0xff]   ;;  %v9293_v15 = vld [vmem:[%s14233_s1 + $0x280] ss:$16 sps:$4 sm:$0xff]   ;;  %v11076_v7 = vcombine.low %v333_v48, %v333_v48 }
  0x13   : > { %6257 = vmatprep.subr.bf16.mxu1 %v9284_v9  ;;  %v9294_v16 = vld [vmem:[%s14233_s1 + $0x64] ss:$16 sps:$4 sm:$0xff]   ;;  %v9298_v18 = vld [vmem:[%s14233_s1 + $0x60] ss:$16 sps:$4 sm:$0xff]   ;;  %6285 = vmatprep.mubr.bf16.mxu1 %v11016_v51 }
  0x14   : > { %v9296_v17 = vld [vmem:[%s14233_s1 + $0x264] ss:$16 sps:$4 sm:$0xff]   ;;  %v9299_v19 = vld [vmem:[%s14233_s1 + $0x260] ss:$16 sps:$4 sm:$0xff]  }
  0x15   : > { %6217 = vmatpush1.bf16.msra.mxu0 %v9286_v10  ;;  %v9300_v20 = vld [vmem:[%s14233_s1 + $0x44] ss:$16 sps:$4 sm:$0xff]   ;;  %v9304_v22 = vld [vmem:[%s14233_s1 + $0x40] ss:$16 sps:$4 sm:$0xff]  }
  0x16   : > { %6258 = vmatpush1.bf16.msra.mxu1 %v9287_v11  ;;  %6218 = vmatprep.subr.bf16.mxu0 %v9288_v12  ;;  %v9302_v21 = vld [vmem:[%s14233_s1 + $0x244] ss:$16 sps:$4 sm:$0xff]   ;;  %v9305_v23 = vld [vmem:[%s14233_s1 + $0x240] ss:$16 sps:$4 sm:$0xff]  }
  0x17   : > { %6259 = vmatprep.subr.bf16.mxu1 %v9290_v13  ;;  %v9306_v24 = vld [vmem:[%s14233_s1 + $0x24] ss:$16 sps:$4 sm:$0xff]   ;;  %v9310_v26 = vld [vmem:[%s14233_s1 + $0x20] ss:$16 sps:$4 sm:$0xff]  }
  0x18   : > { %v9308_v25 = vld [vmem:[%s14233_s1 + $0x224] ss:$16 sps:$4 sm:$0xff]   ;;  %v9311_v27 = vld [vmem:[%s14233_s1 + $0x220] ss:$16 sps:$4 sm:$0xff]  }
  0x19   : > { %6219 = vmatpush1.bf16.msra.mxu0 %v9292_v14  ;;  %v9312_v28 = vld [vmem:[%s14233_s1 + $0x4] ss:$16 sps:$4 sm:$0xff]   ;;  %v9316_v30 = vld [vmem:[%s14233_s1] ss:$16 sps:$4 sm:$0xff]  }
  0x1a   : > { %6260 = vmatpush1.bf16.msra.mxu1 %v9293_v15  ;;  %6220 = vmatprep.subr.bf16.mxu0 %v9294_v16  ;;  %v9314_v29 = vld [vmem:[%s14233_s1 + $0x204] ss:$16 sps:$4 sm:$0xff]   ;;  %v9317_v31 = vld [vmem:[%s14233_s1 + $0x200] ss:$16 sps:$4 sm:$0xff]  }
  0x1b   : > { %6261 = vmatprep.subr.bf16.mxu1 %v9296_v17  ;;  %v9318_v32 = vld [vmem:[%s14233_s1 + $0x1e4] ss:$16 sps:$4 sm:$0xff]   ;;  %v9322_v34 = vld [vmem:[%s14233_s1 + $0x1e0] ss:$16 sps:$4 sm:$0xff]  }
  0x1c   : > { %v9320_v33 = vld [vmem:[%s14233_s1 + $0x3e4] ss:$16 sps:$4 sm:$0xff]   ;;  %v9323_v35 = vld [vmem:[%s14233_s1 + $0x3e0] ss:$16 sps:$4 sm:$0xff]  }
  0x1d   : > { %6221 = vmatpush1.bf16.msra.mxu0 %v9298_v18  ;;  %v9324_v36 = vld [vmem:[%s14233_s1 + $0x1c4] ss:$16 sps:$4 sm:$0xff]   ;;  %v9328_v38 = vld [vmem:[%s14233_s1 + $0x1c0] ss:$16 sps:$4 sm:$0xff]  }
  0x1e   : > { %6262 = vmatpush1.bf16.msra.mxu1 %v9299_v19  ;;  %6222 = vmatprep.subr.bf16.mxu0 %v9300_v20  ;;  %v9326_v37 = vld [vmem:[%s14233_s1 + $0x3c4] ss:$16 sps:$4 sm:$0xff]   ;;  %v9329_v39 = vld [vmem:[%s14233_s1 + $0x3c0] ss:$16 sps:$4 sm:$0xff]  }
  0x1f   : > { %6263 = vmatprep.subr.bf16.mxu1 %v9302_v21  ;;  %v9330_v40 = vld [vmem:[%s14233_s1 + $0x1a4] ss:$16 sps:$4 sm:$0xff]   ;;  %v9334_v42 = vld [vmem:[%s14233_s1 + $0x1a0] ss:$16 sps:$4 sm:$0xff]  }
  0x20   : > { %v9332_v41 = vld [vmem:[%s14233_s1 + $0x3a4] ss:$16 sps:$4 sm:$0xff]   ;;  %v9335_v43 = vld [vmem:[%s14233_s1 + $0x3a0] ss:$16 sps:$4 sm:$0xff]  }
  0x21   : > { %6223 = vmatpush1.bf16.msra.mxu0 %v9304_v22  ;;  %v9336_v44 = vld [vmem:[%s14233_s1 + $0x184] ss:$16 sps:$4 sm:$0xff]   ;;  %v9340_v49 = vld [vmem:[%s14233_s1 + $0x180] ss:$16 sps:$4 sm:$0xff]  }
  0x22   : > { %6264 = vmatpush1.bf16.msra.mxu1 %v9305_v23  ;;  %6224 = vmatprep.subr.bf16.mxu0 %v9306_v24  ;;  %v9338_v45 = vld [vmem:[%s14233_s1 + $0x384] ss:$16 sps:$4 sm:$0xff]   ;;  %v9341_v50 = vld [vmem:[%s14233_s1 + $0x380] ss:$16 sps:$4 sm:$0xff]  }
  0x23   : > { %6265 = vmatprep.subr.bf16.mxu1 %v9308_v25  ;;  %v332_v46 = vld [vmem:[%s10998_s26] sm:$0xff] }
  0x24   : > { %v11007_v47 = vcombine.high %v332_v46, %v332_v46  ;;  %v9342_v52 = vld [vmem:[%s14233_s1 + $0x164] ss:$16 sps:$4 sm:$0xff]   ;;  %v9346_v54 = vld [vmem:[%s14233_s1 + $0x160] ss:$16 sps:$4 sm:$0xff]   ;;  %v11074_v6 = vcombine.low %v332_v46, %v332_v46 }
  0x25   : > { %6225 = vmatpush1.bf16.msra.mxu0 %v9310_v26  ;;  %v9344_v53 = vld [vmem:[%s14233_s1 + $0x364] ss:$16 sps:$4 sm:$0xff]   ;;  %v9347_v55 = vld [vmem:[%s14233_s1 + $0x360] ss:$16 sps:$4 sm:$0xff]  }
  0x26   : > { %6266 = vmatpush1.bf16.msra.mxu1 %v9311_v27  ;;  %6226 = vmatprep.subr.bf16.mxu0 %v9312_v28  ;;  %v9348_v56 = vld [vmem:[%s14233_s1 + $0x144] ss:$16 sps:$4 sm:$0xff]   ;;  %v9352_v58 = vld [vmem:[%s14233_s1 + $0x140] ss:$16 sps:$4 sm:$0xff]  }
  0x27   : > { %6267 = vmatprep.subr.bf16.mxu1 %v9314_v29  ;;  %6244 = vmatprep.mubr.bf16.mxu0 %v11007_v47  ;;  %v9350_v57 = vld [vmem:[%s14233_s1 + $0x344] ss:$16 sps:$4 sm:$0xff]   ;;  %v9353_v59 = vld [vmem:[%s14233_s1 + $0x340] ss:$16 sps:$4 sm:$0xff]  }
  0x28   : > { %v9354_v60 = vld [vmem:[%s14233_s1 + $0x124] ss:$16 sps:$4 sm:$0xff]   ;;  %v9358_v62 = vld [vmem:[%s14233_s1 + $0x120] ss:$16 sps:$4 sm:$0xff]  }
  0x29   : > { %6227 = vmatpush1.bf16.msra.mxu0 %v9316_v30  ;;  %v9356_v61 = vld [vmem:[%s14233_s1 + $0x324] ss:$16 sps:$4 sm:$0xff]   ;;  %v9359_v63 = vld [vmem:[%s14233_s1 + $0x320] ss:$16 sps:$4 sm:$0xff]  }
  0x2a   : > { %6268 = vmatpush1.bf16.msra.mxu1 %v9317_v31  ;;  %6228 = vmatprep.subr.bf16.mxu0 %v9318_v32  ;;  %v9360_v0 = vld [vmem:[%s14233_s1 + $0x104] ss:$16 sps:$4 sm:$0xff]   ;;  %v9364_v2 = vld [vmem:[%s14233_s1 + $0x100] ss:$16 sps:$4 sm:$0xff]  }
  0x2b   : > { %6269 = vmatprep.subr.bf16.mxu1 %v9320_v33  ;;  %v9362_v1 = vld [vmem:[%s14233_s1 + $0x304] ss:$16 sps:$4 sm:$0xff]   ;;  %v9365_v3 = vld [vmem:[%s14233_s1 + $0x300] ss:$16 sps:$4 sm:$0xff]   ;;  %v11156_v33 = vld [vmem:[%s10998_s26 + $0x18] sm:$0xff] }
  0x2c   : > { %v9372_v4 = vld [vmem:[%s14233_s1 + $0x4e4] ss:$16 sps:$4 sm:$0xff]   ;;  %v9370_v8 = vld [vmem:[%s14233_s1 + $0x4e0] ss:$16 sps:$4 sm:$0xff]  }
  0x2d   : > { %6229 = vmatpush2.bf16.msra.mxu0 %v9322_v34  ;;  %v9375_v5 = vld [vmem:[%s14233_s1 + $0x6e4] ss:$16 sps:$4 sm:$0xff]   ;;  %v9373_v9 = vld [vmem:[%s14233_s1 + $0x6e0] ss:$16 sps:$4 sm:$0xff]  }
  0x2e   : > { %6270 = vmatpush2.bf16.msra.mxu1 %v9323_v35  ;;  %6230 = vmatprep.subr.bf16.mxu0 %v9324_v36  ;;  %v9378_v10 = vld [vmem:[%s14233_s1 + $0x4c4] ss:$16 sps:$4 sm:$0xff]   ;;  %v9376_v12 = vld [vmem:[%s14233_s1 + $0x4c0] ss:$16 sps:$4 sm:$0xff]  }
  0x2f   : > { %6271 = vmatprep.subr.bf16.mxu1 %v9326_v37  ;;  %v9381_v11 = vld [vmem:[%s14233_s1 + $0x6c4] ss:$16 sps:$4 sm:$0xff]   ;;  %v9379_v13 = vld [vmem:[%s14233_s1 + $0x6c0] ss:$16 sps:$4 sm:$0xff]   ;;  %v11170_v37 = vcombine.high %v11156_v33, %v11156_v33 }
  0x30   : > { %v9384_v14 = vld [vmem:[%s14233_s1 + $0x4a4] ss:$16 sps:$4 sm:$0xff]   ;;  %v9382_v16 = vld [vmem:[%s14233_s1 + $0x4a0] ss:$16 sps:$4 sm:$0xff]  }
  0x31   : > { %6231 = vmatpush2.bf16.msra.mxu0 %v9328_v38  ;;  %v9387_v15 = vld [vmem:[%s14233_s1 + $0x6a4] ss:$16 sps:$4 sm:$0xff]   ;;  %v9385_v17 = vld [vmem:[%s14233_s1 + $0x6a0] ss:$16 sps:$4 sm:$0xff]  }
  0x32   : > { %6272 = vmatpush2.bf16.msra.mxu1 %v9329_v39  ;;  %6232 = vmatprep.subr.bf16.mxu0 %v9330_v40  ;;  %v9390_v18 = vld [vmem:[%s14233_s1 + $0x484] ss:$16 sps:$4 sm:$0xff]   ;;  %v9388_v20 = vld [vmem:[%s14233_s1 + $0x480] ss:$16 sps:$4 sm:$0xff]  }
  0x33   : > { %6273 = vmatprep.subr.bf16.mxu1 %v9332_v41  ;;  %v9393_v19 = vld [vmem:[%s14233_s1 + $0x684] ss:$16 sps:$4 sm:$0xff]   ;;  %v9391_v21 = vld [vmem:[%s14233_s1 + $0x680] ss:$16 sps:$4 sm:$0xff]  }
  0x34   : > { %v9396_v22 = vld [vmem:[%s14233_s1 + $0x464] ss:$16 sps:$4 sm:$0xff]   ;;  %v9394_v24 = vld [vmem:[%s14233_s1 + $0x460] ss:$16 sps:$4 sm:$0xff]  }
  0x35   : > { %6233 = vmatpush2.bf16.msra.mxu0 %v9334_v42  ;;  %v9399_v23 = vld [vmem:[%s14233_s1 + $0x664] ss:$16 sps:$4 sm:$0xff]   ;;  %v9397_v25 = vld [vmem:[%s14233_s1 + $0x660] ss:$16 sps:$4 sm:$0xff]  }
  0x36   : > { %6274 = vmatpush2.bf16.msra.mxu1 %v9335_v43  ;;  %6234 = vmatprep.subr.bf16.mxu0 %v9336_v44  ;;  %v9402_v26 = vld [vmem:[%s14233_s1 + $0x444] ss:$16 sps:$4 sm:$0xff]   ;;  %v9400_v28 = vld [vmem:[%s14233_s1 + $0x440] ss:$16 sps:$4 sm:$0xff]  }
  0x37   : > { %6275 = vmatprep.subr.bf16.mxu1 %v9338_v45  ;;  %v9405_v27 = vld [vmem:[%s14233_s1 + $0x644] ss:$16 sps:$4 sm:$0xff]   ;;  %v9403_v29 = vld [vmem:[%s14233_s1 + $0x640] ss:$16 sps:$4 sm:$0xff]  }
  0x38   : > { %v9408_v30 = vld [vmem:[%s14233_s1 + $0x424] ss:$16 sps:$4 sm:$0xff]   ;;  %v9406_v34 = vld [vmem:[%s14233_s1 + $0x420] ss:$16 sps:$4 sm:$0xff]  }
  0x39   : > { %6235 = vmatpush2.bf16.msra.mxu0 %v9340_v49  ;;  %v9411_v31 = vld [vmem:[%s14233_s1 + $0x624] ss:$16 sps:$4 sm:$0xff]   ;;  %v9409_v35 = vld [vmem:[%s14233_s1 + $0x620] ss:$16 sps:$4 sm:$0xff]  }
  0x3a   : > { %6276 = vmatpush2.bf16.msra.mxu1 %v9341_v50  ;;  %6236 = vmatprep.subr.bf16.mxu0 %v9342_v52  ;;  %v11153_v32 = vld [vmem:[%s10998_s26 + $0x10] sm:$0xff] }
  0x3b   : > { %6277 = vmatprep.subr.bf16.mxu1 %v9344_v53  ;;  %v11166_v36 = vcombine.high %v11153_v32, %v11153_v32  ;;  %v9414_v38 = vld [vmem:[%s14233_s1 + $0x404] ss:$16 sps:$4 sm:$0xff]   ;;  %v9412_v40 = vld [vmem:[%s14233_s1 + $0x400] ss:$16 sps:$4 sm:$0xff]  }
  0x3c   : > { %v9417_v39 = vld [vmem:[%s14233_s1 + $0x604] ss:$16 sps:$4 sm:$0xff]   ;;  %v9415_v41 = vld [vmem:[%s14233_s1 + $0x600] ss:$16 sps:$4 sm:$0xff]  }
  0x3d   : > { %6237 = vmatpush2.bf16.msra.mxu0 %v9346_v54  ;;  %v9420_v42 = vld [vmem:[%s14233_s1 + $0x5e4] ss:$16 sps:$4 sm:$0xff]   ;;  %v9418_v44 = vld [vmem:[%s14233_s1 + $0x5e0] ss:$16 sps:$4 sm:$0xff]  }
  0x3e   : > { %6278 = vmatpush2.bf16.msra.mxu1 %v9347_v55  ;;  %6238 = vmatprep.subr.bf16.mxu0 %v9348_v56  ;;  %v9423_v43 = vld [vmem:[%s14233_s1 + $0x7e4] ss:$16 sps:$4 sm:$0xff]   ;;  %v9421_v45 = vld [vmem:[%s14233_s1 + $0x7e0] ss:$16 sps:$4 sm:$0xff]  }
  0x3f   : > { %6279 = vmatprep.subr.bf16.mxu1 %v9350_v57  ;;  %v9426_v46 = vld [vmem:[%s14233_s1 + $0x5c4] ss:$16 sps:$4 sm:$0xff]   ;;  %v9424_v49 = vld [vmem:[%s14233_s1 + $0x5c0] ss:$16 sps:$4 sm:$0xff]  }
  0x40   : > { %v9429_v48 = vld [vmem:[%s14233_s1 + $0x7c4] ss:$16 sps:$4 sm:$0xff]   ;;  %v9427_v50 = vld [vmem:[%s14233_s1 + $0x7c0] ss:$16 sps:$4 sm:$0xff]  }
  0x41   : > { %6239 = vmatpush2.bf16.msra.mxu0 %v9352_v58  ;;  %v9432_v52 = vld [vmem:[%s14233_s1 + $0x5a4] ss:$16 sps:$4 sm:$0xff]   ;;  %v9430_v54 = vld [vmem:[%s14233_s1 + $0x5a0] ss:$16 sps:$4 sm:$0xff]  }
  0x42   : > { %6280 = vmatpush2.bf16.msra.mxu1 %v9353_v59  ;;  %6240 = vmatprep.subr.bf16.mxu0 %v9354_v60  ;;  %v9435_v53 = vld [vmem:[%s14233_s1 + $0x7a4] ss:$16 sps:$4 sm:$0xff]   ;;  %v9433_v55 = vld [vmem:[%s14233_s1 + $0x7a0] ss:$16 sps:$4 sm:$0xff]  }
  0x43   : > { %6281 = vmatprep.subr.bf16.mxu1 %v9356_v61  ;;  %v9438_v56 = vld [vmem:[%s14233_s1 + $0x584] ss:$16 sps:$4 sm:$0xff]   ;;  %v9436_v58 = vld [vmem:[%s14233_s1 + $0x580] ss:$16 sps:$4 sm:$0xff]  }
  0x44   : > { %v9441_v57 = vld [vmem:[%s14233_s1 + $0x784] ss:$16 sps:$4 sm:$0xff]   ;;  %v9439_v59 = vld [vmem:[%s14233_s1 + $0x780] ss:$16 sps:$4 sm:$0xff]  }
  0x45   : > { %6241 = vmatpush2.bf16.msra.mxu0 %v9358_v62  ;;  %v9444_v60 = vld [vmem:[%s14233_s1 + $0x564] ss:$16 sps:$4 sm:$0xff]   ;;  %v9442_v62 = vld [vmem:[%s14233_s1 + $0x560] ss:$16 sps:$4 sm:$0xff]  }
  0x46   : > { %6282 = vmatpush2.bf16.msra.mxu1 %v9359_v63  ;;  %6242 = vmatprep.subr.bf16.mxu0 %v9360_v0  ;;  %v9447_v61 = vld [vmem:[%s14233_s1 + $0x764] ss:$16 sps:$4 sm:$0xff]   ;;  %v9445_v63 = vld [vmem:[%s14233_s1 + $0x760] ss:$16 sps:$4 sm:$0xff]  }
  0x47   : > { %6283 = vmatprep.subr.bf16.mxu1 %v9362_v1  ;;  %v9450_v0 = vld [vmem:[%s14233_s1 + $0x544] ss:$16 sps:$4 sm:$0xff]  }
  0x48   : > { %v9453_v1 = vld [vmem:[%s14233_s1 + $0x744] ss:$16 sps:$4 sm:$0xff]  }
  0x49   : > { %6243 = vmatpush2.bf16.msra.mxu0 %v9364_v2  ;;  %v9448_v2 = vld [vmem:[%s14233_s1 + $0x540] ss:$16 sps:$4 sm:$0xff]  }
  0x4a   : > { %6284 = vmatpush2.bf16.msra.mxu1 %v9365_v3  ;;  %6294 = vmatprep.subr.bf16.mxu0 %v9372_v4  ;;  %v9451_v3 = vld [vmem:[%s14233_s1 + $0x740] ss:$16 sps:$4 sm:$0xff]   ;;  %v9456_v4 = vld [vmem:[%s14233_s1 + $0x524] ss:$16 sps:$4 sm:$0xff]  }
  0x4b   : > { %6335 = vmatprep.subr.bf16.mxu1 %v9375_v5  ;;  %v9459_v5 = vld [vmem:[%s14233_s1 + $0x724] ss:$16 sps:$4 sm:$0xff]  }
  0x4c   : > { %6245 = vmatmul.mubr.bf16.vlgmr.msra.gmra.mxu0 %v11074_v6 }
  0x4d   : > { %6286 = vmatmul.mubr.bf16.vlgmr.msra.gmra.mxu1 %v11076_v7  ;;  %6295 = vmatpush1.bf16.msra.mxu0 %v9370_v8  ;;  %v9454_v8 = vld [vmem:[%s14233_s1 + $0x520] ss:$16 sps:$4 sm:$0xff]  }
  0x4e   : > { %6336 = vmatpush1.bf16.msra.mxu1 %v9373_v9  ;;  %6296 = vmatprep.subr.bf16.mxu0 %v9378_v10  ;;  %v9457_v9 = vld [vmem:[%s14233_s1 + $0x720] ss:$16 sps:$4 sm:$0xff]   ;;  %v9462_v10 = vld [vmem:[%s14233_s1 + $0x504] ss:$16 sps:$4 sm:$0xff]  }
  0x4f   : > { %6337 = vmatprep.subr.bf16.mxu1 %v9381_v11  ;;  %6326 = vmatprep.mubr.bf16.mxu0 %v11166_v36  ;;  %v9465_v11 = vld [vmem:[%s14233_s1 + $0x704] ss:$16 sps:$4 sm:$0xff]  }
  0x50   : > { %6367 = vmatprep.mubr.bf16.mxu1 %v11170_v37 }
  0x51   : > { %6297 = vmatpush1.bf16.msra.mxu0 %v9376_v12  ;;  %v9460_v12 = vld [vmem:[%s14233_s1 + $0x500] ss:$16 sps:$4 sm:$0xff]  }
  0x52   : > { %6338 = vmatpush1.bf16.msra.mxu1 %v9379_v13  ;;  %6298 = vmatprep.subr.bf16.mxu0 %v9384_v14  ;;  %v9463_v13 = vld [vmem:[%s14233_s1 + $0x700] ss:$16 sps:$4 sm:$0xff]   ;;  %v9472_v14 = vld [vmem:[%s14233_s1 + $0x8e4] ss:$16 sps:$4 sm:$0xff]  }
  0x53   : > { %6339 = vmatprep.subr.bf16.mxu1 %v9387_v15  ;;  %v9475_v15 = vld [vmem:[%s14233_s1 + $0xae4] ss:$16 sps:$4 sm:$0xff]  }
  0x55   : > { %6299 = vmatpush1.bf16.msra.mxu0 %v9382_v16  ;;  %v11290_v16 = vcombine.low %v11153_v32, %v11153_v32  ;;  %v9490_v32 = vld [vmem:[%s14233_s1 + $0x884] ss:$16 sps:$4 sm:$0xff]  }
  0x56   : > { %6340 = vmatpush1.bf16.msra.mxu1 %v9385_v17  ;;  %6300 = vmatprep.subr.bf16.mxu0 %v9390_v18  ;;  %v11294_v17 = vcombine.low %v11156_v33, %v11156_v33  ;;  %v9470_v18 = vld [vmem:[%s14233_s1 + $0x8e0] ss:$16 sps:$4 sm:$0xff]   ;;  %v9493_v33 = vld [vmem:[%s14233_s1 + $0xa84] ss:$16 sps:$4 sm:$0xff]  }
  0x57   : > { %6341 = vmatprep.subr.bf16.mxu1 %v9393_v19  ;;  %v9473_v19 = vld [vmem:[%s14233_s1 + $0xae0] ss:$16 sps:$4 sm:$0xff]  }
  0x59   : > { %6301 = vmatpush1.bf16.msra.mxu0 %v9388_v20  ;;  %v9478_v20 = vld [vmem:[%s14233_s1 + $0x8c4] ss:$16 sps:$4 sm:$0xff]  }
  0x5a   : > { %6342 = vmatpush1.bf16.msra.mxu1 %v9391_v21  ;;  %6302 = vmatprep.subr.bf16.mxu0 %v9396_v22  ;;  %v9481_v21 = vld [vmem:[%s14233_s1 + $0xac4] ss:$16 sps:$4 sm:$0xff]  }
  0x5b   : > { %6343 = vmatprep.subr.bf16.mxu1 %v9399_v23  ;;  %v11309_v22 = vld [vmem:[%s10998_s26 + $0x20] sm:$0xff]  ;;  %v11312_v23 = vld [vmem:[%s10998_s26 + $0x28] sm:$0xff] }
  0x5d   : > { %6303 = vmatpush1.bf16.msra.mxu0 %v9394_v24  ;;  %v11316_v24 = vcombine.high %v11309_v22, %v11309_v22 }
  0x5e   : > { %6344 = vmatpush1.bf16.msra.mxu1 %v9397_v25  ;;  %6304 = vmatprep.subr.bf16.mxu0 %v9402_v26  ;;  %v11320_v25 = vcombine.high %v11312_v23, %v11312_v23  ;;  %v9476_v26 = vld [vmem:[%s14233_s1 + $0x8c0] ss:$16 sps:$4 sm:$0xff]  }
  0x5f   : > { %6345 = vmatprep.subr.bf16.mxu1 %v9405_v27  ;;  %v9479_v27 = vld [vmem:[%s14233_s1 + $0xac0] ss:$16 sps:$4 sm:$0xff]  }
  0x61   : > { %6305 = vmatpush1.bf16.msra.mxu0 %v9400_v28  ;;  %v9484_v28 = vld [vmem:[%s14233_s1 + $0x8a4] ss:$16 sps:$4 sm:$0xff]  }
  0x62   : > { %6346 = vmatpush1.bf16.msra.mxu1 %v9403_v29  ;;  %6306 = vmatprep.subr.bf16.mxu0 %v9408_v30  ;;  %v9487_v29 = vld [vmem:[%s14233_s1 + $0xaa4] ss:$16 sps:$4 sm:$0xff]   ;;  %v9482_v30 = vld [vmem:[%s14233_s1 + $0x8a0] ss:$16 sps:$4 sm:$0xff]  }
  0x63   : > { %6347 = vmatprep.subr.bf16.mxu1 %v9411_v31  ;;  %v9485_v31 = vld [vmem:[%s14233_s1 + $0xaa0] ss:$16 sps:$4 sm:$0xff]  }
  0x65   : > { %6307 = vmatpush1.bf16.msra.mxu0 %v9406_v34  ;;  %v9488_v34 = vld [vmem:[%s14233_s1 + $0x880] ss:$16 sps:$4 sm:$0xff]  }
  0x66   : > { %6348 = vmatpush1.bf16.msra.mxu1 %v9409_v35  ;;  %6308 = vmatprep.subr.bf16.mxu0 %v9414_v38  ;;  %v9491_v35 = vld [vmem:[%s14233_s1 + $0xa80] ss:$16 sps:$4 sm:$0xff]   ;;  %v9496_v38 = vld [vmem:[%s14233_s1 + $0x864] ss:$16 sps:$4 sm:$0xff]  }
  0x67   : > { %6349 = vmatprep.subr.bf16.mxu1 %v9417_v39  ;;  %v9499_v39 = vld [vmem:[%s14233_s1 + $0xa64] ss:$16 sps:$4 sm:$0xff]  }
  0x69   : > { %6309 = vmatpush1.bf16.msra.mxu0 %v9412_v40  ;;  %v9494_v40 = vld [vmem:[%s14233_s1 + $0x860] ss:$16 sps:$4 sm:$0xff]  }
  0x6a   : > { %6350 = vmatpush1.bf16.msra.mxu1 %v9415_v41  ;;  %6310 = vmatprep.subr.bf16.mxu0 %v9420_v42  ;;  %v9497_v41 = vld [vmem:[%s14233_s1 + $0xa60] ss:$16 sps:$4 sm:$0xff]   ;;  %v9502_v42 = vld [vmem:[%s14233_s1 + $0x844] ss:$16 sps:$4 sm:$0xff]  }
  0x6b   : > { %6351 = vmatprep.subr.bf16.mxu1 %v9423_v43  ;;  %v9505_v43 = vld [vmem:[%s14233_s1 + $0xa44] ss:$16 sps:$4 sm:$0xff]  }
  0x6d   : > { %6311 = vmatpush2.bf16.msra.mxu0 %v9418_v44  ;;  %v9500_v44 = vld [vmem:[%s14233_s1 + $0x840] ss:$16 sps:$4 sm:$0xff]  }
  0x6e   : > { %6352 = vmatpush2.bf16.msra.mxu1 %v9421_v45  ;;  %6312 = vmatprep.subr.bf16.mxu0 %v9426_v46  ;;  %v9503_v45 = vld [vmem:[%s14233_s1 + $0xa40] ss:$16 sps:$4 sm:$0xff]   ;;  %v9508_v46 = vld [vmem:[%s14233_s1 + $0x824] ss:$16 sps:$4 sm:$0xff]  }
  0x6f   : > { %6353 = vmatprep.subr.bf16.mxu1 %v9429_v48  ;;  %v9511_v48 = vld [vmem:[%s14233_s1 + $0xa24] ss:$16 sps:$4 sm:$0xff]  }
  0x71   : > { %6313 = vmatpush2.bf16.msra.mxu0 %v9424_v49  ;;  %v9506_v49 = vld [vmem:[%s14233_s1 + $0x820] ss:$16 sps:$4 sm:$0xff]  }
  0x72   : > { %6354 = vmatpush2.bf16.msra.mxu1 %v9427_v50  ;;  %6314 = vmatprep.subr.bf16.mxu0 %v9432_v52  ;;  %v9509_v50 = vld [vmem:[%s14233_s1 + $0xa20] ss:$16 sps:$4 sm:$0xff]   ;;  %v9514_v52 = vld [vmem:[%s14233_s1 + $0x804] ss:$16 sps:$4 sm:$0xff]  }
  0x73   : > { %6355 = vmatprep.subr.bf16.mxu1 %v9435_v53  ;;  %v9517_v53 = vld [vmem:[%s14233_s1 + $0xa04] ss:$16 sps:$4 sm:$0xff]  }
  0x75   : > { %6315 = vmatpush2.bf16.msra.mxu0 %v9430_v54  ;;  %v9512_v54 = vld [vmem:[%s14233_s1 + $0x800] ss:$16 sps:$4 sm:$0xff]  }
  0x76   : > { %6356 = vmatpush2.bf16.msra.mxu1 %v9433_v55  ;;  %6316 = vmatprep.subr.bf16.mxu0 %v9438_v56  ;;  %v9515_v55 = vld [vmem:[%s14233_s1 + $0xa00] ss:$16 sps:$4 sm:$0xff]   ;;  %v9520_v56 = vld [vmem:[%s14233_s1 + $0x9e4] ss:$16 sps:$4 sm:$0xff]  }
  0x77   : > { %6357 = vmatprep.subr.bf16.mxu1 %v9441_v57  ;;  %v9523_v57 = vld [vmem:[%s14233_s1 + $0xbe4] ss:$16 sps:$4 sm:$0xff]  }
  0x79   : > { %6317 = vmatpush2.bf16.msra.mxu0 %v9436_v58  ;;  %v9518_v58 = vld [vmem:[%s14233_s1 + $0x9e0] ss:$16 sps:$4 sm:$0xff]  }
  0x7a   : > { %6358 = vmatpush2.bf16.msra.mxu1 %v9439_v59  ;;  %6318 = vmatprep.subr.bf16.mxu0 %v9444_v60  ;;  %v9521_v59 = vld [vmem:[%s14233_s1 + $0xbe0] ss:$16 sps:$4 sm:$0xff]   ;;  %v9526_v60 = vld [vmem:[%s14233_s1 + $0x9c4] ss:$16 sps:$4 sm:$0xff]  }
  0x7b   : > { %6359 = vmatprep.subr.bf16.mxu1 %v9447_v61  ;;  %v9529_v61 = vld [vmem:[%s14233_s1 + $0xbc4] ss:$16 sps:$4 sm:$0xff]  }
  0x7d   : > { %6319 = vmatpush2.bf16.msra.mxu0 %v9442_v62  ;;  %v9524_v62 = vld [vmem:[%s14233_s1 + $0x9c0] ss:$16 sps:$4 sm:$0xff]  }
  0x7e   : > { %6360 = vmatpush2.bf16.msra.mxu1 %v9445_v63  ;;  %6320 = vmatprep.subr.bf16.mxu0 %v9450_v0  ;;  %v9527_v63 = vld [vmem:[%s14233_s1 + $0xbc0] ss:$16 sps:$4 sm:$0xff]   ;;  %v9532_v0 = vld [vmem:[%s14233_s1 + $0x9a4] ss:$16 sps:$4 sm:$0xff]  }
  0x7f   : > { %6361 = vmatprep.subr.bf16.mxu1 %v9453_v1  ;;  %v9535_v1 = vld [vmem:[%s14233_s1 + $0xba4] ss:$16 sps:$4 sm:$0xff]  }
  0x81   : > { %6321 = vmatpush2.bf16.msra.mxu0 %v9448_v2  ;;  %v9530_v2 = vld [vmem:[%s14233_s1 + $0x9a0] ss:$16 sps:$4 sm:$0xff]  }
  0x82   : > { %6362 = vmatpush2.bf16.msra.mxu1 %v9451_v3  ;;  %6322 = vmatprep.subr.bf16.mxu0 %v9456_v4  ;;  %v9533_v3 = vld [vmem:[%s14233_s1 + $0xba0] ss:$16 sps:$4 sm:$0xff]   ;;  %v9538_v4 = vld [vmem:[%s14233_s1 + $0x984] ss:$16 sps:$4 sm:$0xff]  }
  0x83   : > { %6363 = vmatprep.subr.bf16.mxu1 %v9459_v5  ;;  %v9541_v5 = vld [vmem:[%s14233_s1 + $0xb84] ss:$16 sps:$4 sm:$0xff]  }
  0x85   : > { %6323 = vmatpush2.bf16.msra.mxu0 %v9454_v8  ;;  %v9536_v8 = vld [vmem:[%s14233_s1 + $0x980] ss:$16 sps:$4 sm:$0xff]  }
  0x86   : > { %6364 = vmatpush2.bf16.msra.mxu1 %v9457_v9  ;;  %6324 = vmatprep.subr.bf16.mxu0 %v9462_v10  ;;  %v9539_v9 = vld [vmem:[%s14233_s1 + $0xb80] ss:$16 sps:$4 sm:$0xff]   ;;  %v9544_v10 = vld [vmem:[%s14233_s1 + $0x964] ss:$16 sps:$4 sm:$0xff]  }
  0x87   : > { %6365 = vmatprep.subr.bf16.mxu1 %v9465_v11  ;;  %v9547_v11 = vld [vmem:[%s14233_s1 + $0xb64] ss:$16 sps:$4 sm:$0xff]  }
  0x89   : > { %6325 = vmatpush2.bf16.msra.mxu0 %v9460_v12  ;;  %v9542_v12 = vld [vmem:[%s14233_s1 + $0x960] ss:$16 sps:$4 sm:$0xff]  }
  0x8a   : > { %6366 = vmatpush2.bf16.msra.mxu1 %v9463_v13  ;;  %6376 = vmatprep.subr.bf16.mxu0 %v9472_v14  ;;  %v9545_v13 = vld [vmem:[%s14233_s1 + $0xb60] ss:$16 sps:$4 sm:$0xff]   ;;  %v9550_v14 = vld [vmem:[%s14233_s1 + $0x944] ss:$16 sps:$4 sm:$0xff]  }
  0x8b   : > { %6417 = vmatprep.subr.bf16.mxu1 %v9475_v15  ;;  %v9553_v15 = vld [vmem:[%s14233_s1 + $0xb44] ss:$16 sps:$4 sm:$0xff]  }
  0x8c   : > { %6327 = vmatmul.mubr.bf16.vlgmr.msra.gmra.mxu0 %v11290_v16 }
  0x8d   : > { %6368 = vmatmul.mubr.bf16.vlgmr.msra.gmra.mxu1 %v11294_v17  ;;  %6377 = vmatpush1.bf16.msra.mxu0 %v9470_v18  ;;  %v9548_v18 = vld [vmem:[%s14233_s1 + $0x940] ss:$16 sps:$4 sm:$0xff]  }
  0x8e   : > { %6418 = vmatpush1.bf16.msra.mxu1 %v9473_v19  ;;  %6378 = vmatprep.subr.bf16.mxu0 %v9478_v20  ;;  %v9551_v19 = vld [vmem:[%s14233_s1 + $0xb40] ss:$16 sps:$4 sm:$0xff]   ;;  %v9556_v20 = vld [vmem:[%s14233_s1 + $0x924] ss:$16 sps:$4 sm:$0xff]  }
  0x8f   : > { %6419 = vmatprep.subr.bf16.mxu1 %v9481_v21  ;;  %6408 = vmatprep.mubr.bf16.mxu0 %v11316_v24  ;;  %v9559_v21 = vld [vmem:[%s14233_s1 + $0xb24] ss:$16 sps:$4 sm:$0xff]  }
  0x90   : > { %6449 = vmatprep.mubr.bf16.mxu1 %v11320_v25 }
  0x91   : > { %6379 = vmatpush1.bf16.msra.mxu0 %v9476_v26  ;;  %v9554_v26 = vld [vmem:[%s14233_s1 + $0x920] ss:$16 sps:$4 sm:$0xff]  }
  0x92   : > { %6420 = vmatpush1.bf16.msra.mxu1 %v9479_v27  ;;  %6380 = vmatprep.subr.bf16.mxu0 %v9484_v28  ;;  %v9557_v27 = vld [vmem:[%s14233_s1 + $0xb20] ss:$16 sps:$4 sm:$0xff]   ;;  %v9562_v28 = vld [vmem:[%s14233_s1 + $0x904] ss:$16 sps:$4 sm:$0xff]  }
  0x93   : > { %6421 = vmatprep.subr.bf16.mxu1 %v9487_v29  ;;  %v9565_v29 = vld [vmem:[%s14233_s1 + $0xb04] ss:$16 sps:$4 sm:$0xff]  }
  0x95   : > { %6381 = vmatpush1.bf16.msra.mxu0 %v9482_v30  ;;  %v9560_v30 = vld [vmem:[%s14233_s1 + $0x900] ss:$16 sps:$4 sm:$0xff]  }
  0x96   : > { %6422 = vmatpush1.bf16.msra.mxu1 %v9485_v31  ;;  %6382 = vmatprep.subr.bf16.mxu0 %v9490_v32  ;;  %v9563_v31 = vld [vmem:[%s14233_s1 + $0xb00] ss:$16 sps:$4 sm:$0xff]   ;;  %v9572_v32 = vld [vmem:[%s14233_s1 + $0xce4] ss:$16 sps:$4 sm:$0xff]  }
  0x97   : > { %6423 = vmatprep.subr.bf16.mxu1 %v9493_v33  ;;  %v9575_v33 = vld [vmem:[%s14233_s1 + $0xee4] ss:$16 sps:$4 sm:$0xff]  }
  0x99   : > { %6383 = vmatpush1.bf16.msra.mxu0 %v9488_v34  ;;  %v9570_v34 = vld [vmem:[%s14233_s1 + $0xce0] ss:$16 sps:$4 sm:$0xff]  }
  0x9a   : > { %6424 = vmatpush1.bf16.msra.mxu1 %v9491_v35  ;;  %6384 = vmatprep.subr.bf16.mxu0 %v9496_v38  ;;  %v9573_v35 = vld [vmem:[%s14233_s1 + $0xee0] ss:$16 sps:$4 sm:$0xff]   ;;  %v11514_v38 = vcombine.low %v11309_v22, %v11309_v22  ;;  %v9581_v22 = vld [vmem:[%s14233_s1 + $0xec4] ss:$16 sps:$4 sm:$0xff]  }
  0x9b   : > { %6425 = vmatprep.subr.bf16.mxu1 %v9499_v39  ;;  %v11518_v39 = vcombine.low %v11312_v23, %v11312_v23 }
  0x9d   : > { %6385 = vmatpush1.bf16.msra.mxu0 %v9494_v40  ;;  %v11521_v40 = vld [vmem:[%s10998_s26 + $0x30] sm:$0xff] }
  0x9e   : > { %6426 = vmatpush1.bf16.msra.mxu1 %v9497_v41  ;;  %6386 = vmatprep.subr.bf16.mxu0 %v9502_v42  ;;  %v11524_v41 = vld [vmem:[%s10998_s26 + $0x38] sm:$0xff]  ;;  %v9578_v42 = vld [vmem:[%s14233_s1 + $0xcc4] ss:$16 sps:$4 sm:$0xff]   ;;  %v11534_v23 = vcombine.high %v11521_v40, %v11521_v40 }
  0x9f   : > { %6427 = vmatprep.subr.bf16.mxu1 %v9505_v43  ;;  %v11538_v43 = vcombine.high %v11524_v41, %v11524_v41 }
  0xa1   : > { %6387 = vmatpush1.bf16.msra.mxu0 %v9500_v44  ;;  %v9576_v44 = vld [vmem:[%s14233_s1 + $0xcc0] ss:$16 sps:$4 sm:$0xff]  }
  0xa2   : > { %6428 = vmatpush1.bf16.msra.mxu1 %v9503_v45  ;;  %6388 = vmatprep.subr.bf16.mxu0 %v9508_v46  ;;  %v9579_v45 = vld [vmem:[%s14233_s1 + $0xec0] ss:$16 sps:$4 sm:$0xff]   ;;  %v9584_v46 = vld [vmem:[%s14233_s1 + $0xca4] ss:$16 sps:$4 sm:$0xff]  }
  0xa3   : > { %6429 = vmatprep.subr.bf16.mxu1 %v9511_v48  ;;  %v9587_v48 = vld [vmem:[%s14233_s1 + $0xea4] ss:$16 sps:$4 sm:$0xff]  }
  0xa5   : > { %6389 = vmatpush1.bf16.msra.mxu0 %v9506_v49  ;;  %v9582_v49 = vld [vmem:[%s14233_s1 + $0xca0] ss:$16 sps:$4 sm:$0xff]  }
  0xa6   : > { %6430 = vmatpush1.bf16.msra.mxu1 %v9509_v50  ;;  %6390 = vmatprep.subr.bf16.mxu0 %v9514_v52  ;;  %v9585_v50 = vld [vmem:[%s14233_s1 + $0xea0] ss:$16 sps:$4 sm:$0xff]   ;;  %v9590_v52 = vld [vmem:[%s14233_s1 + $0xc84] ss:$16 sps:$4 sm:$0xff]  }
  0xa7   : > { %6431 = vmatprep.subr.bf16.mxu1 %v9517_v53  ;;  %v9593_v53 = vld [vmem:[%s14233_s1 + $0xe84] ss:$16 sps:$4 sm:$0xff]  }
  0xa9   : > { %6391 = vmatpush1.bf16.msra.mxu0 %v9512_v54  ;;  %v9588_v54 = vld [vmem:[%s14233_s1 + $0xc80] ss:$16 sps:$4 sm:$0xff]  }
  0xaa   : > { %6432 = vmatpush1.bf16.msra.mxu1 %v9515_v55  ;;  %6392 = vmatprep.subr.bf16.mxu0 %v9520_v56  ;;  %v9591_v55 = vld [vmem:[%s14233_s1 + $0xe80] ss:$16 sps:$4 sm:$0xff]   ;;  %v9596_v56 = vld [vmem:[%s14233_s1 + $0xc64] ss:$16 sps:$4 sm:$0xff]  }
  0xab   : > { %6433 = vmatprep.subr.bf16.mxu1 %v9523_v57  ;;  %v9599_v57 = vld [vmem:[%s14233_s1 + $0xe64] ss:$16 sps:$4 sm:$0xff]  }
  0xad   : > { %6393 = vmatpush2.bf16.msra.mxu0 %v9518_v58  ;;  %v9594_v58 = vld [vmem:[%s14233_s1 + $0xc60] ss:$16 sps:$4 sm:$0xff]  }
  0xae   : > { %6434 = vmatpush2.bf16.msra.mxu1 %v9521_v59  ;;  %6394 = vmatprep.subr.bf16.mxu0 %v9526_v60  ;;  %v9597_v59 = vld [vmem:[%s14233_s1 + $0xe60] ss:$16 sps:$4 sm:$0xff]   ;;  %v9602_v60 = vld [vmem:[%s14233_s1 + $0xc44] ss:$16 sps:$4 sm:$0xff]  }
  0xaf   : > { %6435 = vmatprep.subr.bf16.mxu1 %v9529_v61  ;;  %v9605_v61 = vld [vmem:[%s14233_s1 + $0xe44] ss:$16 sps:$4 sm:$0xff]  }
  0xb1   : > { %6395 = vmatpush2.bf16.msra.mxu0 %v9524_v62  ;;  %v9600_v62 = vld [vmem:[%s14233_s1 + $0xc40] ss:$16 sps:$4 sm:$0xff]  }
  0xb2   : > { %6436 = vmatpush2.bf16.msra.mxu1 %v9527_v63  ;;  %6396 = vmatprep.subr.bf16.mxu0 %v9532_v0  ;;  %v9603_v63 = vld [vmem:[%s14233_s1 + $0xe40] ss:$16 sps:$4 sm:$0xff]   ;;  %v9608_v0 = vld [vmem:[%s14233_s1 + $0xc24] ss:$16 sps:$4 sm:$0xff]  }
  0xb3   : > { %6437 = vmatprep.subr.bf16.mxu1 %v9535_v1  ;;  %v9611_v1 = vld [vmem:[%s14233_s1 + $0xe24] ss:$16 sps:$4 sm:$0xff]  }
  0xb5   : > { %6397 = vmatpush2.bf16.msra.mxu0 %v9530_v2  ;;  %v9606_v2 = vld [vmem:[%s14233_s1 + $0xc20] ss:$16 sps:$4 sm:$0xff]  }
  0xb6   : > { %6438 = vmatpush2.bf16.msra.mxu1 %v9533_v3  ;;  %6398 = vmatprep.subr.bf16.mxu0 %v9538_v4  ;;  %v9609_v3 = vld [vmem:[%s14233_s1 + $0xe20] ss:$16 sps:$4 sm:$0xff]   ;;  %v9614_v4 = vld [vmem:[%s14233_s1 + $0xc04] ss:$16 sps:$4 sm:$0xff]  }
  0xb7   : > { %6439 = vmatprep.subr.bf16.mxu1 %v9541_v5  ;;  %v9617_v5 = vld [vmem:[%s14233_s1 + $0xe04] ss:$16 sps:$4 sm:$0xff]  }
  0xb9   : > { %6399 = vmatpush2.bf16.msra.mxu0 %v9536_v8  ;;  %v9612_v8 = vld [vmem:[%s14233_s1 + $0xc00] ss:$16 sps:$4 sm:$0xff]  }
  0xba   : > { %6440 = vmatpush2.bf16.msra.mxu1 %v9539_v9  ;;  %6400 = vmatprep.subr.bf16.mxu0 %v9544_v10  ;;  %v9615_v9 = vld [vmem:[%s14233_s1 + $0xe00] ss:$16 sps:$4 sm:$0xff]   ;;  %v9620_v10 = vld [vmem:[%s14233_s1 + $0xde4] ss:$16 sps:$4 sm:$0xff]  }
  0xbb   : > { %6441 = vmatprep.subr.bf16.mxu1 %v9547_v11  ;;  %v9623_v11 = vld [vmem:[%s14233_s1 + $0xfe4] ss:$16 sps:$4 sm:$0xff]  }
  0xbd   : > { %6401 = vmatpush2.bf16.msra.mxu0 %v9542_v12  ;;  %v9618_v12 = vld [vmem:[%s14233_s1 + $0xde0] ss:$16 sps:$4 sm:$0xff]  }
  0xbe   : > { %6442 = vmatpush2.bf16.msra.mxu1 %v9545_v13  ;;  %6402 = vmatprep.subr.bf16.mxu0 %v9550_v14  ;;  %v9621_v13 = vld [vmem:[%s14233_s1 + $0xfe0] ss:$16 sps:$4 sm:$0xff]   ;;  %v9626_v14 = vld [vmem:[%s14233_s1 + $0xdc4] ss:$16 sps:$4 sm:$0xff]  }
  0xbf   : > { %6443 = vmatprep.subr.bf16.mxu1 %v9553_v15  ;;  %v9629_v15 = vld [vmem:[%s14233_s1 + $0xfc4] ss:$16 sps:$4 sm:$0xff]  }
  0xc1   : > { %6403 = vmatpush2.bf16.msra.mxu0 %v9548_v18  ;;  %v9624_v18 = vld [vmem:[%s14233_s1 + $0xdc0] ss:$16 sps:$4 sm:$0xff]  }
  0xc2   : > { %6444 = vmatpush2.bf16.msra.mxu1 %v9551_v19  ;;  %6404 = vmatprep.subr.bf16.mxu0 %v9556_v20  ;;  %v9627_v19 = vld [vmem:[%s14233_s1 + $0xfc0] ss:$16 sps:$4 sm:$0xff]   ;;  %v9632_v20 = vld [vmem:[%s14233_s1 + $0xda4] ss:$16 sps:$4 sm:$0xff]  }
  0xc3   : > { %6445 = vmatprep.subr.bf16.mxu1 %v9559_v21  ;;  %v9635_v21 = vld [vmem:[%s14233_s1 + $0xfa4] ss:$16 sps:$4 sm:$0xff]  }
  0xc5   : > { %6405 = vmatpush2.bf16.msra.mxu0 %v9554_v26  ;;  %v9630_v26 = vld [vmem:[%s14233_s1 + $0xda0] ss:$16 sps:$4 sm:$0xff]  }
  0xc6   : > { %6446 = vmatpush2.bf16.msra.mxu1 %v9557_v27  ;;  %6406 = vmatprep.subr.bf16.mxu0 %v9562_v28  ;;  %v9633_v27 = vld [vmem:[%s14233_s1 + $0xfa0] ss:$16 sps:$4 sm:$0xff]   ;;  %v9638_v28 = vld [vmem:[%s14233_s1 + $0xd84] ss:$16 sps:$4 sm:$0xff]  }
  0xc7   : > { %6447 = vmatprep.subr.bf16.mxu1 %v9565_v29  ;;  %v9641_v29 = vld [vmem:[%s14233_s1 + $0xf84] ss:$16 sps:$4 sm:$0xff]  }
  0xc9   : > { %6407 = vmatpush2.bf16.msra.mxu0 %v9560_v30  ;;  %v9636_v30 = vld [vmem:[%s14233_s1 + $0xd80] ss:$16 sps:$4 sm:$0xff]  }
  0xca   : > { %6448 = vmatpush2.bf16.msra.mxu1 %v9563_v31  ;;  %6458 = vmatprep.subr.bf16.mxu0 %v9572_v32  ;;  %v9639_v31 = vld [vmem:[%s14233_s1 + $0xf80] ss:$16 sps:$4 sm:$0xff]   ;;  %v9644_v32 = vld [vmem:[%s14233_s1 + $0xd64] ss:$16 sps:$4 sm:$0xff]  }
  0xcb   : > { %6499 = vmatprep.subr.bf16.mxu1 %v9575_v33  ;;  %v9647_v33 = vld [vmem:[%s14233_s1 + $0xf64] ss:$16 sps:$4 sm:$0xff]  }
  0xcc   : > { %6409 = vmatmul.mubr.bf16.vlgmr.msra.gmra.mxu0 %v11514_v38 }
  0xcd   : > { %6450 = vmatmul.mubr.bf16.vlgmr.msra.gmra.mxu1 %v11518_v39  ;;  %6459 = vmatpush1.bf16.msra.mxu0 %v9570_v34  ;;  %v9642_v34 = vld [vmem:[%s14233_s1 + $0xd60] ss:$16 sps:$4 sm:$0xff]  }
  0xce   : > { %6500 = vmatpush1.bf16.msra.mxu1 %v9573_v35  ;;  %6460 = vmatprep.subr.bf16.mxu0 %v9578_v42  ;;  %v9645_v35 = vld [vmem:[%s14233_s1 + $0xf60] ss:$16 sps:$4 sm:$0xff]   ;;  %v9650_v42 = vld [vmem:[%s14233_s1 + $0xd44] ss:$16 sps:$4 sm:$0xff]  }
  0xcf   : > { %6501 = vmatprep.subr.bf16.mxu1 %v9581_v22  ;;  %6490 = vmatprep.mubr.bf16.mxu0 %v11534_v23  ;;  %v9653_v22 = vld [vmem:[%s14233_s1 + $0xf44] ss:$16 sps:$4 sm:$0xff]  }
  0xd0   : > { %6531 = vmatprep.mubr.bf16.mxu1 %v11538_v43 }
  0xd1   : > { %6461 = vmatpush1.bf16.msra.mxu0 %v9576_v44  ;;  %v9648_v44 = vld [vmem:[%s14233_s1 + $0xd40] ss:$16 sps:$4 sm:$0xff]  }
  0xd2   : > { %6502 = vmatpush1.bf16.msra.mxu1 %v9579_v45  ;;  %6462 = vmatprep.subr.bf16.mxu0 %v9584_v46  ;;  %v9651_v45 = vld [vmem:[%s14233_s1 + $0xf40] ss:$16 sps:$4 sm:$0xff]   ;;  %v9656_v46 = vld [vmem:[%s14233_s1 + $0xd24] ss:$16 sps:$4 sm:$0xff]  }
  0xd3   : > { %6503 = vmatprep.subr.bf16.mxu1 %v9587_v48  ;;  %v9659_v48 = vld [vmem:[%s14233_s1 + $0xf24] ss:$16 sps:$4 sm:$0xff]  }
  0xd5   : > { %6463 = vmatpush1.bf16.msra.mxu0 %v9582_v49  ;;  %v9654_v49 = vld [vmem:[%s14233_s1 + $0xd20] ss:$16 sps:$4 sm:$0xff]  }
  0xd6   : > { %6504 = vmatpush1.bf16.msra.mxu1 %v9585_v50  ;;  %6464 = vmatprep.subr.bf16.mxu0 %v9590_v52  ;;  %v9657_v50 = vld [vmem:[%s14233_s1 + $0xf20] ss:$16 sps:$4 sm:$0xff]   ;;  %v9662_v52 = vld [vmem:[%s14233_s1 + $0xd04] ss:$16 sps:$4 sm:$0xff]  }
  0xd7   : > { %6505 = vmatprep.subr.bf16.mxu1 %v9593_v53  ;;  %v9665_v53 = vld [vmem:[%s14233_s1 + $0xf04] ss:$16 sps:$4 sm:$0xff]  }
  0xd9   : > { %6465 = vmatpush1.bf16.msra.mxu0 %v9588_v54  ;;  %v9660_v54 = vld [vmem:[%s14233_s1 + $0xd00] ss:$16 sps:$4 sm:$0xff]  }
  0xda   : > { %6506 = vmatpush1.bf16.msra.mxu1 %v9591_v55  ;;  %6466 = vmatprep.subr.bf16.mxu0 %v9596_v56  ;;  %v9663_v55 = vld [vmem:[%s14233_s1 + $0xf00] ss:$16 sps:$4 sm:$0xff]   ;;  %v9672_v56 = vld [vmem:[%s14233_s1 + $0x10e4] ss:$16 sps:$4 sm:$0xff]  }
  0xdb   : > { %6507 = vmatprep.subr.bf16.mxu1 %v9599_v57  ;;  %v9675_v57 = vld [vmem:[%s14233_s1 + $0x12e4] ss:$16 sps:$4 sm:$0xff]  }
  0xdd   : > { %6467 = vmatpush1.bf16.msra.mxu0 %v9594_v58  ;;  %v11725_v58 = vld [vmem:[%s10998_s26 + $0x40] sm:$0xff] }
  0xde   : > { %6508 = vmatpush1.bf16.msra.mxu1 %v9597_v59  ;;  %6468 = vmatprep.subr.bf16.mxu0 %v9602_v60  ;;  %v11729_v59 = vcombine.low %v11521_v40, %v11521_v40  ;;  %v11733_v60 = vcombine.low %v11524_v41, %v11524_v41  ;;  %v9678_v40 = vld [vmem:[%s14233_s1 + $0x10c4] ss:$16 sps:$4 sm:$0xff]  }
  0xdf   : > { %6509 = vmatprep.subr.bf16.mxu1 %v9605_v61  ;;  %v11736_v61 = vld [vmem:[%s10998_s26 + $0x48] sm:$0xff]  ;;  %v9681_v41 = vld [vmem:[%s14233_s1 + $0x12c4] ss:$16 sps:$4 sm:$0xff]  }
  0xe1   : > { %6469 = vmatpush1.bf16.msra.mxu0 %v9600_v62  ;;  %v9670_v62 = vld [vmem:[%s14233_s1 + $0x10e0] ss:$16 sps:$4 sm:$0xff]  }
  0xe2   : > { %6510 = vmatpush1.bf16.msra.mxu1 %v9603_v63  ;;  %6470 = vmatprep.subr.bf16.mxu0 %v9608_v0  ;;  %v9673_v63 = vld [vmem:[%s14233_s1 + $0x12e0] ss:$16 sps:$4 sm:$0xff]   ;;  %v11752_v0 = vcombine.high %v11725_v58, %v11725_v58 }
  0xe3   : > { %6511 = vmatprep.subr.bf16.mxu1 %v9611_v1  ;;  %v11756_v1 = vcombine.high %v11736_v61, %v11736_v61 }
  0xe5   : > { %6471 = vmatpush1.bf16.msra.mxu0 %v9606_v2 }
  0xe6   : > { %6512 = vmatpush1.bf16.msra.mxu1 %v9609_v3  ;;  %6472 = vmatprep.subr.bf16.mxu0 %v9614_v4  ;;  %v9676_v4 = vld [vmem:[%s14233_s1 + $0x10c0] ss:$16 sps:$4 sm:$0xff]  }
  0xe7   : > { %6513 = vmatprep.subr.bf16.mxu1 %v9617_v5  ;;  %v9679_v5 = vld [vmem:[%s14233_s1 + $0x12c0] ss:$16 sps:$4 sm:$0xff]  }
  0xe9   : > { %6473 = vmatpush1.bf16.msra.mxu0 %v9612_v8 }
  0xea   : > { %6514 = vmatpush1.bf16.msra.mxu1 %v9615_v9  ;;  %6474 = vmatprep.subr.bf16.mxu0 %v9620_v10  ;;  %v9684_v9 = vld [vmem:[%s14233_s1 + $0x10a4] ss:$16 sps:$4 sm:$0xff]  }
  0xeb   : > { %6515 = vmatprep.subr.bf16.mxu1 %v9623_v11 }
  0xed   : > { %6475 = vmatpush2.bf16.msra.mxu0 %v9618_v12  ;;  %v9687_v12 = vld [vmem:[%s14233_s1 + $0x12a4] ss:$16 sps:$4 sm:$0xff]  }
  0xee   : > { %6516 = vmatpush2.bf16.msra.mxu1 %v9621_v13  ;;  %6476 = vmatprep.subr.bf16.mxu0 %v9626_v14 }
  0xef   : > { %6517 = vmatprep.subr.bf16.mxu1 %v9629_v15 }
  0xf1   : > { %6477 = vmatpush2.bf16.msra.mxu0 %v9624_v18  ;;  %v9682_v18 = vld [vmem:[%s14233_s1 + $0x10a0] ss:$16 sps:$4 sm:$0xff]  }
  0xf2   : > { %6518 = vmatpush2.bf16.msra.mxu1 %v9627_v19  ;;  %6478 = vmatprep.subr.bf16.mxu0 %v9632_v20  ;;  %v9685_v19 = vld [vmem:[%s14233_s1 + $0x12a0] ss:$16 sps:$4 sm:$0xff]   ;;  %v9690_v20 = vld [vmem:[%s14233_s1 + $0x1084] ss:$16 sps:$4 sm:$0xff]  }
  0xf3   : > { %6519 = vmatprep.subr.bf16.mxu1 %v9635_v21 }
  0xf5   : > { %6479 = vmatpush2.bf16.msra.mxu0 %v9630_v26 }
  0xf6   : > { %6520 = vmatpush2.bf16.msra.mxu1 %v9633_v27  ;;  %6480 = vmatprep.subr.bf16.mxu0 %v9638_v28  ;;  %v9693_v27 = vld [vmem:[%s14233_s1 + $0x1284] ss:$16 sps:$4 sm:$0xff]   ;;  %v9688_v28 = vld [vmem:[%s14233_s1 + $0x1080] ss:$16 sps:$4 sm:$0xff]  }
  0xf7   : > { %6521 = vmatprep.subr.bf16.mxu1 %v9641_v29  ;;  %v9691_v29 = vld [vmem:[%s14233_s1 + $0x1280] ss:$16 sps:$4 sm:$0xff]  }
  0xf9   : > { %6481 = vmatpush2.bf16.msra.mxu0 %v9636_v30  ;;  %v9696_v30 = vld [vmem:[%s14233_s1 + $0x1064] ss:$16 sps:$4 sm:$0xff]  }
  0xfa   : > { %6522 = vmatpush2.bf16.msra.mxu1 %v9639_v31  ;;  %6482 = vmatprep.subr.bf16.mxu0 %v9644_v32  ;;  %v9699_v31 = vld [vmem:[%s14233_s1 + $0x1264] ss:$16 sps:$4 sm:$0xff]   ;;  %v9694_v32 = vld [vmem:[%s14233_s1 + $0x1060] ss:$16 sps:$4 sm:$0xff]  }
  0xfb   : > { %6523 = vmatprep.subr.bf16.mxu1 %v9647_v33  ;;  %v9697_v33 = vld [vmem:[%s14233_s1 + $0x1260] ss:$16 sps:$4 sm:$0xff]  }
  0xfd   : > { %6483 = vmatpush2.bf16.msra.mxu0 %v9642_v34  ;;  %v9702_v34 = vld [vmem:[%s14233_s1 + $0x1044] ss:$16 sps:$4 sm:$0xff]  }
  0xfe   : > { %6524 = vmatpush2.bf16.msra.mxu1 %v9645_v35  ;;  %6484 = vmatprep.subr.bf16.mxu0 %v9650_v42  ;;  %v9705_v35 = vld [vmem:[%s14233_s1 + $0x1244] ss:$16 sps:$4 sm:$0xff]   ;;  %v9700_v42 = vld [vmem:[%s14233_s1 + $0x1040] ss:$16 sps:$4 sm:$0xff]  }
  0xff   : > { %6525 = vmatprep.subr.bf16.mxu1 %v9653_v22  ;;  %v9703_v22 = vld [vmem:[%s14233_s1 + $0x1240] ss:$16 sps:$4 sm:$0xff]  }
 0x101   : > { %6485 = vmatpush2.bf16.msra.mxu0 %v9648_v44  ;;  %v9708_v44 = vld [vmem:[%s14233_s1 + $0x1024] ss:$16 sps:$4 sm:$0xff]  }
 0x102   : > { %6526 = vmatpush2.bf16.msra.mxu1 %v9651_v45  ;;  %6486 = vmatprep.subr.bf16.mxu0 %v9656_v46  ;;  %v9711_v45 = vld [vmem:[%s14233_s1 + $0x1224] ss:$16 sps:$4 sm:$0xff]   ;;  %v9706_v46 = vld [vmem:[%s14233_s1 + $0x1020] ss:$16 sps:$4 sm:$0xff]  }
 0x103   : > { %6527 = vmatprep.subr.bf16.mxu1 %v9659_v48  ;;  %v9709_v48 = vld [vmem:[%s14233_s1 + $0x1220] ss:$16 sps:$4 sm:$0xff]  }
 0x105   : > { %6487 = vmatpush2.bf16.msra.mxu0 %v9654_v49  ;;  %v9714_v49 = vld [vmem:[%s14233_s1 + $0x1004] ss:$16 sps:$4 sm:$0xff]  }
 0x106   : > { %6528 = vmatpush2.bf16.msra.mxu1 %v9657_v50  ;;  %6488 = vmatprep.subr.bf16.mxu0 %v9662_v52  ;;  %v9717_v50 = vld [vmem:[%s14233_s1 + $0x1204] ss:$16 sps:$4 sm:$0xff]   ;;  %v9712_v52 = vld [vmem:[%s14233_s1 + $0x1000] ss:$16 sps:$4 sm:$0xff]  }
 0x107   : > { %6529 = vmatprep.subr.bf16.mxu1 %v9665_v53  ;;  %v9715_v53 = vld [vmem:[%s14233_s1 + $0x1200] ss:$16 sps:$4 sm:$0xff]  }
 0x109   : > { %6489 = vmatpush2.bf16.msra.mxu0 %v9660_v54  ;;  %v9720_v54 = vld [vmem:[%s14233_s1 + $0x11e4] ss:$16 sps:$4 sm:$0xff]  }
 0x10a   : > { %6530 = vmatpush2.bf16.msra.mxu1 %v9663_v55  ;;  %6540 = vmatprep.subr.bf16.mxu0 %v9672_v56  ;;  %v9723_v55 = vld [vmem:[%s14233_s1 + $0x13e4] ss:$16 sps:$4 sm:$0xff]   ;;  %v9718_v56 = vld [vmem:[%s14233_s1 + $0x11e0] ss:$16 sps:$4 sm:$0xff]  }
 0x10b   : > { %6581 = vmatprep.subr.bf16.mxu1 %v9675_v57  ;;  %v9721_v57 = vld [vmem:[%s14233_s1 + $0x13e0] ss:$16 sps:$4 sm:$0xff]  }
 0x10c   : > { %v6246_v2 = vpop.f32.mrf.mxu0  ;;  %6491 = vmatmul.mubr.bf16.vlgmr.msra.gmra.mxu0 %v11729_v59 }
 0x10d   : > { %v6287_v3 = vpop.f32.mrf.mxu1  ;;  %6532 = vmatmul.mubr.bf16.vlgmr.msra.gmra.mxu1 %v11733_v60  ;;  %6541 = vmatpush1.bf16.msra.mxu0 %v9670_v62  ;;  %v9726_v62 = vld [vmem:[%s14233_s1 + $0x11c4] ss:$16 sps:$4 sm:$0xff]  }
 0x10e   : > { %v11766_v8 = vadd.f32 %v6287_v3, %v6246_v2  ;;  %6582 = vmatpush1.bf16.msra.mxu1 %v9673_v63  ;;  %v6248_v10 = vpop.f32.mrf.mxu0  ;;  %6542 = vmatprep.subr.bf16.mxu0 %v9678_v40  ;;  %v9729_v63 = vld [vmem:[%s14233_s1 + $0x13c4] ss:$16 sps:$4 sm:$0xff]   ;;  %v9724_v40 = vld [vmem:[%s14233_s1 + $0x11c0] ss:$16 sps:$4 sm:$0xff]  }
 0x10f   : > { %v6289_v11 = vpop.f32.mrf.mxu1  ;;  %6583 = vmatprep.subr.bf16.mxu1 %v9681_v41  ;;  %6572 = vmatprep.mubr.bf16.mxu0 %v11752_v0  ;;  %v9727_v41 = vld [vmem:[%s14233_s1 + $0x13c0] ss:$16 sps:$4 sm:$0xff]   ;;  %v9732_v2 = vld [vmem:[%s14233_s1 + $0x11a4] ss:$16 sps:$4 sm:$0xff]  }
 0x110   : > { %v11774_v13 = vadd.f32 %v6289_v11, %v6248_v10  ;;  %6613 = vmatprep.mubr.bf16.mxu1 %v11756_v1  ;;  %v6250_v14 = vpop.f32.mrf.mxu0  ;;  %v9735_v3 = vld [vmem:[%s14233_s1 + $0x13a4] ss:$16 sps:$4 sm:$0xff]   ;;  %v9736_v11 = vld [vmem:[%s14233_s1 + $0x1180] ss:$16 sps:$4 sm:$0xff]  }
 0x111   : > { %v6291_v15 = vpop.f32.mrf.mxu1  ;;  %6543 = vmatpush1.bf16.msra.mxu0 %v9676_v4  ;;  %v9730_v4 = vld [vmem:[%s14233_s1 + $0x11a0] ss:$16 sps:$4 sm:$0xff]   ;;  %v9741_v10 = vld [vmem:[%s14233_s1 + $0x1384] ss:$16 sps:$4 sm:$0xff]  }
 0x112   : > { %6584 = vmatpush1.bf16.msra.mxu1 %v9679_v5  ;;  %v6251_v21 = vpop.f32.mrf.mxu0  ;;  %6544 = vmatprep.subr.bf16.mxu0 %v9684_v9  ;;  %v9733_v5 = vld [vmem:[%s14233_s1 + $0x13a0] ss:$16 sps:$4 sm:$0xff]   ;;  %v9738_v9 = vld [vmem:[%s14233_s1 + $0x1184] ss:$16 sps:$4 sm:$0xff]  }
 0x113   : > { %v6292_v26 = vpop.f32.mrf.mxu1  ;;  %6585 = vmatprep.subr.bf16.mxu1 %v9687_v12  ;;  %v9739_v12 = vld [vmem:[%s14233_s1 + $0x1380] ss:$16 sps:$4 sm:$0xff]   ;;  %v9744_v14 = vld [vmem:[%s14233_s1 + $0x1164] ss:$16 sps:$4 sm:$0xff]  }
 0x114   : > { %v9747_v15 = vld [vmem:[%s14233_s1 + $0x1364] ss:$16 sps:$4 sm:$0xff]   ;;  %v9748_v26 = vld [vmem:[%s14233_s1 + $0x1140] ss:$16 sps:$4 sm:$0xff]  }
 0x115   : > { %6545 = vmatpush1.bf16.msra.mxu0 %v9682_v18  ;;  %v9742_v18 = vld [vmem:[%s14233_s1 + $0x1160] ss:$16 sps:$4 sm:$0xff]   ;;  %v9753_v21 = vld [vmem:[%s14233_s1 + $0x1344] ss:$16 sps:$4 sm:$0xff]  }
 0x116   : > { %6586 = vmatpush1.bf16.msra.mxu1 %v9685_v19  ;;  %6546 = vmatprep.subr.bf16.mxu0 %v9690_v20  ;;  %v9745_v19 = vld [vmem:[%s14233_s1 + $0x1360] ss:$16 sps:$4 sm:$0xff]   ;;  %v9750_v20 = vld [vmem:[%s14233_s1 + $0x1144] ss:$16 sps:$4 sm:$0xff]  }
 0x117   : > { %6587 = vmatprep.subr.bf16.mxu1 %v9693_v27  ;;  %v9751_v27 = vld [vmem:[%s14233_s1 + $0x1340] ss:$16 sps:$4 sm:$0xff]  }
 0x119   : > { %6547 = vmatpush1.bf16.msra.mxu0 %v9688_v28  ;;  %v9756_v28 = vld [vmem:[%s14233_s1 + $0x1124] ss:$16 sps:$4 sm:$0xff]  }
 0x11a   : > { %6588 = vmatpush1.bf16.msra.mxu1 %v9691_v29  ;;  %6548 = vmatprep.subr.bf16.mxu0 %v9696_v30  ;;  %v9759_v29 = vld [vmem:[%s14233_s1 + $0x1324] ss:$16 sps:$4 sm:$0xff]   ;;  %v9754_v30 = vld [vmem:[%s14233_s1 + $0x1120] ss:$16 sps:$4 sm:$0xff]  }
 0x11b   : > { %6589 = vmatprep.subr.bf16.mxu1 %v9699_v31  ;;  %v9757_v31 = vld [vmem:[%s14233_s1 + $0x1320] ss:$16 sps:$4 sm:$0xff]  }
 0x11d   : > { %6549 = vmatpush1.bf16.msra.mxu0 %v9694_v32  ;;  %v9762_v32 = vld [vmem:[%s14233_s1 + $0x1104] ss:$16 sps:$4 sm:$0xff]  }
 0x11e   : > { %6590 = vmatpush1.bf16.msra.mxu1 %v9697_v33  ;;  %6550 = vmatprep.subr.bf16.mxu0 %v9702_v34  ;;  %v9765_v33 = vld [vmem:[%s14233_s1 + $0x1304] ss:$16 sps:$4 sm:$0xff]   ;;  %v9760_v34 = vld [vmem:[%s14233_s1 + $0x1100] ss:$16 sps:$4 sm:$0xff]  }
 0x11f   : > { %6591 = vmatprep.subr.bf16.mxu1 %v9705_v35  ;;  %v9763_v35 = vld [vmem:[%s14233_s1 + $0x1300] ss:$16 sps:$4 sm:$0xff]  }
 0x121   : > { %6551 = vmatpush1.bf16.msra.mxu0 %v9700_v42  ;;  %v9772_v42 = vld [vmem:[%s14233_s1 + $0x14e4] ss:$16 sps:$4 sm:$0xff]  }
 0x122   : > { %6592 = vmatpush1.bf16.msra.mxu1 %v9703_v22  ;;  %6552 = vmatprep.subr.bf16.mxu0 %v9708_v44  ;;  %v9775_v22 = vld [vmem:[%s14233_s1 + $0x16e4] ss:$16 sps:$4 sm:$0xff]   ;;  %v9770_v44 = vld [vmem:[%s14233_s1 + $0x14e0] ss:$16 sps:$4 sm:$0xff]  }
 0x123   : > { %6593 = vmatprep.subr.bf16.mxu1 %v9711_v45  ;;  %v9773_v45 = vld [vmem:[%s14233_s1 + $0x16e0] ss:$16 sps:$4 sm:$0xff]  }
 0x125   : > { %6553 = vmatpush1.bf16.msra.mxu0 %v9706_v46  ;;  %v11954_v46 = vcombine.low %v11725_v58, %v11725_v58  ;;  %v9781_v58 = vld [vmem:[%s14233_s1 + $0x16c4] ss:$16 sps:$4 sm:$0xff]  }
 0x126   : > { %6594 = vmatpush1.bf16.msra.mxu1 %v9709_v48  ;;  %6554 = vmatprep.subr.bf16.mxu0 %v9714_v49  ;;  %v11958_v48 = vcombine.low %v11736_v61, %v11736_v61  ;;  %v11961_v49 = vld [vmem:[%s10998_s26 + $0x50] sm:$0xff] }
 0x127   : > { %6595 = vmatprep.subr.bf16.mxu1 %v9717_v50  ;;  %v11964_v50 = vld [vmem:[%s10998_s26 + $0x58] sm:$0xff]  ;;  %v9776_v61 = vld [vmem:[%s14233_s1 + $0x14c0] ss:$16 sps:$4 sm:$0xff]  }
 0x129   : > { %6555 = vmatpush1.bf16.msra.mxu0 %v9712_v52  ;;  %v9778_v52 = vld [vmem:[%s14233_s1 + $0x14c4] ss:$16 sps:$4 sm:$0xff]  }
 0x12a   : > { %6596 = vmatpush1.bf16.msra.mxu1 %v9715_v53  ;;  %6556 = vmatprep.subr.bf16.mxu0 %v9720_v54  ;;  %v9779_v53 = vld [vmem:[%s14233_s1 + $0x16c0] ss:$16 sps:$4 sm:$0xff]   ;;  %v11980_v54 = vcombine.high %v11961_v49, %v11961_v49 }
 0x12b   : > { %6597 = vmatprep.subr.bf16.mxu1 %v9723_v55  ;;  %v11984_v55 = vcombine.high %v11964_v50, %v11964_v50 }
 0x12d   : > { %6557 = vmatpush2.bf16.msra.mxu0 %v9718_v56 }
 0x12e   : > { %6598 = vmatpush2.bf16.msra.mxu1 %v9721_v57  ;;  %6558 = vmatprep.subr.bf16.mxu0 %v9726_v62 }
 0x12f   : > { %6599 = vmatprep.subr.bf16.mxu1 %v9729_v63 }
 0x131   : > { %6559 = vmatpush2.bf16.msra.mxu0 %v9724_v40 }
 0x132   : > { %6600 = vmatpush2.bf16.msra.mxu1 %v9727_v41  ;;  %6560 = vmatprep.subr.bf16.mxu0 %v9732_v2  ;;  %v9784_v41 = vld [vmem:[%s14233_s1 + $0x14a4] ss:$16 sps:$4 sm:$0xff]  }
 0x133   : > { %6601 = vmatprep.subr.bf16.mxu1 %v9735_v3  ;;  %v9787_v2 = vld [vmem:[%s14233_s1 + $0x16a4] ss:$16 sps:$4 sm:$0xff]  }
 0x135   : > { %6561 = vmatpush2.bf16.msra.mxu0 %v9730_v4 }
 0x136   : > { %6602 = vmatpush2.bf16.msra.mxu1 %v9733_v5  ;;  %6562 = vmatprep.subr.bf16.mxu0 %v9738_v9  ;;  %v9785_v5 = vld [vmem:[%s14233_s1 + $0x16a0] ss:$16 sps:$4 sm:$0xff]  }
 0x137   : > { %6603 = vmatprep.subr.bf16.mxu1 %v9741_v10 }
 0x139   : > { %6563 = vmatpush2.bf16.msra.mxu0 %v9736_v11 }
 0x13a   : > { %6604 = vmatpush2.bf16.msra.mxu1 %v9739_v12  ;;  %6564 = vmatprep.subr.bf16.mxu0 %v9744_v14  ;;  %v9790_v14 = vld [vmem:[%s14233_s1 + $0x1484] ss:$16 sps:$4 sm:$0xff]  }
 0x13b   : > { %6605 = vmatprep.subr.bf16.mxu1 %v9747_v15  ;;  %v9793_v15 = vld [vmem:[%s14233_s1 + $0x1684] ss:$16 sps:$4 sm:$0xff]  }
 0x13d   : > { %6565 = vmatpush2.bf16.msra.mxu0 %v9742_v18  ;;  %v9788_v18 = vld [vmem:[%s14233_s1 + $0x1480] ss:$16 sps:$4 sm:$0xff]  }
 0x13e   : > { %6606 = vmatpush2.bf16.msra.mxu1 %v9745_v19  ;;  %6566 = vmatprep.subr.bf16.mxu0 %v9750_v20  ;;  %v9791_v19 = vld [vmem:[%s14233_s1 + $0x1680] ss:$16 sps:$4 sm:$0xff]   ;;  %v9796_v20 = vld [vmem:[%s14233_s1 + $0x1464] ss:$16 sps:$4 sm:$0xff]  }
 0x13f   : > { %6607 = vmatprep.subr.bf16.mxu1 %v9753_v21  ;;  %v9799_v21 = vld [vmem:[%s14233_s1 + $0x1664] ss:$16 sps:$4 sm:$0xff]  }
 0x141   : > { %6567 = vmatpush2.bf16.msra.mxu0 %v9748_v26  ;;  %v9794_v26 = vld [vmem:[%s14233_s1 + $0x1460] ss:$16 sps:$4 sm:$0xff]  }
 0x142   : > { %6608 = vmatpush2.bf16.msra.mxu1 %v9751_v27  ;;  %6568 = vmatprep.subr.bf16.mxu0 %v9756_v28  ;;  %v9797_v27 = vld [vmem:[%s14233_s1 + $0x1660] ss:$16 sps:$4 sm:$0xff]   ;;  %v9802_v28 = vld [vmem:[%s14233_s1 + $0x1444] ss:$16 sps:$4 sm:$0xff]  }
 0x143   : > { %6609 = vmatprep.subr.bf16.mxu1 %v9759_v29  ;;  %v9805_v29 = vld [vmem:[%s14233_s1 + $0x1644] ss:$16 sps:$4 sm:$0xff]  }
 0x145   : > { %6569 = vmatpush2.bf16.msra.mxu0 %v9754_v30  ;;  %v9800_v30 = vld [vmem:[%s14233_s1 + $0x1440] ss:$16 sps:$4 sm:$0xff]  }
 0x146   : > { %6610 = vmatpush2.bf16.msra.mxu1 %v9757_v31  ;;  %6570 = vmatprep.subr.bf16.mxu0 %v9762_v32  ;;  %v9803_v31 = vld [vmem:[%s14233_s1 + $0x1640] ss:$16 sps:$4 sm:$0xff]   ;;  %v9808_v32 = vld [vmem:[%s14233_s1 + $0x1424] ss:$16 sps:$4 sm:$0xff]  }
 0x147   : > { %6611 = vmatprep.subr.bf16.mxu1 %v9765_v33  ;;  %v9811_v33 = vld [vmem:[%s14233_s1 + $0x1624] ss:$16 sps:$4 sm:$0xff]  }
 0x149   : > { %6571 = vmatpush2.bf16.msra.mxu0 %v9760_v34  ;;  %v9806_v34 = vld [vmem:[%s14233_s1 + $0x1420] ss:$16 sps:$4 sm:$0xff]  }
 0x14a   : > { %6612 = vmatpush2.bf16.msra.mxu1 %v9763_v35  ;;  %6622 = vmatprep.subr.bf16.mxu0 %v9772_v42  ;;  %v9809_v35 = vld [vmem:[%s14233_s1 + $0x1620] ss:$16 sps:$4 sm:$0xff]   ;;  %v9814_v42 = vld [vmem:[%s14233_s1 + $0x1404] ss:$16 sps:$4 sm:$0xff]  }
 0x14b   : > { %6663 = vmatprep.subr.bf16.mxu1 %v9775_v22  ;;  %v9817_v22 = vld [vmem:[%s14233_s1 + $0x1604] ss:$16 sps:$4 sm:$0xff]  }
 0x14c   : > { %v6328_v56 = vpop.f32.mrf.mxu0  ;;  %6573 = vmatmul.mubr.bf16.vlgmr.msra.gmra.mxu0 %v11954_v46 }
 0x14d   : > { %v6369_v57 = vpop.f32.mrf.mxu1  ;;  %6614 = vmatmul.mubr.bf16.vlgmr.msra.gmra.mxu1 %v11958_v48  ;;  %v6329_v62 = vadd.f32 %v6328_v56, %v11766_v8  ;;  %6623 = vmatpush1.bf16.msra.mxu0 %v9770_v44  ;;  %v9782_v8 = vld [vmem:[%s14233_s1 + $0x14a0] ss:$16 sps:$4 sm:$0xff]   ;;  %v9826_v56 = vld [vmem:[%s14233_s1 + $0x15c4] ss:$16 sps:$4 sm:$0xff]  }
 0x14e   : > { %6664 = vmatpush1.bf16.msra.mxu1 %v9773_v45  ;;  %v6330_v63 = vpop.f32.mrf.mxu0  ;;  %6624 = vmatprep.subr.bf16.mxu0 %v9778_v52  ;;  %v9812_v44 = vld [vmem:[%s14233_s1 + $0x1400] ss:$16 sps:$4 sm:$0xff]   ;;  %v9820_v52 = vld [vmem:[%s14233_s1 + $0x15e4] ss:$16 sps:$4 sm:$0xff]  }
 0x14f   : > { %v6371_v40 = vpop.f32.mrf.mxu1  ;;  %6665 = vmatprep.subr.bf16.mxu1 %v9781_v58  ;;  %v11995_v3 = vadd.f32 %v6369_v57, %v6329_v62  ;;  %v6331_v4 = vadd.f32 %v6330_v63, %v11774_v13  ;;  %6654 = vmatprep.mubr.bf16.mxu0 %v11980_v54  ;;  %v9815_v45 = vld [vmem:[%s14233_s1 + $0x1600] ss:$16 sps:$4 sm:$0xff]   ;;  %v9823_v58 = vld [vmem:[%s14233_s1 + $0x17e4] ss:$16 sps:$4 sm:$0xff]  }
 0x150   : > { %6695 = vmatprep.mubr.bf16.mxu1 %v11984_v55  ;;  %v6332_v9 = vpop.f32.mrf.mxu0  ;;  %v9829_v57 = vld [vmem:[%s14233_s1 + $0x17c4] ss:$16 sps:$4 sm:$0xff]   ;;  %v9824_v62 = vld [vmem:[%s14233_s1 + $0x15c0] ss:$16 sps:$4 sm:$0xff]  }
 0x151   : > { %v6373_v10 = vpop.f32.mrf.mxu1  ;;  %v12006_v11 = vadd.f32 %v6371_v40, %v6331_v4  ;;  %6625 = vmatpush1.bf16.msra.mxu0 %v9776_v61  ;;  %v9818_v61 = vld [vmem:[%s14233_s1 + $0x15e0] ss:$16 sps:$4 sm:$0xff]   ;;  %v9832_v40 = vld [vmem:[%s14233_s1 + $0x15a4] ss:$16 sps:$4 sm:$0xff]  }
 0x152   : > { %6666 = vmatpush1.bf16.msra.mxu1 %v9779_v53  ;;  %v6333_v12 = vpop.f32.mrf.mxu0  ;;  %6626 = vmatprep.subr.bf16.mxu0 %v9784_v41  ;;  %v9821_v53 = vld [vmem:[%s14233_s1 + $0x17e0] ss:$16 sps:$4 sm:$0xff]   ;;  %v9835_v41 = vld [vmem:[%s14233_s1 + $0x17a4] ss:$16 sps:$4 sm:$0xff]  }
 0x153   : > { %v6374_v13 = vpop.f32.mrf.mxu1  ;;  %6667 = vmatprep.subr.bf16.mxu1 %v9787_v2  ;;  %v9827_v63 = vld [vmem:[%s14233_s1 + $0x17c0] ss:$16 sps:$4 sm:$0xff]   ;;  %v9844_v12 = vld [vmem:[%s14233_s1 + $0x1564] ss:$16 sps:$4 sm:$0xff]  }
 0x154   : > { %v9830_v2 = vld [vmem:[%s14233_s1 + $0x15a0] ss:$16 sps:$4 sm:$0xff]   ;;  %v9847_v13 = vld [vmem:[%s14233_s1 + $0x1764] ss:$16 sps:$4 sm:$0xff]  }
 0x155   : > { %6627 = vmatpush1.bf16.msra.mxu0 %v9782_v8  ;;  %v9833_v4 = vld [vmem:[%s14233_s1 + $0x17a0] ss:$16 sps:$4 sm:$0xff]   ;;  %v9838_v8 = vld [vmem:[%s14233_s1 + $0x1584] ss:$16 sps:$4 sm:$0xff]  }
 0x156   : > { %6668 = vmatpush1.bf16.msra.mxu1 %v9785_v5  ;;  %6628 = vmatprep.subr.bf16.mxu0 %v9790_v14  ;;  %v9841_v5 = vld [vmem:[%s14233_s1 + $0x1784] ss:$16 sps:$4 sm:$0xff]   ;;  %v9836_v9 = vld [vmem:[%s14233_s1 + $0x1580] ss:$16 sps:$4 sm:$0xff]  }
 0x157   : > { %6669 = vmatprep.subr.bf16.mxu1 %v9793_v15  ;;  %v9839_v10 = vld [vmem:[%s14233_s1 + $0x1780] ss:$16 sps:$4 sm:$0xff]  }
 0x158   : > { %v9842_v14 = vld [vmem:[%s14233_s1 + $0x1560] ss:$16 sps:$4 sm:$0xff]  }
 0x159   : > { %6629 = vmatpush1.bf16.msra.mxu0 %v9788_v18  ;;  %v9845_v15 = vld [vmem:[%s14233_s1 + $0x1760] ss:$16 sps:$4 sm:$0xff]   ;;  %v9850_v18 = vld [vmem:[%s14233_s1 + $0x1544] ss:$16 sps:$4 sm:$0xff]  }
 0x15a   : > { %6670 = vmatpush1.bf16.msra.mxu1 %v9791_v19  ;;  %6630 = vmatprep.subr.bf16.mxu0 %v9796_v20  ;;  %v9853_v19 = vld [vmem:[%s14233_s1 + $0x1744] ss:$16 sps:$4 sm:$0xff]   ;;  %v9848_v20 = vld [vmem:[%s14233_s1 + $0x1540] ss:$16 sps:$4 sm:$0xff]  }
 0x15b   : > { %6671 = vmatprep.subr.bf16.mxu1 %v9799_v21  ;;  %v9851_v21 = vld [vmem:[%s14233_s1 + $0x1740] ss:$16 sps:$4 sm:$0xff]  }
 0x15d   : > { %6631 = vmatpush1.bf16.msra.mxu0 %v9794_v26  ;;  %v9856_v26 = vld [vmem:[%s14233_s1 + $0x1524] ss:$16 sps:$4 sm:$0xff]  }
 0x15e   : > { %6672 = vmatpush1.bf16.msra.mxu1 %v9797_v27  ;;  %6632 = vmatprep.subr.bf16.mxu0 %v9802_v28  ;;  %v9859_v27 = vld [vmem:[%s14233_s1 + $0x1724] ss:$16 sps:$4 sm:$0xff]   ;;  %v9854_v28 = vld [vmem:[%s14233_s1 + $0x1520] ss:$16 sps:$4 sm:$0xff]  }
 0x15f   : > { %6673 = vmatprep.subr.bf16.mxu1 %v9805_v29  ;;  %v9857_v29 = vld [vmem:[%s14233_s1 + $0x1720] ss:$16 sps:$4 sm:$0xff]  }
 0x161   : > { %6633 = vmatpush1.bf16.msra.mxu0 %v9800_v30  ;;  %v9862_v30 = vld [vmem:[%s14233_s1 + $0x1504] ss:$16 sps:$4 sm:$0xff]  }
 0x162   : > { %6674 = vmatpush1.bf16.msra.mxu1 %v9803_v31  ;;  %6634 = vmatprep.subr.bf16.mxu0 %v9808_v32  ;;  %v9865_v31 = vld [vmem:[%s14233_s1 + $0x1704] ss:$16 sps:$4 sm:$0xff]   ;;  %v9860_v32 = vld [vmem:[%s14233_s1 + $0x1500] ss:$16 sps:$4 sm:$0xff]  }
 0x163   : > { %6675 = vmatprep.subr.bf16.mxu1 %v9811_v33  ;;  %v9863_v33 = vld [vmem:[%s14233_s1 + $0x1700] ss:$16 sps:$4 sm:$0xff]  }
 0x165   : > { %6635 = vmatpush1.bf16.msra.mxu0 %v9806_v34  ;;  %v9872_v34 = vld [vmem:[%s14233_s1 + $0x18e4] ss:$16 sps:$4 sm:$0xff]  }
 0x166   : > { %6676 = vmatpush1.bf16.msra.mxu1 %v9809_v35  ;;  %6636 = vmatprep.subr.bf16.mxu0 %v9814_v42  ;;  %v9875_v35 = vld [vmem:[%s14233_s1 + $0x1ae4] ss:$16 sps:$4 sm:$0xff]  }
 0x167   : > { %6677 = vmatprep.subr.bf16.mxu1 %v9817_v22  ;;  %v12171_v42 = vld [vmem:[%s10998_s26 + $0x60] sm:$0xff] }
 0x168   : > { %v9870_v22 = vld [vmem:[%s14233_s1 + $0x18e0] ss:$16 sps:$4 sm:$0xff]  }
 0x169   : > { %6637 = vmatpush1.bf16.msra.mxu0 %v9812_v44  ;;  %v9873_v44 = vld [vmem:[%s14233_s1 + $0x1ae0] ss:$16 sps:$4 sm:$0xff]  }
 0x16a   : > { %6678 = vmatpush1.bf16.msra.mxu1 %v9815_v45  ;;  %6638 = vmatprep.subr.bf16.mxu0 %v9820_v52  ;;  %v12181_v45 = vcombine.low %v11961_v49, %v11961_v49  ;;  %v12185_v52 = vcombine.low %v11964_v50, %v11964_v50  ;;  %v9876_v49 = vld [vmem:[%s14233_s1 + $0x18c0] ss:$16 sps:$4 sm:$0xff]  }
 0x16b   : > { %6679 = vmatprep.subr.bf16.mxu1 %v9823_v58  ;;  %v12188_v58 = vld [vmem:[%s10998_s26 + $0x68] sm:$0xff]  ;;  %v9879_v50 = vld [vmem:[%s14233_s1 + $0x1ac0] ss:$16 sps:$4 sm:$0xff]  }
 0x16d   : > { %6639 = vmatpush2.bf16.msra.mxu0 %v9818_v61  ;;  %v9878_v61 = vld [vmem:[%s14233_s1 + $0x18c4] ss:$16 sps:$4 sm:$0xff]  }
 0x16e   : > { %6680 = vmatpush2.bf16.msra.mxu1 %v9821_v53  ;;  %6640 = vmatprep.subr.bf16.mxu0 %v9826_v56  ;;  %v9881_v53 = vld [vmem:[%s14233_s1 + $0x1ac4] ss:$16 sps:$4 sm:$0xff]   ;;  %v12204_v56 = vcombine.high %v12171_v42, %v12171_v42 }
 0x16f   : > { %6681 = vmatprep.subr.bf16.mxu1 %v9829_v57  ;;  %v12208_v57 = vcombine.high %v12188_v58, %v12188_v58 }
 0x171   : > { %6641 = vmatpush2.bf16.msra.mxu0 %v9824_v62 }
 0x172   : > { %6682 = vmatpush2.bf16.msra.mxu1 %v9827_v63  ;;  %6642 = vmatprep.subr.bf16.mxu0 %v9832_v40 }
 0x173   : > { %6683 = vmatprep.subr.bf16.mxu1 %v9835_v41 }
 0x175   : > { %6643 = vmatpush2.bf16.msra.mxu0 %v9830_v2 }
 0x176   : > { %6684 = vmatpush2.bf16.msra.mxu1 %v9833_v4  ;;  %6644 = vmatprep.subr.bf16.mxu0 %v9838_v8  ;;  %v9884_v4 = vld [vmem:[%s14233_s1 + $0x18a4] ss:$16 sps:$4 sm:$0xff]  }
 0x177   : > { %6685 = vmatprep.subr.bf16.mxu1 %v9841_v5  ;;  %v9887_v8 = vld [vmem:[%s14233_s1 + $0x1aa4] ss:$16 sps:$4 sm:$0xff]  }
 0x179   : > { %6645 = vmatpush2.bf16.msra.mxu0 %v9836_v9 }
 0x17a   : > { %6686 = vmatpush2.bf16.msra.mxu1 %v9839_v10  ;;  %6646 = vmatprep.subr.bf16.mxu0 %v9844_v12  ;;  %v9885_v10 = vld [vmem:[%s14233_s1 + $0x1aa0] ss:$16 sps:$4 sm:$0xff]  }
 0x17b   : > { %6687 = vmatprep.subr.bf16.mxu1 %v9847_v13 }
 0x17d   : > { %6647 = vmatpush2.bf16.msra.mxu0 %v9842_v14 }
 0x17e   : > { %6688 = vmatpush2.bf16.msra.mxu1 %v9845_v15  ;;  %6648 = vmatprep.subr.bf16.mxu0 %v9850_v18  ;;  %v9890_v18 = vld [vmem:[%s14233_s1 + $0x1884] ss:$16 sps:$4 sm:$0xff]  }
 0x17f   : > { %6689 = vmatprep.subr.bf16.mxu1 %v9853_v19  ;;  %v9893_v19 = vld [vmem:[%s14233_s1 + $0x1a84] ss:$16 sps:$4 sm:$0xff]  }
 0x181   : > { %6649 = vmatpush2.bf16.msra.mxu0 %v9848_v20  ;;  %v9888_v20 = vld [vmem:[%s14233_s1 + $0x1880] ss:$16 sps:$4 sm:$0xff]  }
 0x182   : > { %6690 = vmatpush2.bf16.msra.mxu1 %v9851_v21  ;;  %6650 = vmatprep.subr.bf16.mxu0 %v9856_v26  ;;  %v9891_v21 = vld [vmem:[%s14233_s1 + $0x1a80] ss:$16 sps:$4 sm:$0xff]   ;;  %v9896_v26 = vld [vmem:[%s14233_s1 + $0x1864] ss:$16 sps:$4 sm:$0xff]  }
 0x183   : > { %6691 = vmatprep.subr.bf16.mxu1 %v9859_v27  ;;  %v9899_v27 = vld [vmem:[%s14233_s1 + $0x1a64] ss:$16 sps:$4 sm:$0xff]  }
 0x185   : > { %6651 = vmatpush2.bf16.msra.mxu0 %v9854_v28  ;;  %v9894_v28 = vld [vmem:[%s14233_s1 + $0x1860] ss:$16 sps:$4 sm:$0xff]  }
 0x186   : > { %6692 = vmatpush2.bf16.msra.mxu1 %v9857_v29  ;;  %6652 = vmatprep.subr.bf16.mxu0 %v9862_v30  ;;  %v9897_v29 = vld [vmem:[%s14233_s1 + $0x1a60] ss:$16 sps:$4 sm:$0xff]   ;;  %v9902_v30 = vld [vmem:[%s14233_s1 + $0x1844] ss:$16 sps:$4 sm:$0xff]  }
 0x187   : > { %6693 = vmatprep.subr.bf16.mxu1 %v9865_v31  ;;  %v9905_v31 = vld [vmem:[%s14233_s1 + $0x1a44] ss:$16 sps:$4 sm:$0xff]  }
 0x189   : > { %6653 = vmatpush2.bf16.msra.mxu0 %v9860_v32  ;;  %v9900_v32 = vld [vmem:[%s14233_s1 + $0x1840] ss:$16 sps:$4 sm:$0xff]  }
 0x18a   : > { %6694 = vmatpush2.bf16.msra.mxu1 %v9863_v33  ;;  %6704 = vmatprep.subr.bf16.mxu0 %v9872_v34  ;;  %v9903_v33 = vld [vmem:[%s14233_s1 + $0x1a40] ss:$16 sps:$4 sm:$0xff]   ;;  %v9908_v34 = vld [vmem:[%s14233_s1 + $0x1824] ss:$16 sps:$4 sm:$0xff]  }
 0x18b   : > { %6745 = vmatprep.subr.bf16.mxu1 %v9875_v35  ;;  %v9911_v35 = vld [vmem:[%s14233_s1 + $0x1a24] ss:$16 sps:$4 sm:$0xff]  }
 0x18c   : > { %v6410_v62 = vpop.f32.mrf.mxu0  ;;  %6655 = vmatmul.mubr.bf16.vlgmr.msra.gmra.mxu0 %v12181_v45 }
 0x18d   : > { %v6451_v63 = vpop.f32.mrf.mxu1  ;;  %6696 = vmatmul.mubr.bf16.vlgmr.msra.gmra.mxu1 %v12185_v52  ;;  %v6411_v40 = vadd.f32 %v6410_v62, %v11995_v3  ;;  %6705 = vmatpush1.bf16.msra.mxu0 %v9870_v22  ;;  %v9882_v3 = vld [vmem:[%s14233_s1 + $0x18a0] ss:$16 sps:$4 sm:$0xff]   ;;  %v9920_v62 = vld [vmem:[%s14233_s1 + $0x19e4] ss:$16 sps:$4 sm:$0xff]  }
 0x18e   : > { %6746 = vmatpush1.bf16.msra.mxu1 %v9873_v44  ;;  %v6412_v41 = vpop.f32.mrf.mxu0  ;;  %6706 = vmatprep.subr.bf16.mxu0 %v9878_v61  ;;  %v9906_v22 = vld [vmem:[%s14233_s1 + $0x1820] ss:$16 sps:$4 sm:$0xff]   ;;  %v9914_v61 = vld [vmem:[%s14233_s1 + $0x1804] ss:$16 sps:$4 sm:$0xff]  }
 0x18f   : > { %v6453_v2 = vpop.f32.mrf.mxu1  ;;  %6747 = vmatprep.subr.bf16.mxu1 %v9881_v53  ;;  %v12219_v5 = vadd.f32 %v6451_v63, %v6411_v40  ;;  %v6413_v9 = vadd.f32 %v6412_v41, %v12006_v11  ;;  %6736 = vmatprep.mubr.bf16.mxu0 %v12204_v56  ;;  %v9909_v44 = vld [vmem:[%s14233_s1 + $0x1a20] ss:$16 sps:$4 sm:$0xff]   ;;  %v9917_v53 = vld [vmem:[%s14233_s1 + $0x1a04] ss:$16 sps:$4 sm:$0xff]  }
 0x190   : > { %6777 = vmatprep.mubr.bf16.mxu1 %v12208_v57  ;;  %v6414_v12 = vpop.f32.mrf.mxu0  ;;  %v9923_v63 = vld [vmem:[%s14233_s1 + $0x1be4] ss:$16 sps:$4 sm:$0xff]   ;;  %v9918_v40 = vld [vmem:[%s14233_s1 + $0x19e0] ss:$16 sps:$4 sm:$0xff]  }
 0x191   : > { %v6455_v13 = vpop.f32.mrf.mxu1  ;;  %v12230_v14 = vadd.f32 %v6453_v2, %v6413_v9  ;;  %6707 = vmatpush1.bf16.msra.mxu0 %v9876_v49  ;;  %v9912_v49 = vld [vmem:[%s14233_s1 + $0x1800] ss:$16 sps:$4 sm:$0xff]   ;;  %v9926_v2 = vld [vmem:[%s14233_s1 + $0x19c4] ss:$16 sps:$4 sm:$0xff]  }
 0x192   : > { %6748 = vmatpush1.bf16.msra.mxu1 %v9879_v50  ;;  %v6415_v15 = vpop.f32.mrf.mxu0  ;;  %6708 = vmatprep.subr.bf16.mxu0 %v9884_v4  ;;  %v9915_v50 = vld [vmem:[%s14233_s1 + $0x1a00] ss:$16 sps:$4 sm:$0xff]   ;;  %v9929_v4 = vld [vmem:[%s14233_s1 + $0x1bc4] ss:$16 sps:$4 sm:$0xff]  }
 0x193   : > { %v6456_v11 = vpop.f32.mrf.mxu1  ;;  %6749 = vmatprep.subr.bf16.mxu1 %v9887_v8  ;;  %v9921_v41 = vld [vmem:[%s14233_s1 + $0x1be0] ss:$16 sps:$4 sm:$0xff]   ;;  %v9938_v15 = vld [vmem:[%s14233_s1 + $0x1984] ss:$16 sps:$4 sm:$0xff]  }
 0x194   : > { %v9924_v8 = vld [vmem:[%s14233_s1 + $0x19c0] ss:$16 sps:$4 sm:$0xff]   ;;  %v9941_v11 = vld [vmem:[%s14233_s1 + $0x1b84] ss:$16 sps:$4 sm:$0xff]  }
 0x195   : > { %6709 = vmatpush1.bf16.msra.mxu0 %v9882_v3  ;;  %v9927_v9 = vld [vmem:[%s14233_s1 + $0x1bc0] ss:$16 sps:$4 sm:$0xff]   ;;  %v9932_v3 = vld [vmem:[%s14233_s1 + $0x19a4] ss:$16 sps:$4 sm:$0xff]  }
 0x196   : > { %6750 = vmatpush1.bf16.msra.mxu1 %v9885_v10  ;;  %6710 = vmatprep.subr.bf16.mxu0 %v9890_v18  ;;  %v9935_v10 = vld [vmem:[%s14233_s1 + $0x1ba4] ss:$16 sps:$4 sm:$0xff]   ;;  %v9930_v12 = vld [vmem:[%s14233_s1 + $0x19a0] ss:$16 sps:$4 sm:$0xff]  }
 0x197   : > { %6751 = vmatprep.subr.bf16.mxu1 %v9893_v19  ;;  %v9933_v13 = vld [vmem:[%s14233_s1 + $0x1ba0] ss:$16 sps:$4 sm:$0xff]  }
 0x198   : > { %v9936_v18 = vld [vmem:[%s14233_s1 + $0x1980] ss:$16 sps:$4 sm:$0xff]  }
 0x199   : > { %6711 = vmatpush1.bf16.msra.mxu0 %v9888_v20  ;;  %v9939_v19 = vld [vmem:[%s14233_s1 + $0x1b80] ss:$16 sps:$4 sm:$0xff]   ;;  %v9944_v20 = vld [vmem:[%s14233_s1 + $0x1964] ss:$16 sps:$4 sm:$0xff]  }
 0x19a   : > { %6752 = vmatpush1.bf16.msra.mxu1 %v9891_v21  ;;  %6712 = vmatprep.subr.bf16.mxu0 %v9896_v26  ;;  %v9947_v21 = vld [vmem:[%s14233_s1 + $0x1b64] ss:$16 sps:$4 sm:$0xff]   ;;  %v9942_v26 = vld [vmem:[%s14233_s1 + $0x1960] ss:$16 sps:$4 sm:$0xff]  }
 0x19b   : > { %6753 = vmatprep.subr.bf16.mxu1 %v9899_v27  ;;  %v9945_v27 = vld [vmem:[%s14233_s1 + $0x1b60] ss:$16 sps:$4 sm:$0xff]  }
 0x19d   : > { %6713 = vmatpush1.bf16.msra.mxu0 %v9894_v28  ;;  %v9950_v28 = vld [vmem:[%s14233_s1 + $0x1944] ss:$16 sps:$4 sm:$0xff]  }
 0x19e   : > { %6754 = vmatpush1.bf16.msra.mxu1 %v9897_v29  ;;  %6714 = vmatprep.subr.bf16.mxu0 %v9902_v30  ;;  %v9953_v29 = vld [vmem:[%s14233_s1 + $0x1b44] ss:$16 sps:$4 sm:$0xff]   ;;  %v9948_v30 = vld [vmem:[%s14233_s1 + $0x1940] ss:$16 sps:$4 sm:$0xff]  }
 0x19f   : > { %6755 = vmatprep.subr.bf16.mxu1 %v9905_v31  ;;  %v9951_v31 = vld [vmem:[%s14233_s1 + $0x1b40] ss:$16 sps:$4 sm:$0xff]  }
 0x1a1   : > { %6715 = vmatpush1.bf16.msra.mxu0 %v9900_v32  ;;  %v9956_v32 = vld [vmem:[%s14233_s1 + $0x1924] ss:$16 sps:$4 sm:$0xff]  }
 0x1a2   : > { %6756 = vmatpush1.bf16.msra.mxu1 %v9903_v33  ;;  %6716 = vmatprep.subr.bf16.mxu0 %v9908_v34  ;;  %v9959_v33 = vld [vmem:[%s14233_s1 + $0x1b24] ss:$16 sps:$4 sm:$0xff]   ;;  %v9954_v34 = vld [vmem:[%s14233_s1 + $0x1920] ss:$16 sps:$4 sm:$0xff]  }
 0x1a3   : > { %6757 = vmatprep.subr.bf16.mxu1 %v9911_v35  ;;  %v9957_v35 = vld [vmem:[%s14233_s1 + $0x1b20] ss:$16 sps:$4 sm:$0xff]  }
 0x1a5   : > { %6717 = vmatpush1.bf16.msra.mxu0 %v9906_v22  ;;  %v9962_v22 = vld [vmem:[%s14233_s1 + $0x1904] ss:$16 sps:$4 sm:$0xff]  }
 0x1a6   : > { %6758 = vmatpush1.bf16.msra.mxu1 %v9909_v44  ;;  %6718 = vmatprep.subr.bf16.mxu0 %v9914_v61  ;;  %v9965_v44 = vld [vmem:[%s14233_s1 + $0x1b04] ss:$16 sps:$4 sm:$0xff]   ;;  %v9960_v61 = vld [vmem:[%s14233_s1 + $0x1900] ss:$16 sps:$4 sm:$0xff]  }
 0x1a7   : > { %6759 = vmatprep.subr.bf16.mxu1 %v9917_v53  ;;  %v9963_v53 = vld [vmem:[%s14233_s1 + $0x1b00] ss:$16 sps:$4 sm:$0xff]  }
 0x1a9   : > { %6719 = vmatpush1.bf16.msra.mxu0 %v9912_v49  ;;  %v9972_v49 = vld [vmem:[%s14233_s1 + $0x1ce4] ss:$16 sps:$4 sm:$0xff]  }
 0x1aa   : > { %6760 = vmatpush1.bf16.msra.mxu1 %v9915_v50  ;;  %6720 = vmatprep.subr.bf16.mxu0 %v9920_v62  ;;  %v9975_v50 = vld [vmem:[%s14233_s1 + $0xec] ss:$16 sps:$4 sm:$0xff]   ;;  %v12395_v62 = vld [vmem:[%s10998_s26 + $0x70] sm:$0xff] }
 0x1ab   : > { %6761 = vmatprep.subr.bf16.mxu1 %v9923_v63  ;;  %v9970_v63 = vld [vmem:[%s14233_s1 + $0x1ce0] ss:$16 sps:$4 sm:$0xff]  }
 0x1ad   : > { %6721 = vmatpush2.bf16.msra.mxu0 %v9918_v40  ;;  %v9973_v40 = vld [vmem:[%s14233_s1 + $0xe8] ss:$16 sps:$4 sm:$0xff]  }
 0x1ae   : > { %6762 = vmatpush2.bf16.msra.mxu1 %v9921_v41  ;;  %6722 = vmatprep.subr.bf16.mxu0 %v9926_v2  ;;  %v12405_v41 = vcombine.low %v12171_v42, %v12171_v42  ;;  %v12409_v2 = vcombine.low %v12188_v58, %v12188_v58  ;;  %v9976_v42 = vld [vmem:[%s14233_s1 + $0x1cc0] ss:$16 sps:$4 sm:$0xff]   ;;  %v9979_v58 = vld [vmem:[%s14233_s1 + $0xc8] ss:$16 sps:$4 sm:$0xff]  }
 0x1af   : > { %6763 = vmatprep.subr.bf16.mxu1 %v9929_v4  ;;  %v9978_v4 = vld [vmem:[%s14233_s1 + $0x1cc4] ss:$16 sps:$4 sm:$0xff]  }
 0x1b1   : > { %6723 = vmatpush2.bf16.msra.mxu0 %v9924_v8  ;;  %v9981_v8 = vld [vmem:[%s14233_s1 + $0xcc] ss:$16 sps:$4 sm:$0xff]  }
 0x1b2   : > { %6764 = vmatpush2.bf16.msra.mxu1 %v9927_v9  ;;  %6724 = vmatprep.subr.bf16.mxu0 %v9932_v3  ;;  %v12425_v9 = vcombine.high %v12395_v62, %v12395_v62 }
 0x1b3   : > { %6765 = vmatprep.subr.bf16.mxu1 %v9935_v10 }
 0x1b5   : > { %6725 = vmatpush2.bf16.msra.mxu0 %v9930_v12 }
 0x1b6   : > { %6766 = vmatpush2.bf16.msra.mxu1 %v9933_v13  ;;  %6726 = vmatprep.subr.bf16.mxu0 %v9938_v15 }
 0x1b7   : > { %6767 = vmatprep.subr.bf16.mxu1 %v9941_v11  ;;  %v9984_v11 = vld [vmem:[%s14233_s1 + $0x1ca4] ss:$16 sps:$4 sm:$0xff]  }
 0x1b9   : > { %6727 = vmatpush2.bf16.msra.mxu0 %v9936_v18  ;;  %v9987_v18 = vld [vmem:[%s14233_s1 + $0xac] ss:$16 sps:$4 sm:$0xff]  }
 0x1ba   : > { %6768 = vmatpush2.bf16.msra.mxu1 %v9939_v19  ;;  %6728 = vmatprep.subr.bf16.mxu0 %v9944_v20 }
 0x1bb   : > { %6769 = vmatprep.subr.bf16.mxu1 %v9947_v21  ;;  %v9985_v21 = vld [vmem:[%s14233_s1 + $0xa8] ss:$16 sps:$4 sm:$0xff]  }
 0x1bd   : > { %6729 = vmatpush2.bf16.msra.mxu0 %v9942_v26 }
 0x1be   : > { %6770 = vmatpush2.bf16.msra.mxu1 %v9945_v27  ;;  %6730 = vmatprep.subr.bf16.mxu0 %v9950_v28 }
 0x1bf   : > { %6771 = vmatprep.subr.bf16.mxu1 %v9953_v29 }
 0x1c1   : > { %6731 = vmatpush2.bf16.msra.mxu0 %v9948_v30  ;;  %v9990_v30 = vld [vmem:[%s14233_s1 + $0x1c84] ss:$16 sps:$4 sm:$0xff]  }
 0x1c2   : > { %6772 = vmatpush2.bf16.msra.mxu1 %v9951_v31  ;;  %6732 = vmatprep.subr.bf16.mxu0 %v9956_v32  ;;  %v9993_v31 = vld [vmem:[%s14233_s1 + $0x8c] ss:$16 sps:$4 sm:$0xff]   ;;  %v9991_v32 = vld [vmem:[%s14233_s1 + $0x88] ss:$16 sps:$4 sm:$0xff]  }
 0x1c3   : > { %6773 = vmatprep.subr.bf16.mxu1 %v9959_v33  ;;  %v9996_v33 = vld [vmem:[%s14233_s1 + $0x1c64] ss:$16 sps:$4 sm:$0xff]  }
 0x1c5   : > { %6733 = vmatpush2.bf16.msra.mxu0 %v9954_v34  ;;  %v9999_v34 = vld [vmem:[%s14233_s1 + $0x6c] ss:$16 sps:$4 sm:$0xff]  }
 0x1c6   : > { %6774 = vmatpush2.bf16.msra.mxu1 %v9957_v35  ;;  %6734 = vmatprep.subr.bf16.mxu0 %v9962_v22  ;;  %v9994_v35 = vld [vmem:[%s14233_s1 + $0x1c60] ss:$16 sps:$4 sm:$0xff]   ;;  %v9997_v22 = vld [vmem:[%s14233_s1 + $0x68] ss:$16 sps:$4 sm:$0xff]  }
 0x1c7   : > { %6775 = vmatprep.subr.bf16.mxu1 %v9965_v44  ;;  %v10002_v44 = vld [vmem:[%s14233_s1 + $0x1c44] ss:$16 sps:$4 sm:$0xff]  }
 0x1c9   : > { %6735 = vmatpush2.bf16.msra.mxu0 %v9960_v61  ;;  %v10005_v61 = vld [vmem:[%s14233_s1 + $0x4c] ss:$16 sps:$4 sm:$0xff]  }
 0x1ca   : > { %6776 = vmatpush2.bf16.msra.mxu1 %v9963_v53  ;;  %6786 = vmatprep.subr.bf16.mxu0 %v9972_v49  ;;  %v10000_v53 = vld [vmem:[%s14233_s1 + $0x1c40] ss:$16 sps:$4 sm:$0xff]   ;;  %v10003_v49 = vld [vmem:[%s14233_s1 + $0x48] ss:$16 sps:$4 sm:$0xff]  }
 0x1cb   : > { %6827 = vmatprep.subr.bf16.mxu1 %v9975_v50  ;;  %v10008_v50 = vld [vmem:[%s14233_s1 + $0x1c24] ss:$16 sps:$4 sm:$0xff]  }
 0x1cc   : > { %v6492_v3 = vpop.f32.mrf.mxu0  ;;  %6737 = vmatmul.mubr.bf16.vlgmr.msra.gmra.mxu0 %v12405_v41 }
 0x1cd   : > { %v6533_v10 = vpop.f32.mrf.mxu1  ;;  %6778 = vmatmul.mubr.bf16.vlgmr.msra.gmra.mxu1 %v12409_v2  ;;  %v6493_v12 = vadd.f32 %v6492_v3, %v12219_v5  ;;  %6787 = vmatpush1.bf16.msra.mxu0 %v9970_v63  ;;  %v9982_v5 = vld [vmem:[%s14233_s1 + $0x1ca0] ss:$16 sps:$4 sm:$0xff]   ;;  %v10011_v63 = vld [vmem:[%s14233_s1 + $0x2c] ss:$16 sps:$4 sm:$0xff]   ;;  %v10015_v3 = vld [vmem:[%s14233_s1 + $0x8] ss:$16 sps:$4 sm:$0xff]  }
 0x1ce   : > { %6828 = vmatpush1.bf16.msra.mxu1 %v9973_v40  ;;  %v6494_v13 = vpop.f32.mrf.mxu0  ;;  %6788 = vmatprep.subr.bf16.mxu0 %v9978_v4  ;;  %v10006_v40 = vld [vmem:[%s14233_s1 + $0x1c20] ss:$16 sps:$4 sm:$0xff]   ;;  %v10009_v4 = vld [vmem:[%s14233_s1 + $0x28] ss:$16 sps:$4 sm:$0xff]  }
 0x1cf   : > { %v6535_v15 = vpop.f32.mrf.mxu1  ;;  %6829 = vmatprep.subr.bf16.mxu1 %v9981_v8  ;;  %v12436_v19 = vadd.f32 %v6533_v10, %v6493_v12  ;;  %v6495_v20 = vadd.f32 %v6494_v13, %v12230_v14  ;;  %6818 = vmatprep.mubr.bf16.mxu0 %v12425_v9  ;;  %v10014_v8 = vld [vmem:[%s14233_s1 + $0x1c04] ss:$16 sps:$4 sm:$0xff]   ;;  %v10023_v12 = vld [vmem:[%s14233_s1 + $0x1ec] ss:$16 sps:$4 sm:$0xff]   ;;  %v10018_v13 = vld [vmem:[%s14233_s1 + $0x1de0] ss:$16 sps:$4 sm:$0xff]  }
 0x1d0   : > { %6859 = vmatprep.mubr.bf16.mxu1 %v11007_v47  ;;  %v6496_v26 = vpop.f32.mrf.mxu0  ;;  %v9988_v47 = vld [vmem:[%s14233_s1 + $0x1c80] ss:$16 sps:$4 sm:$0xff]   ;;  %v10020_v10 = vld [vmem:[%s14233_s1 + $0x1de4] ss:$16 sps:$4 sm:$0xff]  }
 0x1d1   : > { %v6537_v27 = vpop.f32.mrf.mxu1  ;;  %v12447_v28 = vadd.f32 %v6535_v15, %v6495_v20  ;;  %6789 = vmatpush1.bf16.msra.mxu0 %v9976_v42  ;;  %v10017_v42 = vld [vmem:[%s14233_s1 + $0xc] ss:$16 sps:$4 sm:$0xff]   ;;  %v10021_v15 = vld [vmem:[%s14233_s1 + $0x1e8] ss:$16 sps:$4 sm:$0xff]   ;;  %v10024_v20 = vld [vmem:[%s14233_s1 + $0x1dc0] ss:$16 sps:$4 sm:$0xff]  }
 0x1d2   : > { %6830 = vmatpush1.bf16.msra.mxu1 %v9979_v58  ;;  %v6497_v29 = vpop.f32.mrf.mxu0  ;;  %6790 = vmatprep.subr.bf16.mxu0 %v9984_v11  ;;  %v10012_v58 = vld [vmem:[%s14233_s1 + $0x1c00] ss:$16 sps:$4 sm:$0xff]   ;;  %v10026_v11 = vld [vmem:[%s14233_s1 + $0x1dc4] ss:$16 sps:$4 sm:$0xff]   ;;  %v10035_v26 = vld [vmem:[%s14233_s1 + $0x1ac] ss:$16 sps:$4 sm:$0xff]  }
 0x1d3   : > { %v6538_v14 = vpop.f32.mrf.mxu1  ;;  %6831 = vmatprep.subr.bf16.mxu1 %v9987_v18  ;;  %v10029_v18 = vld [vmem:[%s14233_s1 + $0x1cc] ss:$16 sps:$4 sm:$0xff]   ;;  %v10030_v27 = vld [vmem:[%s14233_s1 + $0x1da0] ss:$16 sps:$4 sm:$0xff]   ;;  %v10033_v29 = vld [vmem:[%s14233_s1 + $0x1a8] ss:$16 sps:$4 sm:$0xff]  }
 0x1d4   : > { %v10038_v14 = vld [vmem:[%s14233_s1 + $0x1d84] ss:$16 sps:$4 sm:$0xff]  }
 0x1d5   : > { %6791 = vmatpush1.bf16.msra.mxu0 %v9982_v5  ;;  %v10027_v5 = vld [vmem:[%s14233_s1 + $0x1c8] ss:$16 sps:$4 sm:$0xff]  }
 0x1d6   : > { %6832 = vmatpush1.bf16.msra.mxu1 %v9985_v21  ;;  %6792 = vmatprep.subr.bf16.mxu0 %v9990_v30  ;;  %v10032_v21 = vld [vmem:[%s14233_s1 + $0x1da4] ss:$16 sps:$4 sm:$0xff]   ;;  %v10041_v30 = vld [vmem:[%s14233_s1 + $0x18c] ss:$16 sps:$4 sm:$0xff]  }
 0x1d7   : > { %6833 = vmatprep.subr.bf16.mxu1 %v9993_v31  ;;  %v10036_v31 = vld [vmem:[%s14233_s1 + $0x1d80] ss:$16 sps:$4 sm:$0xff]  }
 0x1d9   : > { %6793 = vmatpush1.bf16.msra.mxu0 %v9988_v47  ;;  %v10039_v47 = vld [vmem:[%s14233_s1 + $0x188] ss:$16 sps:$4 sm:$0xff]  }
 0x1da   : > { %6834 = vmatpush1.bf16.msra.mxu1 %v9991_v32  ;;  %6794 = vmatprep.subr.bf16.mxu0 %v9996_v33  ;;  %v10044_v32 = vld [vmem:[%s14233_s1 + $0x1d64] ss:$16 sps:$4 sm:$0xff]   ;;  %v10047_v33 = vld [vmem:[%s14233_s1 + $0x16c] ss:$16 sps:$4 sm:$0xff]  }
 0x1db   : > { %6835 = vmatprep.subr.bf16.mxu1 %v9999_v34  ;;  %v10042_v34 = vld [vmem:[%s14233_s1 + $0x1d60] ss:$16 sps:$4 sm:$0xff]  }
 0x1dd   : > { %6795 = vmatpush1.bf16.msra.mxu0 %v9994_v35  ;;  %v10045_v35 = vld [vmem:[%s14233_s1 + $0x168] ss:$16 sps:$4 sm:$0xff]  }
 0x1de   : > { %6836 = vmatpush1.bf16.msra.mxu1 %v9997_v22  ;;  %6796 = vmatprep.subr.bf16.mxu0 %v10002_v44  ;;  %v10050_v22 = vld [vmem:[%s14233_s1 + $0x1d44] ss:$16 sps:$4 sm:$0xff]   ;;  %v10053_v44 = vld [vmem:[%s14233_s1 + $0x14c] ss:$16 sps:$4 sm:$0xff]  }
 0x1df   : > { %6837 = vmatprep.subr.bf16.mxu1 %v10005_v61  ;;  %v10048_v61 = vld [vmem:[%s14233_s1 + $0x1d40] ss:$16 sps:$4 sm:$0xff]  }
 0x1e1   : > { %6797 = vmatpush1.bf16.msra.mxu0 %v10000_v53  ;;  %v10051_v53 = vld [vmem:[%s14233_s1 + $0x148] ss:$16 sps:$4 sm:$0xff]  }
 0x1e2   : > { %6838 = vmatpush1.bf16.msra.mxu1 %v10003_v49  ;;  %6798 = vmatprep.subr.bf16.mxu0 %v10008_v50  ;;  %v10056_v49 = vld [vmem:[%s14233_s1 + $0x1d24] ss:$16 sps:$4 sm:$0xff]   ;;  %v10059_v50 = vld [vmem:[%s14233_s1 + $0x12c] ss:$16 sps:$4 sm:$0xff]  }
 0x1e3   : > { %6839 = vmatprep.subr.bf16.mxu1 %v10011_v63  ;;  %v10054_v63 = vld [vmem:[%s14233_s1 + $0x1d20] ss:$16 sps:$4 sm:$0xff]  }
 0x1e5   : > { %6799 = vmatpush1.bf16.msra.mxu0 %v10006_v40  ;;  %v10057_v40 = vld [vmem:[%s14233_s1 + $0x128] ss:$16 sps:$4 sm:$0xff]  }
 0x1e6   : > { %6840 = vmatpush1.bf16.msra.mxu1 %v10009_v4  ;;  %6800 = vmatprep.subr.bf16.mxu0 %v10014_v8  ;;  %v10062_v4 = vld [vmem:[%s14233_s1 + $0x1d04] ss:$16 sps:$4 sm:$0xff]   ;;  %v10065_v8 = vld [vmem:[%s14233_s1 + $0x10c] ss:$16 sps:$4 sm:$0xff]  }
 0x1e7   : > { %6841 = vmatprep.subr.bf16.mxu1 %v10017_v42  ;;  %v10060_v42 = vld [vmem:[%s14233_s1 + $0x1d00] ss:$16 sps:$4 sm:$0xff]  }
 0x1e9   : > { %6801 = vmatpush1.bf16.msra.mxu0 %v10012_v58  ;;  %v10063_v58 = vld [vmem:[%s14233_s1 + $0x108] ss:$16 sps:$4 sm:$0xff]  }
 0x1ea   : > { %6842 = vmatpush1.bf16.msra.mxu1 %v10015_v3  ;;  %6802 = vmatprep.subr.bf16.mxu0 %v10020_v10  ;;  %v10070_v3 = vld [vmem:[%s14233_s1 + $0x2ec] ss:$16 sps:$4 sm:$0xff]  }
 0x1eb   : > { %6843 = vmatprep.subr.bf16.mxu1 %v10023_v12  ;;  %v10073_v10 = vld [vmem:[%s14233_s1 + $0x4ec] ss:$16 sps:$4 sm:$0xff]   ;;  %v10068_v12 = vld [vmem:[%s14233_s1 + $0x2e8] ss:$16 sps:$4 sm:$0xff]  }
 0x1ed   : > { %6803 = vmatpush2.bf16.msra.mxu0 %v10018_v13  ;;  %v10071_v13 = vld [vmem:[%s14233_s1 + $0x4e8] ss:$16 sps:$4 sm:$0xff]  }
 0x1ee   : > { %6844 = vmatpush2.bf16.msra.mxu1 %v10021_v15  ;;  %6804 = vmatprep.subr.bf16.mxu0 %v10026_v11  ;;  %v12619_v15 = vcombine.low %v12395_v62, %v12395_v62  ;;  %v10076_v11 = vld [vmem:[%s14233_s1 + $0x2cc] ss:$16 sps:$4 sm:$0xff]   ;;  %v10077_v62 = vld [vmem:[%s14233_s1 + $0x4c8] ss:$16 sps:$4 sm:$0xff]  }
 0x1ef   : > { %6845 = vmatprep.subr.bf16.mxu1 %v10029_v18  ;;  %v10079_v18 = vld [vmem:[%s14233_s1 + $0x4cc] ss:$16 sps:$4 sm:$0xff]  }
 0x1f1   : > { %6805 = vmatpush2.bf16.msra.mxu0 %v10024_v20  ;;  %v10074_v20 = vld [vmem:[%s14233_s1 + $0x2c8] ss:$16 sps:$4 sm:$0xff]  }
 0x1f2   : > { %6846 = vmatpush2.bf16.msra.mxu1 %v10027_v5  ;;  %6806 = vmatprep.subr.bf16.mxu0 %v10032_v21 }
 0x1f3   : > { %6847 = vmatprep.subr.bf16.mxu1 %v10035_v26 }
 0x1f5   : > { %6807 = vmatpush2.bf16.msra.mxu0 %v10030_v27 }
 0x1f6   : > { %6848 = vmatpush2.bf16.msra.mxu1 %v10033_v29  ;;  %6808 = vmatprep.subr.bf16.mxu0 %v10038_v14  ;;  %v10082_v14 = vld [vmem:[%s14233_s1 + $0x2ac] ss:$16 sps:$4 sm:$0xff]  }
 0x1f7   : > { %6849 = vmatprep.subr.bf16.mxu1 %v10041_v30  ;;  %v10085_v30 = vld [vmem:[%s14233_s1 + $0x4ac] ss:$16 sps:$4 sm:$0xff]  }
 0x1f9   : > { %6809 = vmatpush2.bf16.msra.mxu0 %v10036_v31 }
 0x1fa   : > { %6850 = vmatpush2.bf16.msra.mxu1 %v10039_v47  ;;  %6810 = vmatprep.subr.bf16.mxu0 %v10044_v32  ;;  %v10083_v47 = vld [vmem:[%s14233_s1 + $0x4a8] ss:$16 sps:$4 sm:$0xff]  }
 0x1fb   : > { %6851 = vmatprep.subr.bf16.mxu1 %v10047_v33 }
 0x1fd   : > { %6811 = vmatpush2.bf16.msra.mxu0 %v10042_v34 }
 0x1fe   : > { %6852 = vmatpush2.bf16.msra.mxu1 %v10045_v35  ;;  %6812 = vmatprep.subr.bf16.mxu0 %v10050_v22  ;;  %v10088_v22 = vld [vmem:[%s14233_s1 + $0x28c] ss:$16 sps:$4 sm:$0xff]  }
 0x1ff   : > { %6853 = vmatprep.subr.bf16.mxu1 %v10053_v44  ;;  %v10089_v44 = vld [vmem:[%s14233_s1 + $0x488] ss:$16 sps:$4 sm:$0xff]  }
 0x201   : > { %6813 = vmatpush2.bf16.msra.mxu0 %v10048_v61  ;;  %v10094_v61 = vld [vmem:[%s14233_s1 + $0x26c] ss:$16 sps:$4 sm:$0xff]  }
 0x202   : > { %6854 = vmatpush2.bf16.msra.mxu1 %v10051_v53  ;;  %6814 = vmatprep.subr.bf16.mxu0 %v10056_v49  ;;  %v10097_v53 = vld [vmem:[%s14233_s1 + $0x46c] ss:$16 sps:$4 sm:$0xff]   ;;  %v10092_v49 = vld [vmem:[%s14233_s1 + $0x268] ss:$16 sps:$4 sm:$0xff]  }
 0x203   : > { %6855 = vmatprep.subr.bf16.mxu1 %v10059_v50  ;;  %v10095_v50 = vld [vmem:[%s14233_s1 + $0x468] ss:$16 sps:$4 sm:$0xff]  }
 0x205   : > { %6815 = vmatpush2.bf16.msra.mxu0 %v10054_v63  ;;  %v10100_v63 = vld [vmem:[%s14233_s1 + $0x24c] ss:$16 sps:$4 sm:$0xff]  }
 0x206   : > { %6856 = vmatpush2.bf16.msra.mxu1 %v10057_v40  ;;  %6816 = vmatprep.subr.bf16.mxu0 %v10062_v4  ;;  %v10103_v40 = vld [vmem:[%s14233_s1 + $0x44c] ss:$16 sps:$4 sm:$0xff]   ;;  %v10098_v4 = vld [vmem:[%s14233_s1 + $0x248] ss:$16 sps:$4 sm:$0xff]  }
 0x207   : > { %6857 = vmatprep.subr.bf16.mxu1 %v10065_v8  ;;  %v10101_v8 = vld [vmem:[%s14233_s1 + $0x448] ss:$16 sps:$4 sm:$0xff]  }
 0x209   : > { %6817 = vmatpush2.bf16.msra.mxu0 %v10060_v42  ;;  %v10106_v42 = vld [vmem:[%s14233_s1 + $0x22c] ss:$16 sps:$4 sm:$0xff]  }
 0x20a   : > { %6858 = vmatpush2.bf16.msra.mxu1 %v10063_v58  ;;  %6868 = vmatprep.subr.bf16.mxu0 %v10070_v3  ;;  %v10109_v58 = vld [vmem:[%s14233_s1 + $0x42c] ss:$16 sps:$4 sm:$0xff]   ;;  %v10104_v3 = vld [vmem:[%s14233_s1 + $0x228] ss:$16 sps:$4 sm:$0xff]  }
 0x20b   : > { %6909 = vmatprep.subr.bf16.mxu1 %v10073_v10  ;;  %v10107_v10 = vld [vmem:[%s14233_s1 + $0x428] ss:$16 sps:$4 sm:$0xff]  }
 0x20c   : > { %v6574_v5 = vpop.f32.mrf.mxu0  ;;  %6819 = vmatmul.mubr.bf16.vlgmr.msra.gmra.mxu0 %v12619_v15 }
 0x20d   : > { %v6615_v21 = vpop.f32.mrf.mxu1  ;;  %6860 = vmatmul.mubr.bf16.vlgmr.msra.gmra.mxu1 %v11074_v6  ;;  %v6575_v26 = vadd.f32 %v6574_v5, %v12436_v19  ;;  %6869 = vmatpush1.bf16.msra.mxu0 %v10068_v12  ;;  %v10080_v19 = vld [vmem:[%s14233_s1 + $0x2a8] ss:$16 sps:$4 sm:$0xff]   ;;  %v10112_v12 = vld [vmem:[%s14233_s1 + $0x20c] ss:$16 sps:$4 sm:$0xff]  }
 0x20e   : > { %6910 = vmatpush1.bf16.msra.mxu1 %v10071_v13  ;;  %v6576_v27 = vpop.f32.mrf.mxu0  ;;  %6870 = vmatprep.subr.bf16.mxu0 %v10076_v11  ;;  %v10115_v13 = vld [vmem:[%s14233_s1 + $0x40c] ss:$16 sps:$4 sm:$0xff]   ;;  %v10110_v11 = vld [vmem:[%s14233_s1 + $0x208] ss:$16 sps:$4 sm:$0xff]  }
 0x20f   : > { %v6617_v29 = vpop.f32.mrf.mxu1  ;;  %6911 = vmatprep.subr.bf16.mxu1 %v10079_v18  ;;  %v12642_v31 = vadd.f32 %v6615_v21, %v6575_v26  ;;  %v6577_v6 = vadd.f32 %v6576_v27, %v12447_v28  ;;  %6900 = vmatprep.mubr.bf16.mxu0 %v11016_v51  ;;  %v10091_v51 = vld [vmem:[%s14233_s1 + $0x48c] ss:$16 sps:$4 sm:$0xff]   ;;  %v10113_v18 = vld [vmem:[%s14233_s1 + $0x408] ss:$16 sps:$4 sm:$0xff]  }
 0x210   : > { %6941 = vmatprep.mubr.bf16.mxu1 %v11166_v36  ;;  %v6578_v32 = vpop.f32.mrf.mxu0  ;;  %v10086_v36 = vld [vmem:[%s14233_s1 + $0x288] ss:$16 sps:$4 sm:$0xff]   ;;  %v10124_v26 = vld [vmem:[%s14233_s1 + $0x3cc] ss:$16 sps:$4 sm:$0xff]  }
 0x211   : > { %v6619_v33 = vpop.f32.mrf.mxu1  ;;  %v12653_v34 = vadd.f32 %v6617_v29, %v6577_v6  ;;  %6871 = vmatpush1.bf16.msra.mxu0 %v10074_v20  ;;  %v10118_v20 = vld [vmem:[%s14233_s1 + $0x3ec] ss:$16 sps:$4 sm:$0xff]   ;;  %v10116_v5 = vld [vmem:[%s14233_s1 + $0x3e8] ss:$16 sps:$4 sm:$0xff]  }
 0x212   : > { %6912 = vmatpush1.bf16.msra.mxu1 %v10077_v62  ;;  %v6579_v35 = vpop.f32.mrf.mxu0  ;;  %6872 = vmatprep.subr.bf16.mxu0 %v10082_v14  ;;  %v10121_v62 = vld [vmem:[%s14233_s1 + $0x5ec] ss:$16 sps:$4 sm:$0xff]   ;;  %v10119_v21 = vld [vmem:[%s14233_s1 + $0x5e8] ss:$16 sps:$4 sm:$0xff]  }
 0x213   : > { %v6620_v28 = vpop.f32.mrf.mxu1  ;;  %6913 = vmatprep.subr.bf16.mxu1 %v10085_v30  ;;  %v10127_v27 = vld [vmem:[%s14233_s1 + $0x5cc] ss:$16 sps:$4 sm:$0xff]   ;;  %v10122_v29 = vld [vmem:[%s14233_s1 + $0x3c8] ss:$16 sps:$4 sm:$0xff]  }
 0x214   : > { %v10125_v14 = vld [vmem:[%s14233_s1 + $0x5c8] ss:$16 sps:$4 sm:$0xff]   ;;  %v10130_v30 = vld [vmem:[%s14233_s1 + $0x3ac] ss:$16 sps:$4 sm:$0xff]  }
 0x215   : > { %6873 = vmatpush1.bf16.msra.mxu0 %v10080_v19  ;;  %v10133_v6 = vld [vmem:[%s14233_s1 + $0x5ac] ss:$16 sps:$4 sm:$0xff]   ;;  %v10128_v19 = vld [vmem:[%s14233_s1 + $0x3a8] ss:$16 sps:$4 sm:$0xff]  }
 0x216   : > { %6914 = vmatpush1.bf16.msra.mxu1 %v10083_v47  ;;  %6874 = vmatprep.subr.bf16.mxu0 %v10088_v22  ;;  %v10131_v47 = vld [vmem:[%s14233_s1 + $0x5a8] ss:$16 sps:$4 sm:$0xff]   ;;  %v10136_v32 = vld [vmem:[%s14233_s1 + $0x38c] ss:$16 sps:$4 sm:$0xff]  }
 0x217   : > { %6915 = vmatprep.subr.bf16.mxu1 %v10091_v51  ;;  %v10139_v33 = vld [vmem:[%s14233_s1 + $0x58c] ss:$16 sps:$4 sm:$0xff]   ;;  %v10134_v35 = vld [vmem:[%s14233_s1 + $0x388] ss:$16 sps:$4 sm:$0xff]  }
 0x218   : > { %v10137_v28 = vld [vmem:[%s14233_s1 + $0x588] ss:$16 sps:$4 sm:$0xff]   ;;  %v10142_v22 = vld [vmem:[%s14233_s1 + $0x36c] ss:$16 sps:$4 sm:$0xff]  }
 0x219   : > { %6875 = vmatpush1.bf16.msra.mxu0 %v10086_v36  ;;  %v10145_v51 = vld [vmem:[%s14233_s1 + $0x56c] ss:$16 sps:$4 sm:$0xff]   ;;  %v10140_v36 = vld [vmem:[%s14233_s1 + $0x368] ss:$16 sps:$4 sm:$0xff]  }
 0x21a   : > { %6916 = vmatpush1.bf16.msra.mxu1 %v10089_v44  ;;  %6876 = vmatprep.subr.bf16.mxu0 %v10094_v61  ;;  %v10143_v44 = vld [vmem:[%s14233_s1 + $0x568] ss:$16 sps:$4 sm:$0xff]   ;;  %v10148_v61 = vld [vmem:[%s14233_s1 + $0x34c] ss:$16 sps:$4 sm:$0xff]  }
 0x21b   : > { %6917 = vmatprep.subr.bf16.mxu1 %v10097_v53  ;;  %v10151_v53 = vld [vmem:[%s14233_s1 + $0x54c] ss:$16 sps:$4 sm:$0xff]  }
 0x21d   : > { %6877 = vmatpush1.bf16.msra.mxu0 %v10092_v49  ;;  %v10146_v49 = vld [vmem:[%s14233_s1 + $0x348] ss:$16 sps:$4 sm:$0xff]  }
 0x21e   : > { %6918 = vmatpush1.bf16.msra.mxu1 %v10095_v50  ;;  %6878 = vmatprep.subr.bf16.mxu0 %v10100_v63  ;;  %v10149_v50 = vld [vmem:[%s14233_s1 + $0x548] ss:$16 sps:$4 sm:$0xff]   ;;  %v10154_v63 = vld [vmem:[%s14233_s1 + $0x32c] ss:$16 sps:$4 sm:$0xff]  }
 0x21f   : > { %6919 = vmatprep.subr.bf16.mxu1 %v10103_v40  ;;  %v10157_v40 = vld [vmem:[%s14233_s1 + $0x52c] ss:$16 sps:$4 sm:$0xff]  }
 0x221   : > { %6879 = vmatpush1.bf16.msra.mxu0 %v10098_v4  ;;  %v10152_v4 = vld [vmem:[%s14233_s1 + $0x328] ss:$16 sps:$4 sm:$0xff]  }
 0x222   : > { %6920 = vmatpush1.bf16.msra.mxu1 %v10101_v8  ;;  %6880 = vmatprep.subr.bf16.mxu0 %v10106_v42  ;;  %v10155_v8 = vld [vmem:[%s14233_s1 + $0x528] ss:$16 sps:$4 sm:$0xff]   ;;  %v10160_v42 = vld [vmem:[%s14233_s1 + $0x30c] ss:$16 sps:$4 sm:$0xff]  }
 0x223   : > { %6921 = vmatprep.subr.bf16.mxu1 %v10109_v58  ;;  %v10163_v58 = vld [vmem:[%s14233_s1 + $0x50c] ss:$16 sps:$4 sm:$0xff]  }
 0x225   : > { %6881 = vmatpush1.bf16.msra.mxu0 %v10104_v3  ;;  %v10158_v3 = vld [vmem:[%s14233_s1 + $0x308] ss:$16 sps:$4 sm:$0xff]  }
 0x226   : > { %6922 = vmatpush1.bf16.msra.mxu1 %v10107_v10  ;;  %6882 = vmatprep.subr.bf16.mxu0 %v10112_v12  ;;  %v10161_v10 = vld [vmem:[%s14233_s1 + $0x508] ss:$16 sps:$4 sm:$0xff]   ;;  %v10166_v12 = vld [vmem:[%s14233_s1 + $0x6ec] ss:$16 sps:$4 sm:$0xff]  }
 0x227   : > { %6923 = vmatprep.subr.bf16.mxu1 %v10115_v13  ;;  %v10169_v13 = vld [vmem:[%s14233_s1 + $0x8ec] ss:$16 sps:$4 sm:$0xff]  }
 0x229   : > { %6883 = vmatpush1.bf16.msra.mxu0 %v10110_v11  ;;  %v10164_v11 = vld [vmem:[%s14233_s1 + $0x6e8] ss:$16 sps:$4 sm:$0xff]  }
 0x22a   : > { %6924 = vmatpush1.bf16.msra.mxu1 %v10113_v18  ;;  %6884 = vmatprep.subr.bf16.mxu0 %v10118_v20  ;;  %v10167_v18 = vld [vmem:[%s14233_s1 + $0x8e8] ss:$16 sps:$4 sm:$0xff]   ;;  %v10172_v20 = vld [vmem:[%s14233_s1 + $0x6cc] ss:$16 sps:$4 sm:$0xff]  }
 0x22b   : > { %6925 = vmatprep.subr.bf16.mxu1 %v10121_v62  ;;  %v10175_v62 = vld [vmem:[%s14233_s1 + $0x8cc] ss:$16 sps:$4 sm:$0xff]  }
 0x22d   : > { %6885 = vmatpush2.bf16.msra.mxu0 %v10116_v5  ;;  %v10170_v5 = vld [vmem:[%s14233_s1 + $0x6c8] ss:$16 sps:$4 sm:$0xff]  }
 0x22e   : > { %6926 = vmatpush2.bf16.msra.mxu1 %v10119_v21  ;;  %6886 = vmatprep.subr.bf16.mxu0 %v10124_v26  ;;  %v10173_v21 = vld [vmem:[%s14233_s1 + $0x8c8] ss:$16 sps:$4 sm:$0xff]  }
 0x22f   : > { %6927 = vmatprep.subr.bf16.mxu1 %v10127_v27 }
 0x231   : > { %6887 = vmatpush2.bf16.msra.mxu0 %v10122_v29 }
 0x232   : > { %6928 = vmatpush2.bf16.msra.mxu1 %v10125_v14  ;;  %6888 = vmatprep.subr.bf16.mxu0 %v10130_v30 }
 0x233   : > { %6929 = vmatprep.subr.bf16.mxu1 %v10133_v6  ;;  %v10178_v6 = vld [vmem:[%s14233_s1 + $0x6ac] ss:$16 sps:$4 sm:$0xff]  }
 0x235   : > { %6889 = vmatpush2.bf16.msra.mxu0 %v10128_v19  ;;  %v10181_v19 = vld [vmem:[%s14233_s1 + $0x8ac] ss:$16 sps:$4 sm:$0xff]  }
 0x236   : > { %6930 = vmatpush2.bf16.msra.mxu1 %v10131_v47  ;;  %6890 = vmatprep.subr.bf16.mxu0 %v10136_v32 }
 0x237   : > { %6931 = vmatprep.subr.bf16.mxu1 %v10139_v33 }
 0x239   : > { %6891 = vmatpush2.bf16.msra.mxu0 %v10134_v35 }
 0x23a   : > { %6932 = vmatpush2.bf16.msra.mxu1 %v10137_v28  ;;  %6892 = vmatprep.subr.bf16.mxu0 %v10142_v22  ;;  %v10184_v22 = vld [vmem:[%s14233_s1 + $0x68c] ss:$16 sps:$4 sm:$0xff]  }
 0x23b   : > { %6933 = vmatprep.subr.bf16.mxu1 %v10145_v51  ;;  %v10185_v51 = vld [vmem:[%s14233_s1 + $0x888] ss:$16 sps:$4 sm:$0xff]  }
 0x23d   : > { %6893 = vmatpush2.bf16.msra.mxu0 %v10140_v36  ;;  %v10190_v36 = vld [vmem:[%s14233_s1 + $0x66c] ss:$16 sps:$4 sm:$0xff]  }
 0x23e   : > { %6934 = vmatpush2.bf16.msra.mxu1 %v10143_v44  ;;  %6894 = vmatprep.subr.bf16.mxu0 %v10148_v61  ;;  %v10193_v44 = vld [vmem:[%s14233_s1 + $0x86c] ss:$16 sps:$4 sm:$0xff]   ;;  %v10188_v61 = vld [vmem:[%s14233_s1 + $0x668] ss:$16 sps:$4 sm:$0xff]  }
 0x23f   : > { %6935 = vmatprep.subr.bf16.mxu1 %v10151_v53  ;;  %v10191_v53 = vld [vmem:[%s14233_s1 + $0x868] ss:$16 sps:$4 sm:$0xff]  }
 0x241   : > { %6895 = vmatpush2.bf16.msra.mxu0 %v10146_v49  ;;  %v10196_v49 = vld [vmem:[%s14233_s1 + $0x64c] ss:$16 sps:$4 sm:$0xff]  }
 0x242   : > { %6936 = vmatpush2.bf16.msra.mxu1 %v10149_v50  ;;  %6896 = vmatprep.subr.bf16.mxu0 %v10154_v63  ;;  %v10199_v50 = vld [vmem:[%s14233_s1 + $0x84c] ss:$16 sps:$4 sm:$0xff]   ;;  %v10194_v63 = vld [vmem:[%s14233_s1 + $0x648] ss:$16 sps:$4 sm:$0xff]  }
 0x243   : > { %6937 = vmatprep.subr.bf16.mxu1 %v10157_v40  ;;  %v10197_v40 = vld [vmem:[%s14233_s1 + $0x848] ss:$16 sps:$4 sm:$0xff]  }
 0x245   : > { %6897 = vmatpush2.bf16.msra.mxu0 %v10152_v4  ;;  %v10202_v4 = vld [vmem:[%s14233_s1 + $0x62c] ss:$16 sps:$4 sm:$0xff]  }
 0x246   : > { %6938 = vmatpush2.bf16.msra.mxu1 %v10155_v8  ;;  %6898 = vmatprep.subr.bf16.mxu0 %v10160_v42  ;;  %v10205_v8 = vld [vmem:[%s14233_s1 + $0x82c] ss:$16 sps:$4 sm:$0xff]   ;;  %v10200_v42 = vld [vmem:[%s14233_s1 + $0x628] ss:$16 sps:$4 sm:$0xff]  }
 0x247   : > { %6939 = vmatprep.subr.bf16.mxu1 %v10163_v58  ;;  %v10203_v58 = vld [vmem:[%s14233_s1 + $0x828] ss:$16 sps:$4 sm:$0xff]  }
 0x249   : > { %6899 = vmatpush2.bf16.msra.mxu0 %v10158_v3  ;;  %v10208_v3 = vld [vmem:[%s14233_s1 + $0x60c] ss:$16 sps:$4 sm:$0xff]  }
 0x24a   : > { %6940 = vmatpush2.bf16.msra.mxu1 %v10161_v10  ;;  %6950 = vmatprep.subr.bf16.mxu0 %v10166_v12  ;;  %v10211_v10 = vld [vmem:[%s14233_s1 + $0x80c] ss:$16 sps:$4 sm:$0xff]   ;;  %v10206_v12 = vld [vmem:[%s14233_s1 + $0x608] ss:$16 sps:$4 sm:$0xff]  }
 0x24b   : > { %6991 = vmatprep.subr.bf16.mxu1 %v10169_v13  ;;  %v10209_v13 = vld [vmem:[%s14233_s1 + $0x808] ss:$16 sps:$4 sm:$0xff]  }
 0x24c   : > { %v6656_v26 = vpop.f32.mrf.mxu0  ;;  %6901 = vmatmul.mubr.bf16.vlgmr.msra.gmra.mxu0 %v11076_v7 }
 0x24d   : > { %v6697_v27 = vpop.f32.mrf.mxu1  ;;  %6942 = vmatmul.mubr.bf16.vlgmr.msra.gmra.mxu1 %v11290_v16  ;;  %v6657_v29 = vadd.f32 %v6656_v26, %v12642_v31  ;;  %6951 = vmatpush1.bf16.msra.mxu0 %v10164_v11  ;;  %v10176_v16 = vld [vmem:[%s14233_s1 + $0x6a8] ss:$16 sps:$4 sm:$0xff]   ;;  %v10214_v11 = vld [vmem:[%s14233_s1 + $0x7ec] ss:$16 sps:$4 sm:$0xff]  }
 0x24e   : > { %6992 = vmatpush1.bf16.msra.mxu1 %v10167_v18  ;;  %v6658_v14 = vpop.f32.mrf.mxu0  ;;  %6952 = vmatprep.subr.bf16.mxu0 %v10172_v20  ;;  %v10179_v31 = vld [vmem:[%s14233_s1 + $0x8a8] ss:$16 sps:$4 sm:$0xff]   ;;  %v10217_v18 = vld [vmem:[%s14233_s1 + $0x9ec] ss:$16 sps:$4 sm:$0xff]  }
 0x24f   : > { %v6699_v30 = vpop.f32.mrf.mxu1  ;;  %6993 = vmatprep.subr.bf16.mxu1 %v10175_v62  ;;  %v12844_v47 = vadd.f32 %v6697_v27, %v6657_v29  ;;  %v6659_v7 = vadd.f32 %v6658_v14, %v12653_v34  ;;  %6982 = vmatprep.mubr.bf16.mxu0 %v11170_v37  ;;  %v10187_v37 = vld [vmem:[%s14233_s1 + $0x88c] ss:$16 sps:$4 sm:$0xff]   ;;  %v10212_v20 = vld [vmem:[%s14233_s1 + $0x7e8] ss:$16 sps:$4 sm:$0xff]  }
 0x250   : > { %7023 = vmatprep.mubr.bf16.mxu1 %v11316_v24  ;;  %v6660_v32 = vpop.f32.mrf.mxu0  ;;  %v10182_v24 = vld [vmem:[%s14233_s1 + $0x688] ss:$16 sps:$4 sm:$0xff]   ;;  %v10226_v29 = vld [vmem:[%s14233_s1 + $0x7ac] ss:$16 sps:$4 sm:$0xff]  }
 0x251   : > { %v6701_v33 = vpop.f32.mrf.mxu1  ;;  %v12855_v35 = vadd.f32 %v6699_v30, %v6659_v7  ;;  %6953 = vmatpush1.bf16.msra.mxu0 %v10170_v5  ;;  %v10215_v62 = vld [vmem:[%s14233_s1 + $0x9e8] ss:$16 sps:$4 sm:$0xff]   ;;  %v10220_v5 = vld [vmem:[%s14233_s1 + $0x7cc] ss:$16 sps:$4 sm:$0xff]  }
 0x252   : > { %6994 = vmatpush1.bf16.msra.mxu1 %v10173_v21  ;;  %v6661_v28 = vpop.f32.mrf.mxu0  ;;  %6954 = vmatprep.subr.bf16.mxu0 %v10178_v6  ;;  %v10223_v21 = vld [vmem:[%s14233_s1 + $0x9cc] ss:$16 sps:$4 sm:$0xff]   ;;  %v10218_v26 = vld [vmem:[%s14233_s1 + $0x7c8] ss:$16 sps:$4 sm:$0xff]  }
 0x253   : > { %v6702_v34 = vpop.f32.mrf.mxu1  ;;  %6995 = vmatprep.subr.bf16.mxu1 %v10181_v19  ;;  %v10221_v27 = vld [vmem:[%s14233_s1 + $0x9c8] ss:$16 sps:$4 sm:$0xff]   ;;  %v10229_v14 = vld [vmem:[%s14233_s1 + $0x9ac] ss:$16 sps:$4 sm:$0xff]  }
 0x254   : > { %v10224_v30 = vld [vmem:[%s14233_s1 + $0x7a8] ss:$16 sps:$4 sm:$0xff]   ;;  %v10232_v19 = vld [vmem:[%s14233_s1 + $0x78c] ss:$16 sps:$4 sm:$0xff]  }
 0x255   : > { %6955 = vmatpush1.bf16.msra.mxu0 %v10176_v16  ;;  %v10227_v6 = vld [vmem:[%s14233_s1 + $0x9a8] ss:$16 sps:$4 sm:$0xff]   ;;  %v10235_v7 = vld [vmem:[%s14233_s1 + $0x98c] ss:$16 sps:$4 sm:$0xff]  }
 0x256   : > { %6996 = vmatpush1.bf16.msra.mxu1 %v10179_v31  ;;  %6956 = vmatprep.subr.bf16.mxu0 %v10184_v22  ;;  %v10230_v16 = vld [vmem:[%s14233_s1 + $0x788] ss:$16 sps:$4 sm:$0xff]   ;;  %v10238_v32 = vld [vmem:[%s14233_s1 + $0x76c] ss:$16 sps:$4 sm:$0xff]  }
 0x257   : > { %6997 = vmatprep.subr.bf16.mxu1 %v10187_v37  ;;  %v10233_v31 = vld [vmem:[%s14233_s1 + $0x988] ss:$16 sps:$4 sm:$0xff]   ;;  %v10241_v33 = vld [vmem:[%s14233_s1 + $0x96c] ss:$16 sps:$4 sm:$0xff]  }
 0x258   : > { %v10236_v28 = vld [vmem:[%s14233_s1 + $0x768] ss:$16 sps:$4 sm:$0xff]   ;;  %v10244_v22 = vld [vmem:[%s14233_s1 + $0x74c] ss:$16 sps:$4 sm:$0xff]  }
 0x259   : > { %6957 = vmatpush1.bf16.msra.mxu0 %v10182_v24  ;;  %v10239_v34 = vld [vmem:[%s14233_s1 + $0x968] ss:$16 sps:$4 sm:$0xff]   ;;  %v10247_v37 = vld [vmem:[%s14233_s1 + $0x94c] ss:$16 sps:$4 sm:$0xff]  }
 0x25a   : > { %6998 = vmatpush1.bf16.msra.mxu1 %v10185_v51  ;;  %6958 = vmatprep.subr.bf16.mxu0 %v10190_v36  ;;  %v10242_v24 = vld [vmem:[%s14233_s1 + $0x748] ss:$16 sps:$4 sm:$0xff]   ;;  %v10250_v36 = vld [vmem:[%s14233_s1 + $0x72c] ss:$16 sps:$4 sm:$0xff]  }
 0x25b   : > { %6999 = vmatprep.subr.bf16.mxu1 %v10193_v44  ;;  %v10245_v51 = vld [vmem:[%s14233_s1 + $0x948] ss:$16 sps:$4 sm:$0xff]   ;;  %v10253_v44 = vld [vmem:[%s14233_s1 + $0x92c] ss:$16 sps:$4 sm:$0xff]  }
 0x25d   : > { %6959 = vmatpush1.bf16.msra.mxu0 %v10188_v61  ;;  %v10248_v61 = vld [vmem:[%s14233_s1 + $0x728] ss:$16 sps:$4 sm:$0xff]  }
 0x25e   : > { %7000 = vmatpush1.bf16.msra.mxu1 %v10191_v53  ;;  %6960 = vmatprep.subr.bf16.mxu0 %v10196_v49  ;;  %v10251_v53 = vld [vmem:[%s14233_s1 + $0x928] ss:$16 sps:$4 sm:$0xff]   ;;  %v10256_v49 = vld [vmem:[%s14233_s1 + $0x70c] ss:$16 sps:$4 sm:$0xff]  }
 0x25f   : > { %7001 = vmatprep.subr.bf16.mxu1 %v10199_v50  ;;  %v10259_v50 = vld [vmem:[%s14233_s1 + $0x90c] ss:$16 sps:$4 sm:$0xff]  }
 0x261   : > { %6961 = vmatpush1.bf16.msra.mxu0 %v10194_v63  ;;  %v10254_v63 = vld [vmem:[%s14233_s1 + $0x708] ss:$16 sps:$4 sm:$0xff]  }
 0x262   : > { %7002 = vmatpush1.bf16.msra.mxu1 %v10197_v40  ;;  %6962 = vmatprep.subr.bf16.mxu0 %v10202_v4  ;;  %v10257_v40 = vld [vmem:[%s14233_s1 + $0x908] ss:$16 sps:$4 sm:$0xff]   ;;  %v10262_v4 = vld [vmem:[%s14233_s1 + $0xaec] ss:$16 sps:$4 sm:$0xff]  }
 0x263   : > { %7003 = vmatprep.subr.bf16.mxu1 %v10205_v8  ;;  %v10265_v8 = vld [vmem:[%s14233_s1 + $0xcec] ss:$16 sps:$4 sm:$0xff]  }
 0x265   : > { %6963 = vmatpush1.bf16.msra.mxu0 %v10200_v42  ;;  %v10260_v42 = vld [vmem:[%s14233_s1 + $0xae8] ss:$16 sps:$4 sm:$0xff]  }
 0x266   : > { %7004 = vmatpush1.bf16.msra.mxu1 %v10203_v58  ;;  %6964 = vmatprep.subr.bf16.mxu0 %v10208_v3  ;;  %v10263_v58 = vld [vmem:[%s14233_s1 + $0xce8] ss:$16 sps:$4 sm:$0xff]   ;;  %v10268_v3 = vld [vmem:[%s14233_s1 + $0xacc] ss:$16 sps:$4 sm:$0xff]  }
 0x267   : > { %7005 = vmatprep.subr.bf16.mxu1 %v10211_v10  ;;  %v10271_v10 = vld [vmem:[%s14233_s1 + $0xccc] ss:$16 sps:$4 sm:$0xff]  }
 0x269   : > { %6965 = vmatpush1.bf16.msra.mxu0 %v10206_v12 }
 0x26a   : > { %7006 = vmatpush1.bf16.msra.mxu1 %v10209_v13  ;;  %6966 = vmatprep.subr.bf16.mxu0 %v10214_v11 }
 0x26b   : > { %7007 = vmatprep.subr.bf16.mxu1 %v10217_v18  ;;  %v10266_v18 = vld [vmem:[%s14233_s1 + $0xac8] ss:$16 sps:$4 sm:$0xff]  }
 0x26d   : > { %6967 = vmatpush2.bf16.msra.mxu0 %v10212_v20  ;;  %v10269_v20 = vld [vmem:[%s14233_s1 + $0xcc8] ss:$16 sps:$4 sm:$0xff]  }
 0x26e   : > { %7008 = vmatpush2.bf16.msra.mxu1 %v10215_v62  ;;  %6968 = vmatprep.subr.bf16.mxu0 %v10220_v5 }
 0x26f   : > { %7009 = vmatprep.subr.bf16.mxu1 %v10223_v21 }
 0x271   : > { %6969 = vmatpush2.bf16.msra.mxu0 %v10218_v26 }
 0x272   : > { %7010 = vmatpush2.bf16.msra.mxu1 %v10221_v27  ;;  %6970 = vmatprep.subr.bf16.mxu0 %v10226_v29 }
 0x273   : > { %7011 = vmatprep.subr.bf16.mxu1 %v10229_v14  ;;  %v10272_v14 = vld [vmem:[%s14233_s1 + $0xaa8] ss:$16 sps:$4 sm:$0xff]  }
 0x275   : > { %6971 = vmatpush2.bf16.msra.mxu0 %v10224_v30  ;;  %v10275_v30 = vld [vmem:[%s14233_s1 + $0xca8] ss:$16 sps:$4 sm:$0xff]  }
 0x276   : > { %7012 = vmatpush2.bf16.msra.mxu1 %v10227_v6  ;;  %6972 = vmatprep.subr.bf16.mxu0 %v10232_v19  ;;  %v10278_v19 = vld [vmem:[%s14233_s1 + $0xa88] ss:$16 sps:$4 sm:$0xff]  }
 0x277   : > { %7013 = vmatprep.subr.bf16.mxu1 %v10235_v7  ;;  %v10281_v7 = vld [vmem:[%s14233_s1 + $0xc88] ss:$16 sps:$4 sm:$0xff]  }
 0x279   : > { %6973 = vmatpush2.bf16.msra.mxu0 %v10230_v16  ;;  %v10286_v16 = vld [vmem:[%s14233_s1 + $0xa6c] ss:$16 sps:$4 sm:$0xff]  }
 0x27a   : > { %7014 = vmatpush2.bf16.msra.mxu1 %v10233_v31  ;;  %6974 = vmatprep.subr.bf16.mxu0 %v10238_v32  ;;  %v10289_v31 = vld [vmem:[%s14233_s1 + $0xc6c] ss:$16 sps:$4 sm:$0xff]   ;;  %v10284_v32 = vld [vmem:[%s14233_s1 + $0xa68] ss:$16 sps:$4 sm:$0xff]  }
 0x27b   : > { %7015 = vmatprep.subr.bf16.mxu1 %v10241_v33  ;;  %v10287_v33 = vld [vmem:[%s14233_s1 + $0xc68] ss:$16 sps:$4 sm:$0xff]  }
 0x27d   : > { %6975 = vmatpush2.bf16.msra.mxu0 %v10236_v28  ;;  %v10292_v28 = vld [vmem:[%s14233_s1 + $0xa4c] ss:$16 sps:$4 sm:$0xff]  }
 0x27e   : > { %7016 = vmatpush2.bf16.msra.mxu1 %v10239_v34  ;;  %6976 = vmatprep.subr.bf16.mxu0 %v10244_v22  ;;  %v10295_v34 = vld [vmem:[%s14233_s1 + $0xc4c] ss:$16 sps:$4 sm:$0xff]   ;;  %v10290_v22 = vld [vmem:[%s14233_s1 + $0xa48] ss:$16 sps:$4 sm:$0xff]  }
 0x27f   : > { %7017 = vmatprep.subr.bf16.mxu1 %v10247_v37  ;;  %v10293_v37 = vld [vmem:[%s14233_s1 + $0xc48] ss:$16 sps:$4 sm:$0xff]  }
 0x281   : > { %6977 = vmatpush2.bf16.msra.mxu0 %v10242_v24  ;;  %v10298_v24 = vld [vmem:[%s14233_s1 + $0xa2c] ss:$16 sps:$4 sm:$0xff]  }
 0x282   : > { %7018 = vmatpush2.bf16.msra.mxu1 %v10245_v51  ;;  %6978 = vmatprep.subr.bf16.mxu0 %v10250_v36  ;;  %v10301_v51 = vld [vmem:[%s14233_s1 + $0xc2c] ss:$16 sps:$4 sm:$0xff]   ;;  %v10296_v36 = vld [vmem:[%s14233_s1 + $0xa28] ss:$16 sps:$4 sm:$0xff]  }
 0x283   : > { %7019 = vmatprep.subr.bf16.mxu1 %v10253_v44  ;;  %v10299_v44 = vld [vmem:[%s14233_s1 + $0xc28] ss:$16 sps:$4 sm:$0xff]  }
 0x285   : > { %6979 = vmatpush2.bf16.msra.mxu0 %v10248_v61  ;;  %v10304_v61 = vld [vmem:[%s14233_s1 + $0xa0c] ss:$16 sps:$4 sm:$0xff]  }
 0x286   : > { %7020 = vmatpush2.bf16.msra.mxu1 %v10251_v53  ;;  %6980 = vmatprep.subr.bf16.mxu0 %v10256_v49  ;;  %v10307_v53 = vld [vmem:[%s14233_s1 + $0xc0c] ss:$16 sps:$4 sm:$0xff]   ;;  %v10302_v49 = vld [vmem:[%s14233_s1 + $0xa08] ss:$16 sps:$4 sm:$0xff]  }
 0x287   : > { %7021 = vmatprep.subr.bf16.mxu1 %v10259_v50  ;;  %v10305_v50 = vld [vmem:[%s14233_s1 + $0xc08] ss:$16 sps:$4 sm:$0xff]  }
 0x289   : > { %6981 = vmatpush2.bf16.msra.mxu0 %v10254_v63  ;;  %v10310_v63 = vld [vmem:[%s14233_s1 + $0xbec] ss:$16 sps:$4 sm:$0xff]  }
 0x28a   : > { %7022 = vmatpush2.bf16.msra.mxu1 %v10257_v40  ;;  %7032 = vmatprep.subr.bf16.mxu0 %v10262_v4  ;;  %v10313_v40 = vld [vmem:[%s14233_s1 + $0xdec] ss:$16 sps:$4 sm:$0xff]   ;;  %v10308_v4 = vld [vmem:[%s14233_s1 + $0xbe8] ss:$16 sps:$4 sm:$0xff]  }
 0x28b   : > { %7073 = vmatprep.subr.bf16.mxu1 %v10265_v8  ;;  %v10311_v8 = vld [vmem:[%s14233_s1 + $0xde8] ss:$16 sps:$4 sm:$0xff]  }
 0x28c   : > { %v6738_v12 = vpop.f32.mrf.mxu0  ;;  %6983 = vmatmul.mubr.bf16.vlgmr.msra.gmra.mxu0 %v11294_v17  ;;  %v10274_v17 = vld [vmem:[%s14233_s1 + $0xaac] ss:$16 sps:$4 sm:$0xff]  }
 0x28d   : > { %v6779_v13 = vpop.f32.mrf.mxu1  ;;  %7024 = vmatmul.mubr.bf16.vlgmr.msra.gmra.mxu1 %v11514_v38  ;;  %v6739_v11 = vadd.f32 %v6738_v12, %v12844_v47  ;;  %7033 = vmatpush1.bf16.msra.mxu0 %v10260_v42  ;;  %v10277_v38 = vld [vmem:[%s14233_s1 + $0xcac] ss:$16 sps:$4 sm:$0xff]  }
 0x28e   : > { %7074 = vmatpush1.bf16.msra.mxu1 %v10263_v58  ;;  %v6740_v62 = vpop.f32.mrf.mxu0  ;;  %7034 = vmatprep.subr.bf16.mxu0 %v10268_v3  ;;  %v10316_v42 = vld [vmem:[%s14233_s1 + $0xbcc] ss:$16 sps:$4 sm:$0xff]   ;;  %v10314_v3 = vld [vmem:[%s14233_s1 + $0xbc8] ss:$16 sps:$4 sm:$0xff]  }
 0x28f   : > { %v6781_v5 = vpop.f32.mrf.mxu1  ;;  %7075 = vmatprep.subr.bf16.mxu1 %v10271_v10  ;;  %v13046_v47 = vadd.f32 %v6779_v13, %v6739_v11  ;;  %v6741_v21 = vadd.f32 %v6740_v62, %v12855_v35  ;;  %7064 = vmatprep.mubr.bf16.mxu0 %v11320_v25  ;;  %v10280_v25 = vld [vmem:[%s14233_s1 + $0xa8c] ss:$16 sps:$4 sm:$0xff]   ;;  %v10317_v10 = vld [vmem:[%s14233_s1 + $0xdc8] ss:$16 sps:$4 sm:$0xff]  }
 0x290   : > { %7105 = vmatprep.mubr.bf16.mxu1 %v11534_v23  ;;  %v6742_v26 = vpop.f32.mrf.mxu0  ;;  %v10283_v23 = vld [vmem:[%s14233_s1 + $0xc8c] ss:$16 sps:$4 sm:$0xff]   ;;  %v10320_v11 = vld [vmem:[%s14233_s1 + $0xba8] ss:$16 sps:$4 sm:$0xff]  }
 0x291   : > { %v6783_v27 = vpop.f32.mrf.mxu1  ;;  %v13051_v29 = vadd.f32 %v6781_v5, %v6741_v21  ;;  %7035 = vmatpush1.bf16.msra.mxu0 %v10266_v18  ;;  %v10319_v58 = vld [vmem:[%s14233_s1 + $0xdcc] ss:$16 sps:$4 sm:$0xff]   ;;  %v10323_v18 = vld [vmem:[%s14233_s1 + $0xda8] ss:$16 sps:$4 sm:$0xff]  }
 0x292   : > { %7076 = vmatpush1.bf16.msra.mxu1 %v10269_v20  ;;  %v6743_v6 = vpop.f32.mrf.mxu0  ;;  %7036 = vmatprep.subr.bf16.mxu0 %v10274_v17  ;;  %v10322_v12 = vld [vmem:[%s14233_s1 + $0xbac] ss:$16 sps:$4 sm:$0xff]   ;;  %v10326_v5 = vld [vmem:[%s14233_s1 + $0xb88] ss:$16 sps:$4 sm:$0xff]  }
 0x293   : > { %v6784_v35 = vpop.f32.mrf.mxu1  ;;  %7077 = vmatprep.subr.bf16.mxu1 %v10277_v38  ;;  %v10325_v13 = vld [vmem:[%s14233_s1 + $0xdac] ss:$16 sps:$4 sm:$0xff]   ;;  %v10329_v17 = vld [vmem:[%s14233_s1 + $0xd88] ss:$16 sps:$4 sm:$0xff]  }
 0x294   : > { %v10328_v20 = vld [vmem:[%s14233_s1 + $0xb8c] ss:$16 sps:$4 sm:$0xff]   ;;  %v10332_v26 = vld [vmem:[%s14233_s1 + $0xb68] ss:$16 sps:$4 sm:$0xff]  }
 0x295   : > { %7037 = vmatpush1.bf16.msra.mxu0 %v10272_v14  ;;  %v10331_v62 = vld [vmem:[%s14233_s1 + $0xd8c] ss:$16 sps:$4 sm:$0xff]   ;;  %v10335_v27 = vld [vmem:[%s14233_s1 + $0xd68] ss:$16 sps:$4 sm:$0xff]  }
 0x296   : > { %7078 = vmatpush1.bf16.msra.mxu1 %v10275_v30  ;;  %7038 = vmatprep.subr.bf16.mxu0 %v10280_v25  ;;  %v10334_v38 = vld [vmem:[%s14233_s1 + $0xb6c] ss:$16 sps:$4 sm:$0xff]   ;;  %v10338_v6 = vld [vmem:[%s14233_s1 + $0xb48] ss:$16 sps:$4 sm:$0xff]  }
 0x297   : > { %7079 = vmatprep.subr.bf16.mxu1 %v10283_v23  ;;  %v10337_v21 = vld [vmem:[%s14233_s1 + $0xd6c] ss:$16 sps:$4 sm:$0xff]   ;;  %v10341_v35 = vld [vmem:[%s14233_s1 + $0xd48] ss:$16 sps:$4 sm:$0xff]  }
 0x298   : > { %v10340_v14 = vld [vmem:[%s14233_s1 + $0xb4c] ss:$16 sps:$4 sm:$0xff]  }
 0x299   : > { %7039 = vmatpush1.bf16.msra.mxu0 %v10278_v19  ;;  %v10343_v30 = vld [vmem:[%s14233_s1 + $0xd4c] ss:$16 sps:$4 sm:$0xff]   ;;  %v10344_v19 = vld [vmem:[%s14233_s1 + $0xb28] ss:$16 sps:$4 sm:$0xff]  }
 0x29a   : > { %7080 = vmatpush1.bf16.msra.mxu1 %v10281_v7  ;;  %7040 = vmatprep.subr.bf16.mxu0 %v10286_v16  ;;  %v10346_v25 = vld [vmem:[%s14233_s1 + $0xb2c] ss:$16 sps:$4 sm:$0xff]   ;;  %v10347_v7 = vld [vmem:[%s14233_s1 + $0xd28] ss:$16 sps:$4 sm:$0xff]  }
 0x29b   : > { %7081 = vmatprep.subr.bf16.mxu1 %v10289_v31  ;;  %v10349_v23 = vld [vmem:[%s14233_s1 + $0xd2c] ss:$16 sps:$4 sm:$0xff]  }
 0x29c   : > { %v10352_v16 = vld [vmem:[%s14233_s1 + $0xb0c] ss:$16 sps:$4 sm:$0xff]  }
 0x29d   : > { %7041 = vmatpush1.bf16.msra.mxu0 %v10284_v32  ;;  %v10355_v31 = vld [vmem:[%s14233_s1 + $0xd0c] ss:$16 sps:$4 sm:$0xff]   ;;  %v10350_v32 = vld [vmem:[%s14233_s1 + $0xb08] ss:$16 sps:$4 sm:$0xff]  }
 0x29e   : > { %7082 = vmatpush1.bf16.msra.mxu1 %v10287_v33  ;;  %7042 = vmatprep.subr.bf16.mxu0 %v10292_v28  ;;  %v10353_v33 = vld [vmem:[%s14233_s1 + $0xd08] ss:$16 sps:$4 sm:$0xff]   ;;  %v10358_v28 = vld [vmem:[%s14233_s1 + $0xeec] ss:$16 sps:$4 sm:$0xff]  }
 0x29f   : > { %7083 = vmatprep.subr.bf16.mxu1 %v10295_v34  ;;  %v10361_v34 = vld [vmem:[%s14233_s1 + $0x10ec] ss:$16 sps:$4 sm:$0xff]  }
 0x2a1   : > { %7043 = vmatpush1.bf16.msra.mxu0 %v10290_v22  ;;  %v10356_v22 = vld [vmem:[%s14233_s1 + $0xee8] ss:$16 sps:$4 sm:$0xff]  }
 0x2a2   : > { %7084 = vmatpush1.bf16.msra.mxu1 %v10293_v37  ;;  %7044 = vmatprep.subr.bf16.mxu0 %v10298_v24  ;;  %v10359_v37 = vld [vmem:[%s14233_s1 + $0x10e8] ss:$16 sps:$4 sm:$0xff]   ;;  %v10364_v24 = vld [vmem:[%s14233_s1 + $0xecc] ss:$16 sps:$4 sm:$0xff]  }
 0x2a3   : > { %7085 = vmatprep.subr.bf16.mxu1 %v10301_v51  ;;  %v10367_v51 = vld [vmem:[%s14233_s1 + $0x10cc] ss:$16 sps:$4 sm:$0xff]  }
 0x2a5   : > { %7045 = vmatpush1.bf16.msra.mxu0 %v10296_v36 }
 0x2a6   : > { %7086 = vmatpush1.bf16.msra.mxu1 %v10299_v44  ;;  %7046 = vmatprep.subr.bf16.mxu0 %v10304_v61 }
 0x2a7   : > { %7087 = vmatprep.subr.bf16.mxu1 %v10307_v53  ;;  %v10362_v53 = vld [vmem:[%s14233_s1 + $0xec8] ss:$16 sps:$4 sm:$0xff]  }
 0x2a9   : > { %7047 = vmatpush1.bf16.msra.mxu0 %v10302_v49  ;;  %v10365_v49 = vld [vmem:[%s14233_s1 + $0x10c8] ss:$16 sps:$4 sm:$0xff]  }
 0x2aa   : > { %7088 = vmatpush1.bf16.msra.mxu1 %v10305_v50  ;;  %7048 = vmatprep.subr.bf16.mxu0 %v10310_v63 }
 0x2ab   : > { %7089 = vmatprep.subr.bf16.mxu1 %v10313_v40 }
 0x2ad   : > { %7049 = vmatpush2.bf16.msra.mxu0 %v10308_v4 }
 0x2ae   : > { %7090 = vmatpush2.bf16.msra.mxu1 %v10311_v8  ;;  %7050 = vmatprep.subr.bf16.mxu0 %v10316_v42  ;;  %v10368_v8 = vld [vmem:[%s14233_s1 + $0xea8] ss:$16 sps:$4 sm:$0xff]  }
 0x2af   : > { %7091 = vmatprep.subr.bf16.mxu1 %v10319_v58  ;;  %v10371_v42 = vld [vmem:[%s14233_s1 + $0x10a8] ss:$16 sps:$4 sm:$0xff]  }
 0x2b1   : > { %7051 = vmatpush2.bf16.msra.mxu0 %v10314_v3 }
 0x2b2   : > { %7092 = vmatpush2.bf16.msra.mxu1 %v10317_v10  ;;  %7052 = vmatprep.subr.bf16.mxu0 %v10322_v12  ;;  %v10377_v10 = vld [vmem:[%s14233_s1 + $0x1088] ss:$16 sps:$4 sm:$0xff]   ;;  %v10382_v12 = vld [vmem:[%s14233_s1 + $0xe6c] ss:$16 sps:$4 sm:$0xff]  }
 0x2b3   : > { %7093 = vmatprep.subr.bf16.mxu1 %v10325_v13  ;;  %v10385_v13 = vld [vmem:[%s14233_s1 + $0x106c] ss:$16 sps:$4 sm:$0xff]  }
 0x2b5   : > { %7053 = vmatpush2.bf16.msra.mxu0 %v10320_v11  ;;  %v10380_v11 = vld [vmem:[%s14233_s1 + $0xe68] ss:$16 sps:$4 sm:$0xff]  }
 0x2b6   : > { %7094 = vmatpush2.bf16.msra.mxu1 %v10323_v18  ;;  %7054 = vmatprep.subr.bf16.mxu0 %v10328_v20  ;;  %v10383_v18 = vld [vmem:[%s14233_s1 + $0x1068] ss:$16 sps:$4 sm:$0xff]   ;;  %v10388_v20 = vld [vmem:[%s14233_s1 + $0xe4c] ss:$16 sps:$4 sm:$0xff]  }
 0x2b7   : > { %7095 = vmatprep.subr.bf16.mxu1 %v10331_v62  ;;  %v10391_v62 = vld [vmem:[%s14233_s1 + $0x104c] ss:$16 sps:$4 sm:$0xff]  }
 0x2b9   : > { %7055 = vmatpush2.bf16.msra.mxu0 %v10326_v5  ;;  %v10386_v5 = vld [vmem:[%s14233_s1 + $0xe48] ss:$16 sps:$4 sm:$0xff]  }
 0x2ba   : > { %7096 = vmatpush2.bf16.msra.mxu1 %v10329_v17  ;;  %7056 = vmatprep.subr.bf16.mxu0 %v10334_v38  ;;  %v10389_v17 = vld [vmem:[%s14233_s1 + $0x1048] ss:$16 sps:$4 sm:$0xff]   ;;  %v10394_v38 = vld [vmem:[%s14233_s1 + $0xe2c] ss:$16 sps:$4 sm:$0xff]  }
 0x2bb   : > { %7097 = vmatprep.subr.bf16.mxu1 %v10337_v21  ;;  %v10397_v21 = vld [vmem:[%s14233_s1 + $0x102c] ss:$16 sps:$4 sm:$0xff]  }
 0x2bd   : > { %7057 = vmatpush2.bf16.msra.mxu0 %v10332_v26  ;;  %v10392_v26 = vld [vmem:[%s14233_s1 + $0xe28] ss:$16 sps:$4 sm:$0xff]  }
 0x2be   : > { %7098 = vmatpush2.bf16.msra.mxu1 %v10335_v27  ;;  %7058 = vmatprep.subr.bf16.mxu0 %v10340_v14  ;;  %v10395_v27 = vld [vmem:[%s14233_s1 + $0x1028] ss:$16 sps:$4 sm:$0xff]   ;;  %v10400_v14 = vld [vmem:[%s14233_s1 + $0xe0c] ss:$16 sps:$4 sm:$0xff]  }
 0x2bf   : > { %7099 = vmatprep.subr.bf16.mxu1 %v10343_v30  ;;  %v10403_v30 = vld [vmem:[%s14233_s1 + $0x100c] ss:$16 sps:$4 sm:$0xff]  }
 0x2c1   : > { %7059 = vmatpush2.bf16.msra.mxu0 %v10338_v6  ;;  %v10398_v6 = vld [vmem:[%s14233_s1 + $0xe08] ss:$16 sps:$4 sm:$0xff]  }
 0x2c2   : > { %7100 = vmatpush2.bf16.msra.mxu1 %v10341_v35  ;;  %7060 = vmatprep.subr.bf16.mxu0 %v10346_v25  ;;  %v10401_v35 = vld [vmem:[%s14233_s1 + $0x1008] ss:$16 sps:$4 sm:$0xff]   ;;  %v10406_v25 = vld [vmem:[%s14233_s1 + $0xfec] ss:$16 sps:$4 sm:$0xff]  }
 0x2c3   : > { %7101 = vmatprep.subr.bf16.mxu1 %v10349_v23  ;;  %v10409_v23 = vld [vmem:[%s14233_s1 + $0x11ec] ss:$16 sps:$4 sm:$0xff]  }
 0x2c5   : > { %7061 = vmatpush2.bf16.msra.mxu0 %v10344_v19  ;;  %v10404_v19 = vld [vmem:[%s14233_s1 + $0xfe8] ss:$16 sps:$4 sm:$0xff]  }
 0x2c6   : > { %7102 = vmatpush2.bf16.msra.mxu1 %v10347_v7  ;;  %7062 = vmatprep.subr.bf16.mxu0 %v10352_v16  ;;  %v10407_v7 = vld [vmem:[%s14233_s1 + $0x11e8] ss:$16 sps:$4 sm:$0xff]   ;;  %v10412_v16 = vld [vmem:[%s14233_s1 + $0xfcc] ss:$16 sps:$4 sm:$0xff]  }
 0x2c7   : > { %7103 = vmatprep.subr.bf16.mxu1 %v10355_v31  ;;  %v10415_v31 = vld [vmem:[%s14233_s1 + $0x11cc] ss:$16 sps:$4 sm:$0xff]  }
 0x2c9   : > { %7063 = vmatpush2.bf16.msra.mxu0 %v10350_v32  ;;  %v10410_v32 = vld [vmem:[%s14233_s1 + $0xfc8] ss:$16 sps:$4 sm:$0xff]  }
 0x2ca   : > { %7104 = vmatpush2.bf16.msra.mxu1 %v10353_v33  ;;  %7114 = vmatprep.subr.bf16.mxu0 %v10358_v28  ;;  %v10413_v33 = vld [vmem:[%s14233_s1 + $0x11c8] ss:$16 sps:$4 sm:$0xff]   ;;  %v10418_v28 = vld [vmem:[%s14233_s1 + $0xfac] ss:$16 sps:$4 sm:$0xff]  }
 0x2cb   : > { %7155 = vmatprep.subr.bf16.mxu1 %v10361_v34  ;;  %v10421_v34 = vld [vmem:[%s14233_s1 + $0x11ac] ss:$16 sps:$4 sm:$0xff]  }
 0x2cc   : > { %v6820_v36 = vpop.f32.mrf.mxu0  ;;  %7065 = vmatmul.mubr.bf16.vlgmr.msra.gmra.mxu0 %v11518_v39  ;;  %v10370_v39 = vld [vmem:[%s14233_s1 + $0xeac] ss:$16 sps:$4 sm:$0xff]  }
 0x2cd   : > { %v13233_v44 = vpop.f32.mrf.mxu1  ;;  %7106 = vmatmul.mubr.bf16.vlgmr.msra.gmra.mxu1 %v11729_v59  ;;  %v13238_v61 = vadd.f32 %v6820_v36, %v13046_v47  ;;  %7115 = vmatpush1.bf16.msra.mxu0 %v10356_v22  ;;  %v10373_v59 = vld [vmem:[%s14233_s1 + $0x10ac] ss:$16 sps:$4 sm:$0xff]   ;;  %v10416_v22 = vld [vmem:[%s14233_s1 + $0xfa8] ss:$16 sps:$4 sm:$0xff]  }
 0x2ce   : > { %7156 = vmatpush1.bf16.msra.mxu1 %v10359_v37  ;;  %v6822_v50 = vpop.f32.mrf.mxu0  ;;  %7116 = vmatprep.subr.bf16.mxu0 %v10364_v24  ;;  %v10419_v37 = vld [vmem:[%s14233_s1 + $0x11a8] ss:$16 sps:$4 sm:$0xff]   ;;  %v10424_v24 = vld [vmem:[%s14233_s1 + $0xf8c] ss:$16 sps:$4 sm:$0xff]  }
 0x2cf   : > { %v13246_v63 = vpop.f32.mrf.mxu1  ;;  %7157 = vmatprep.subr.bf16.mxu1 %v10367_v51  ;;  %v13255_v47 = vadd.f32 %v6822_v50, %v13051_v29  ;;  %7146 = vmatprep.mubr.bf16.mxu0 %v11538_v43  ;;  %v10376_v43 = vld [vmem:[%s14233_s1 + $0xe8c] ss:$16 sps:$4 sm:$0xff]   ;;  %v10374_v29 = vld [vmem:[%s14233_s1 + $0xe88] ss:$16 sps:$4 sm:$0xff]  }
 0x2d0   : > { %7187 = vmatprep.mubr.bf16.mxu1 %v11752_v0  ;;  %v6824_v40 = vpop.f32.mrf.mxu0  ;;  %v10379_v0 = vld [vmem:[%s14233_s1 + $0x108c] ss:$16 sps:$4 sm:$0xff]   ;;  %v10422_v36 = vld [vmem:[%s14233_s1 + $0xf88] ss:$16 sps:$4 sm:$0xff]  }
 0x2d1   : > { %v6865_v4 = vpop.f32.mrf.mxu1  ;;  %7117 = vmatpush1.bf16.msra.mxu0 %v10362_v53  ;;  %v10427_v51 = vld [vmem:[%s14233_s1 + $0x118c] ss:$16 sps:$4 sm:$0xff]   ;;  %v10425_v53 = vld [vmem:[%s14233_s1 + $0x1188] ss:$16 sps:$4 sm:$0xff]  }
 0x2d2   : > { %7158 = vmatpush1.bf16.msra.mxu1 %v10365_v49  ;;  %v6825_v58 = vpop.f32.mrf.mxu0  ;;  %7118 = vmatprep.subr.bf16.mxu0 %v10370_v39  ;;  %v10430_v49 = vld [vmem:[%s14233_s1 + $0xf6c] ss:$16 sps:$4 sm:$0xff]   ;;  %v10428_v39 = vld [vmem:[%s14233_s1 + $0xf68] ss:$16 sps:$4 sm:$0xff]  }
 0x2d3   : > { %v6866_v3 = vpop.f32.mrf.mxu1  ;;  %7159 = vmatprep.subr.bf16.mxu1 %v10373_v59  ;;  %v10433_v50 = vld [vmem:[%s14233_s1 + $0x116c] ss:$16 sps:$4 sm:$0xff]   ;;  %v10431_v59 = vld [vmem:[%s14233_s1 + $0x1168] ss:$16 sps:$4 sm:$0xff]  }
 0x2d4   : > { %v10436_v40 = vld [vmem:[%s14233_s1 + $0xf4c] ss:$16 sps:$4 sm:$0xff]  }
 0x2d5   : > { %7119 = vmatpush1.bf16.msra.mxu0 %v10368_v8  ;;  %v10439_v4 = vld [vmem:[%s14233_s1 + $0x114c] ss:$16 sps:$4 sm:$0xff]   ;;  %v10434_v8 = vld [vmem:[%s14233_s1 + $0xf48] ss:$16 sps:$4 sm:$0xff]  }
 0x2d6   : > { %7160 = vmatpush1.bf16.msra.mxu1 %v10371_v42  ;;  %7120 = vmatprep.subr.bf16.mxu0 %v10376_v43  ;;  %v10437_v42 = vld [vmem:[%s14233_s1 + $0x1148] ss:$16 sps:$4 sm:$0xff]   ;;  %v10442_v58 = vld [vmem:[%s14233_s1 + $0xf2c] ss:$16 sps:$4 sm:$0xff]  }
 0x2d7   : > { %7161 = vmatprep.subr.bf16.mxu1 %v10379_v0  ;;  %v10445_v3 = vld [vmem:[%s14233_s1 + $0x112c] ss:$16 sps:$4 sm:$0xff]   ;;  %v10440_v43 = vld [vmem:[%s14233_s1 + $0xf28] ss:$16 sps:$4 sm:$0xff]  }
 0x2d8   : > { %v10443_v0 = vld [vmem:[%s14233_s1 + $0x1128] ss:$16 sps:$4 sm:$0xff]  }
 0x2d9   : > { %7121 = vmatpush1.bf16.msra.mxu0 %v10374_v29  ;;  %v10448_v29 = vld [vmem:[%s14233_s1 + $0xf0c] ss:$16 sps:$4 sm:$0xff]  }
 0x2da   : > { %7162 = vmatpush1.bf16.msra.mxu1 %v10377_v10  ;;  %7122 = vmatprep.subr.bf16.mxu0 %v10382_v12  ;;  %v10451_v10 = vld [vmem:[%s14233_s1 + $0x110c] ss:$16 sps:$4 sm:$0xff]   ;;  %v10446_v12 = vld [vmem:[%s14233_s1 + $0xf08] ss:$16 sps:$4 sm:$0xff]  }
 0x2db   : > { %7163 = vmatprep.subr.bf16.mxu1 %v10385_v13  ;;  %v10449_v13 = vld [vmem:[%s14233_s1 + $0x1108] ss:$16 sps:$4 sm:$0xff]  }
 0x2dd   : > { %7123 = vmatpush1.bf16.msra.mxu0 %v10380_v11  ;;  %v10454_v11 = vld [vmem:[%s14233_s1 + $0x12ec] ss:$16 sps:$4 sm:$0xff]  }
 0x2de   : > { %7164 = vmatpush1.bf16.msra.mxu1 %v10383_v18  ;;  %7124 = vmatprep.subr.bf16.mxu0 %v10388_v20  ;;  %v10457_v18 = vld [vmem:[%s14233_s1 + $0x14ec] ss:$16 sps:$4 sm:$0xff]   ;;  %v10452_v20 = vld [vmem:[%s14233_s1 + $0x12e8] ss:$16 sps:$4 sm:$0xff]  }
 0x2df   : > { %7165 = vmatprep.subr.bf16.mxu1 %v10391_v62  ;;  %v10455_v62 = vld [vmem:[%s14233_s1 + $0x14e8] ss:$16 sps:$4 sm:$0xff]  }
 0x2e1   : > { %7125 = vmatpush1.bf16.msra.mxu0 %v10386_v5  ;;  %v10460_v5 = vld [vmem:[%s14233_s1 + $0x12cc] ss:$16 sps:$4 sm:$0xff]  }
 0x2e2   : > { %7166 = vmatpush1.bf16.msra.mxu1 %v10389_v17  ;;  %7126 = vmatprep.subr.bf16.mxu0 %v10394_v38  ;;  %v10463_v17 = vld [vmem:[%s14233_s1 + $0x14cc] ss:$16 sps:$4 sm:$0xff]  }
 0x2e3   : > { %7167 = vmatprep.subr.bf16.mxu1 %v10397_v21 }
 0x2e5   : > { %7127 = vmatpush1.bf16.msra.mxu0 %v10392_v26 }
 0x2e6   : > { %7168 = vmatpush1.bf16.msra.mxu1 %v10395_v27  ;;  %7128 = vmatprep.subr.bf16.mxu0 %v10400_v14  ;;  %v10458_v27 = vld [vmem:[%s14233_s1 + $0x12c8] ss:$16 sps:$4 sm:$0xff]  }
 0x2e7   : > { %7169 = vmatprep.subr.bf16.mxu1 %v10403_v30  ;;  %v10461_v14 = vld [vmem:[%s14233_s1 + $0x14c8] ss:$16 sps:$4 sm:$0xff]  }
 0x2e9   : > { %7129 = vmatpush1.bf16.msra.mxu0 %v10398_v6 }
 0x2ea   : > { %7170 = vmatpush1.bf16.msra.mxu1 %v10401_v35  ;;  %7130 = vmatprep.subr.bf16.mxu0 %v10406_v25 }
 0x2eb   : > { %7171 = vmatprep.subr.bf16.mxu1 %v10409_v23 }
 0x2ed   : > { %7131 = vmatpush2.bf16.msra.mxu0 %v10404_v19 }
 0x2ee   : > { %7172 = vmatpush2.bf16.msra.mxu1 %v10407_v7  ;;  %7132 = vmatprep.subr.bf16.mxu0 %v10412_v16  ;;  %v10464_v7 = vld [vmem:[%s14233_s1 + $0x12a8] ss:$16 sps:$4 sm:$0xff]  }
 0x2ef   : > { %7173 = vmatprep.subr.bf16.mxu1 %v10415_v31  ;;  %v10467_v16 = vld [vmem:[%s14233_s1 + $0x14a8] ss:$16 sps:$4 sm:$0xff]  }
 0x2f1   : > { %7133 = vmatpush2.bf16.msra.mxu0 %v10410_v32  ;;  %v10470_v32 = vld [vmem:[%s14233_s1 + $0x1288] ss:$16 sps:$4 sm:$0xff]  }
 0x2f2   : > { %7174 = vmatpush2.bf16.msra.mxu1 %v10413_v33  ;;  %7134 = vmatprep.subr.bf16.mxu0 %v10418_v28  ;;  %v10473_v33 = vld [vmem:[%s14233_s1 + $0x1488] ss:$16 sps:$4 sm:$0xff]   ;;  %v10478_v28 = vld [vmem:[%s14233_s1 + $0x126c] ss:$16 sps:$4 sm:$0xff]  }
 0x2f3   : > { %7175 = vmatprep.subr.bf16.mxu1 %v10421_v34  ;;  %v10481_v34 = vld [vmem:[%s14233_s1 + $0x146c] ss:$16 sps:$4 sm:$0xff]  }
 0x2f5   : > { %7135 = vmatpush2.bf16.msra.mxu0 %v10416_v22  ;;  %v10476_v22 = vld [vmem:[%s14233_s1 + $0x1268] ss:$16 sps:$4 sm:$0xff]  }
 0x2f6   : > { %7176 = vmatpush2.bf16.msra.mxu1 %v10419_v37  ;;  %7136 = vmatprep.subr.bf16.mxu0 %v10424_v24  ;;  %v10479_v37 = vld [vmem:[%s14233_s1 + $0x1468] ss:$16 sps:$4 sm:$0xff]   ;;  %v10484_v24 = vld [vmem:[%s14233_s1 + $0x124c] ss:$16 sps:$4 sm:$0xff]  }
 0x2f7   : > { %7177 = vmatprep.subr.bf16.mxu1 %v10427_v51  ;;  %v10487_v51 = vld [vmem:[%s14233_s1 + $0x144c] ss:$16 sps:$4 sm:$0xff]  }
 0x2f9   : > { %7137 = vmatpush2.bf16.msra.mxu0 %v10422_v36  ;;  %v10482_v36 = vld [vmem:[%s14233_s1 + $0x1248] ss:$16 sps:$4 sm:$0xff]  }
 0x2fa   : > { %7178 = vmatpush2.bf16.msra.mxu1 %v10425_v53  ;;  %7138 = vmatprep.subr.bf16.mxu0 %v10430_v49  ;;  %v10485_v53 = vld [vmem:[%s14233_s1 + $0x1448] ss:$16 sps:$4 sm:$0xff]   ;;  %v10490_v49 = vld [vmem:[%s14233_s1 + $0x122c] ss:$16 sps:$4 sm:$0xff]  }
 0x2fb   : > { %7179 = vmatprep.subr.bf16.mxu1 %v10433_v50  ;;  %v10493_v50 = vld [vmem:[%s14233_s1 + $0x142c] ss:$16 sps:$4 sm:$0xff]  }
 0x2fd   : > { %7139 = vmatpush2.bf16.msra.mxu0 %v10428_v39  ;;  %v10488_v39 = vld [vmem:[%s14233_s1 + $0x1228] ss:$16 sps:$4 sm:$0xff]  }
 0x2fe   : > { %7180 = vmatpush2.bf16.msra.mxu1 %v10431_v59  ;;  %7140 = vmatprep.subr.bf16.mxu0 %v10436_v40  ;;  %v10491_v59 = vld [vmem:[%s14233_s1 + $0x1428] ss:$16 sps:$4 sm:$0xff]   ;;  %v10496_v40 = vld [vmem:[%s14233_s1 + $0x120c] ss:$16 sps:$4 sm:$0xff]  }
 0x2ff   : > { %7181 = vmatprep.subr.bf16.mxu1 %v10439_v4  ;;  %v10499_v4 = vld [vmem:[%s14233_s1 + $0x140c] ss:$16 sps:$4 sm:$0xff]  }
 0x301   : > { %7141 = vmatpush2.bf16.msra.mxu0 %v10434_v8  ;;  %v10494_v8 = vld [vmem:[%s14233_s1 + $0x1208] ss:$16 sps:$4 sm:$0xff]  }
 0x302   : > { %7182 = vmatpush2.bf16.msra.mxu1 %v10437_v42  ;;  %7142 = vmatprep.subr.bf16.mxu0 %v10442_v58  ;;  %v10497_v42 = vld [vmem:[%s14233_s1 + $0x1408] ss:$16 sps:$4 sm:$0xff]   ;;  %v10502_v58 = vld [vmem:[%s14233_s1 + $0x13ec] ss:$16 sps:$4 sm:$0xff]  }
 0x303   : > { %7183 = vmatprep.subr.bf16.mxu1 %v10445_v3  ;;  %v10505_v3 = vld [vmem:[%s14233_s1 + $0x15ec] ss:$16 sps:$4 sm:$0xff]  }
 0x305   : > { %7143 = vmatpush2.bf16.msra.mxu0 %v10440_v43  ;;  %v10500_v43 = vld [vmem:[%s14233_s1 + $0x13e8] ss:$16 sps:$4 sm:$0xff]  }
 0x306   : > { %7184 = vmatpush2.bf16.msra.mxu1 %v10443_v0  ;;  %7144 = vmatprep.subr.bf16.mxu0 %v10448_v29  ;;  %v10503_v0 = vld [vmem:[%s14233_s1 + $0x15e8] ss:$16 sps:$4 sm:$0xff]   ;;  %v10508_v29 = vld [vmem:[%s14233_s1 + $0x13cc] ss:$16 sps:$4 sm:$0xff]  }
 0x307   : > { %7185 = vmatprep.subr.bf16.mxu1 %v10451_v10  ;;  %v10511_v10 = vld [vmem:[%s14233_s1 + $0x15cc] ss:$16 sps:$4 sm:$0xff]  }
 0x309   : > { %7145 = vmatpush2.bf16.msra.mxu0 %v10446_v12  ;;  %v10506_v12 = vld [vmem:[%s14233_s1 + $0x13c8] ss:$16 sps:$4 sm:$0xff]  }
 0x30a   : > { %7186 = vmatpush2.bf16.msra.mxu1 %v10449_v13  ;;  %7196 = vmatprep.subr.bf16.mxu0 %v10454_v11  ;;  %v10509_v13 = vld [vmem:[%s14233_s1 + $0x15c8] ss:$16 sps:$4 sm:$0xff]   ;;  %v10514_v11 = vld [vmem:[%s14233_s1 + $0x13ac] ss:$16 sps:$4 sm:$0xff]  }
 0x30b   : > { %7237 = vmatprep.subr.bf16.mxu1 %v10457_v18  ;;  %v10517_v18 = vld [vmem:[%s14233_s1 + $0x15ac] ss:$16 sps:$4 sm:$0xff]  }
 0x30c   : > { %v6902_v38 = vpop.f32.mrf.mxu0  ;;  %7147 = vmatmul.mubr.bf16.vlgmr.msra.gmra.mxu0 %v11733_v60  ;;  %v10466_v60 = vld [vmem:[%s14233_s1 + $0x12ac] ss:$16 sps:$4 sm:$0xff]  }
 0x30d   : > { %v6943_v21 = vpop.f32.mrf.mxu1  ;;  %7188 = vmatmul.mubr.bf16.vlgmr.msra.gmra.mxu1 %v11954_v46  ;;  %v6903_v26 = vadd.f32 %v6902_v38, %v13233_v44  ;;  %7197 = vmatpush1.bf16.msra.mxu0 %v10452_v20  ;;  %v10469_v46 = vld [vmem:[%s14233_s1 + $0x14ac] ss:$16 sps:$4 sm:$0xff]   ;;  %v10512_v20 = vld [vmem:[%s14233_s1 + $0x13a8] ss:$16 sps:$4 sm:$0xff]  }
 0x30e   : > { %7238 = vmatpush1.bf16.msra.mxu1 %v10455_v62  ;;  %v6904_v30 = vpop.f32.mrf.mxu0  ;;  %7198 = vmatprep.subr.bf16.mxu0 %v10460_v5  ;;  %v10515_v62 = vld [vmem:[%s14233_s1 + $0x15a8] ss:$16 sps:$4 sm:$0xff]   ;;  %v10520_v5 = vld [vmem:[%s14233_s1 + $0x138c] ss:$16 sps:$4 sm:$0xff]  }
 0x30f   : > { %v6945_v6 = vpop.f32.mrf.mxu1  ;;  %7239 = vmatprep.subr.bf16.mxu1 %v10463_v17  ;;  %v13454_v44 = vadd.f32 %v6943_v21, %v6903_v26  ;;  %v6905_v35 = vadd.f32 %v6904_v30, %v13246_v63  ;;  %7228 = vmatprep.mubr.bf16.mxu0 %v11756_v1  ;;  %v10472_v1 = vld [vmem:[%s14233_s1 + $0x128c] ss:$16 sps:$4 sm:$0xff]   ;;  %v10518_v38 = vld [vmem:[%s14233_s1 + $0x1388] ss:$16 sps:$4 sm:$0xff]  }
 0x310   : > { %7269 = vmatprep.mubr.bf16.mxu1 %v11980_v54  ;;  %v6906_v25 = vpop.f32.mrf.mxu0  ;;  %v10475_v54 = vld [vmem:[%s14233_s1 + $0x148c] ss:$16 sps:$4 sm:$0xff]   ;;  %v10521_v21 = vld [vmem:[%s14233_s1 + $0x1588] ss:$16 sps:$4 sm:$0xff]  }
 0x311   : > { %v6947_v23 = vpop.f32.mrf.mxu1  ;;  %v13459_v19 = vadd.f32 %v6945_v6, %v6905_v35  ;;  %7199 = vmatpush1.bf16.msra.mxu0 %v10458_v27  ;;  %v10523_v17 = vld [vmem:[%s14233_s1 + $0x158c] ss:$16 sps:$4 sm:$0xff]   ;;  %v10527_v30 = vld [vmem:[%s14233_s1 + $0x1568] ss:$16 sps:$4 sm:$0xff]  }
 0x312   : > { %7240 = vmatpush1.bf16.msra.mxu1 %v10461_v14  ;;  %v6907_v31 = vpop.f32.mrf.mxu0  ;;  %7200 = vmatprep.subr.bf16.mxu0 %v10466_v60  ;;  %v10526_v26 = vld [vmem:[%s14233_s1 + $0x136c] ss:$16 sps:$4 sm:$0xff]   ;;  %v10524_v14 = vld [vmem:[%s14233_s1 + $0x1368] ss:$16 sps:$4 sm:$0xff]  }
 0x313   : > { %v6948_v63 = vpop.f32.mrf.mxu1  ;;  %7241 = vmatprep.subr.bf16.mxu1 %v10469_v46  ;;  %v10529_v27 = vld [vmem:[%s14233_s1 + $0x156c] ss:$16 sps:$4 sm:$0xff]   ;;  %v10530_v46 = vld [vmem:[%s14233_s1 + $0x1348] ss:$16 sps:$4 sm:$0xff]  }
 0x314   : > { %v10532_v6 = vld [vmem:[%s14233_s1 + $0x134c] ss:$16 sps:$4 sm:$0xff]   ;;  %v10533_v35 = vld [vmem:[%s14233_s1 + $0x1548] ss:$16 sps:$4 sm:$0xff]  }
 0x315   : > { %7201 = vmatpush1.bf16.msra.mxu0 %v10464_v7  ;;  %v10535_v60 = vld [vmem:[%s14233_s1 + $0x154c] ss:$16 sps:$4 sm:$0xff]   ;;  %v10536_v7 = vld [vmem:[%s14233_s1 + $0x1328] ss:$16 sps:$4 sm:$0xff]  }
 0x316   : > { %7242 = vmatpush1.bf16.msra.mxu1 %v10467_v16  ;;  %7202 = vmatprep.subr.bf16.mxu0 %v10472_v1  ;;  %v10538_v25 = vld [vmem:[%s14233_s1 + $0x132c] ss:$16 sps:$4 sm:$0xff]   ;;  %v10539_v16 = vld [vmem:[%s14233_s1 + $0x1528] ss:$16 sps:$4 sm:$0xff]  }
 0x317   : > { %7243 = vmatprep.subr.bf16.mxu1 %v10475_v54  ;;  %v10541_v23 = vld [vmem:[%s14233_s1 + $0x152c] ss:$16 sps:$4 sm:$0xff]   ;;  %v10542_v1 = vld [vmem:[%s14233_s1 + $0x1308] ss:$16 sps:$4 sm:$0xff]  }
 0x318   : > { %v10544_v31 = vld [vmem:[%s14233_s1 + $0x130c] ss:$16 sps:$4 sm:$0xff]   ;;  %v10545_v54 = vld [vmem:[%s14233_s1 + $0x1508] ss:$16 sps:$4 sm:$0xff]  }
 0x319   : > { %7203 = vmatpush1.bf16.msra.mxu0 %v10470_v32  ;;  %v10547_v63 = vld [vmem:[%s14233_s1 + $0x150c] ss:$16 sps:$4 sm:$0xff]  }
 0x31a   : > { %7244 = vmatpush1.bf16.msra.mxu1 %v10473_v33  ;;  %7204 = vmatprep.subr.bf16.mxu0 %v10478_v28  ;;  %v10550_v32 = vld [vmem:[%s14233_s1 + $0x16ec] ss:$16 sps:$4 sm:$0xff]   ;;  %v10548_v28 = vld [vmem:[%s14233_s1 + $0x16e8] ss:$16 sps:$4 sm:$0xff]  }
 0x31b   : > { %7245 = vmatprep.subr.bf16.mxu1 %v10481_v34  ;;  %v10553_v33 = vld [vmem:[%s14233_s1 + $0x18ec] ss:$16 sps:$4 sm:$0xff]   ;;  %v10551_v34 = vld [vmem:[%s14233_s1 + $0x18e8] ss:$16 sps:$4 sm:$0xff]  }
 0x31d   : > { %7205 = vmatpush1.bf16.msra.mxu0 %v10476_v22  ;;  %v10556_v22 = vld [vmem:[%s14233_s1 + $0x16cc] ss:$16 sps:$4 sm:$0xff]  }
 0x31e   : > { %7246 = vmatpush1.bf16.msra.mxu1 %v10479_v37  ;;  %7206 = vmatprep.subr.bf16.mxu0 %v10484_v24  ;;  %v10559_v37 = vld [vmem:[%s14233_s1 + $0x18cc] ss:$16 sps:$4 sm:$0xff]  }
 0x31f   : > { %7247 = vmatprep.subr.bf16.mxu1 %v10487_v51 }
 0x321   : > { %7207 = vmatpush1.bf16.msra.mxu0 %v10482_v36 }
 0x322   : > { %7248 = vmatpush1.bf16.msra.mxu1 %v10485_v53  ;;  %7208 = vmatprep.subr.bf16.mxu0 %v10490_v49  ;;  %v10554_v53 = vld [vmem:[%s14233_s1 + $0x16c8] ss:$16 sps:$4 sm:$0xff]  }
 0x323   : > { %7249 = vmatprep.subr.bf16.mxu1 %v10493_v50  ;;  %v10557_v49 = vld [vmem:[%s14233_s1 + $0x18c8] ss:$16 sps:$4 sm:$0xff]  }
 0x325   : > { %7209 = vmatpush1.bf16.msra.mxu0 %v10488_v39 }
 0x326   : > { %7250 = vmatpush1.bf16.msra.mxu1 %v10491_v59  ;;  %7210 = vmatprep.subr.bf16.mxu0 %v10496_v40 }
 0x327   : > { %7251 = vmatprep.subr.bf16.mxu1 %v10499_v4 }
 0x329   : > { %7211 = vmatpush1.bf16.msra.mxu0 %v10494_v8 }
 0x32a   : > { %7252 = vmatpush1.bf16.msra.mxu1 %v10497_v42  ;;  %7212 = vmatprep.subr.bf16.mxu0 %v10502_v58  ;;  %v10560_v42 = vld [vmem:[%s14233_s1 + $0x16a8] ss:$16 sps:$4 sm:$0xff]  }
 0x32b   : > { %7253 = vmatprep.subr.bf16.mxu1 %v10505_v3  ;;  %v10563_v58 = vld [vmem:[%s14233_s1 + $0x18a8] ss:$16 sps:$4 sm:$0xff]  }
 0x32d   : > { %7213 = vmatpush2.bf16.msra.mxu0 %v10500_v43  ;;  %v10566_v43 = vld [vmem:[%s14233_s1 + $0x1688] ss:$16 sps:$4 sm:$0xff]  }
 0x32e   : > { %7254 = vmatpush2.bf16.msra.mxu1 %v10503_v0  ;;  %7214 = vmatprep.subr.bf16.mxu0 %v10508_v29  ;;  %v10569_v0 = vld [vmem:[%s14233_s1 + $0x1888] ss:$16 sps:$4 sm:$0xff]   ;;  %v10574_v29 = vld [vmem:[%s14233_s1 + $0x166c] ss:$16 sps:$4 sm:$0xff]  }
 0x32f   : > { %7255 = vmatprep.subr.bf16.mxu1 %v10511_v10  ;;  %v10577_v10 = vld [vmem:[%s14233_s1 + $0x186c] ss:$16 sps:$4 sm:$0xff]  }
 0x331   : > { %7215 = vmatpush2.bf16.msra.mxu0 %v10506_v12  ;;  %v10572_v12 = vld [vmem:[%s14233_s1 + $0x1668] ss:$16 sps:$4 sm:$0xff]  }
 0x332   : > { %7256 = vmatpush2.bf16.msra.mxu1 %v10509_v13  ;;  %7216 = vmatprep.subr.bf16.mxu0 %v10514_v11  ;;  %v10575_v13 = vld [vmem:[%s14233_s1 + $0x1868] ss:$16 sps:$4 sm:$0xff]   ;;  %v10580_v11 = vld [vmem:[%s14233_s1 + $0x164c] ss:$16 sps:$4 sm:$0xff]  }
 0x333   : > { %7257 = vmatprep.subr.bf16.mxu1 %v10517_v18  ;;  %v10583_v18 = vld [vmem:[%s14233_s1 + $0x184c] ss:$16 sps:$4 sm:$0xff]  }
 0x335   : > { %7217 = vmatpush2.bf16.msra.mxu0 %v10512_v20  ;;  %v10578_v20 = vld [vmem:[%s14233_s1 + $0x1648] ss:$16 sps:$4 sm:$0xff]  }
 0x336   : > { %7258 = vmatpush2.bf16.msra.mxu1 %v10515_v62  ;;  %7218 = vmatprep.subr.bf16.mxu0 %v10520_v5  ;;  %v10581_v62 = vld [vmem:[%s14233_s1 + $0x1848] ss:$16 sps:$4 sm:$0xff]   ;;  %v10586_v5 = vld [vmem:[%s14233_s1 + $0x162c] ss:$16 sps:$4 sm:$0xff]  }
 0x337   : > { %7259 = vmatprep.subr.bf16.mxu1 %v10523_v17  ;;  %v10589_v17 = vld [vmem:[%s14233_s1 + $0x182c] ss:$16 sps:$4 sm:$0xff]  }
 0x339   : > { %7219 = vmatpush2.bf16.msra.mxu0 %v10518_v38  ;;  %v10584_v38 = vld [vmem:[%s14233_s1 + $0x1628] ss:$16 sps:$4 sm:$0xff]  }
 0x33a   : > { %7260 = vmatpush2.bf16.msra.mxu1 %v10521_v21  ;;  %7220 = vmatprep.subr.bf16.mxu0 %v10526_v26  ;;  %v10587_v21 = vld [vmem:[%s14233_s1 + $0x1828] ss:$16 sps:$4 sm:$0xff]   ;;  %v10592_v26 = vld [vmem:[%s14233_s1 + $0x160c] ss:$16 sps:$4 sm:$0xff]  }
 0x33b   : > { %7261 = vmatprep.subr.bf16.mxu1 %v10529_v27  ;;  %v10595_v27 = vld [vmem:[%s14233_s1 + $0x180c] ss:$16 sps:$4 sm:$0xff]  }
 0x33d   : > { %7221 = vmatpush2.bf16.msra.mxu0 %v10524_v14  ;;  %v10590_v14 = vld [vmem:[%s14233_s1 + $0x1608] ss:$16 sps:$4 sm:$0xff]  }
 0x33e   : > { %7262 = vmatpush2.bf16.msra.mxu1 %v10527_v30  ;;  %7222 = vmatprep.subr.bf16.mxu0 %v10532_v6  ;;  %v10593_v30 = vld [vmem:[%s14233_s1 + $0x1808] ss:$16 sps:$4 sm:$0xff]   ;;  %v10598_v6 = vld [vmem:[%s14233_s1 + $0x17ec] ss:$16 sps:$4 sm:$0xff]  }
 0x33f   : > { %7263 = vmatprep.subr.bf16.mxu1 %v10535_v60  ;;  %v10601_v60 = vld [vmem:[%s14233_s1 + $0x19ec] ss:$16 sps:$4 sm:$0xff]  }
 0x341   : > { %7223 = vmatpush2.bf16.msra.mxu0 %v10530_v46  ;;  %v10596_v46 = vld [vmem:[%s14233_s1 + $0x17e8] ss:$16 sps:$4 sm:$0xff]  }
 0x342   : > { %7264 = vmatpush2.bf16.msra.mxu1 %v10533_v35  ;;  %7224 = vmatprep.subr.bf16.mxu0 %v10538_v25  ;;  %v10599_v35 = vld [vmem:[%s14233_s1 + $0x19e8] ss:$16 sps:$4 sm:$0xff]   ;;  %v10604_v25 = vld [vmem:[%s14233_s1 + $0x17cc] ss:$16 sps:$4 sm:$0xff]  }
 0x343   : > { %7265 = vmatprep.subr.bf16.mxu1 %v10541_v23  ;;  %v10607_v23 = vld [vmem:[%s14233_s1 + $0x19cc] ss:$16 sps:$4 sm:$0xff]  }
 0x345   : > { %7225 = vmatpush2.bf16.msra.mxu0 %v10536_v7  ;;  %v10602_v7 = vld [vmem:[%s14233_s1 + $0x17c8] ss:$16 sps:$4 sm:$0xff]  }
 0x346   : > { %7266 = vmatpush2.bf16.msra.mxu1 %v10539_v16  ;;  %7226 = vmatprep.subr.bf16.mxu0 %v10544_v31  ;;  %v10605_v16 = vld [vmem:[%s14233_s1 + $0x19c8] ss:$16 sps:$4 sm:$0xff]   ;;  %v10610_v31 = vld [vmem:[%s14233_s1 + $0x17ac] ss:$16 sps:$4 sm:$0xff]  }
 0x347   : > { %7267 = vmatprep.subr.bf16.mxu1 %v10547_v63  ;;  %v10613_v63 = vld [vmem:[%s14233_s1 + $0x19ac] ss:$16 sps:$4 sm:$0xff]  }
 0x349   : > { %7227 = vmatpush2.bf16.msra.mxu0 %v10542_v1  ;;  %v10608_v1 = vld [vmem:[%s14233_s1 + $0x17a8] ss:$16 sps:$4 sm:$0xff]  }
 0x34a   : > { %7268 = vmatpush2.bf16.msra.mxu1 %v10545_v54  ;;  %7278 = vmatprep.subr.bf16.mxu0 %v10550_v32  ;;  %v10611_v54 = vld [vmem:[%s14233_s1 + $0x19a8] ss:$16 sps:$4 sm:$0xff]   ;;  %v10616_v32 = vld [vmem:[%s14233_s1 + $0x178c] ss:$16 sps:$4 sm:$0xff]  }
 0x34b   : > { %7319 = vmatprep.subr.bf16.mxu1 %v10553_v33  ;;  %v10619_v33 = vld [vmem:[%s14233_s1 + $0x198c] ss:$16 sps:$4 sm:$0xff]  }
 0x34c   : > { %v6984_v24 = vpop.f32.mrf.mxu0  ;;  %7229 = vmatmul.mubr.bf16.vlgmr.msra.gmra.mxu0 %v11958_v48  ;;  %v10562_v48 = vld [vmem:[%s14233_s1 + $0x16ac] ss:$16 sps:$4 sm:$0xff]  }
 0x34d   : > { %v7025_v51 = vpop.f32.mrf.mxu1  ;;  %7270 = vmatmul.mubr.bf16.vlgmr.msra.gmra.mxu1 %v12181_v45  ;;  %v6985_v36 = vadd.f32 %v6984_v24, %v13454_v44  ;;  %7279 = vmatpush1.bf16.msra.mxu0 %v10548_v28  ;;  %v10565_v45 = vld [vmem:[%s14233_s1 + $0x18ac] ss:$16 sps:$4 sm:$0xff]   ;;  %v10614_v28 = vld [vmem:[%s14233_s1 + $0x1788] ss:$16 sps:$4 sm:$0xff]  }
 0x34e   : > { %7320 = vmatpush1.bf16.msra.mxu1 %v10551_v34  ;;  %v6986_v50 = vpop.f32.mrf.mxu0  ;;  %7280 = vmatprep.subr.bf16.mxu0 %v10556_v22  ;;  %v10617_v34 = vld [vmem:[%s14233_s1 + $0x1988] ss:$16 sps:$4 sm:$0xff]   ;;  %v10622_v22 = vld [vmem:[%s14233_s1 + $0x176c] ss:$16 sps:$4 sm:$0xff]  }
 0x34f   : > { %v7027_v39 = vpop.f32.mrf.mxu1  ;;  %7321 = vmatprep.subr.bf16.mxu1 %v10559_v37  ;;  %v13656_v44 = vadd.f32 %v7025_v51, %v6985_v36  ;;  %v6987_v59 = vadd.f32 %v6986_v50, %v13459_v19  ;;  %7310 = vmatprep.mubr.bf16.mxu0 %v11984_v55  ;;  %v10568_v55 = vld [vmem:[%s14233_s1 + $0x168c] ss:$16 sps:$4 sm:$0xff]   ;;  %v10620_v24 = vld [vmem:[%s14233_s1 + $0x1768] ss:$16 sps:$4 sm:$0xff]  }
 0x350   : > { %7351 = vmatprep.mubr.bf16.mxu1 %v12204_v56  ;;  %v6988_v40 = vpop.f32.mrf.mxu0  ;;  %v10571_v56 = vld [vmem:[%s14233_s1 + $0x188c] ss:$16 sps:$4 sm:$0xff]   ;;  %v10623_v51 = vld [vmem:[%s14233_s1 + $0x1968] ss:$16 sps:$4 sm:$0xff]  }
 0x351   : > { %v7029_v4 = vpop.f32.mrf.mxu1  ;;  %v13661_v8 = vadd.f32 %v7027_v39, %v6987_v59  ;;  %7281 = vmatpush1.bf16.msra.mxu0 %v10554_v53  ;;  %v10625_v37 = vld [vmem:[%s14233_s1 + $0x196c] ss:$16 sps:$4 sm:$0xff]   ;;  %v10629_v50 = vld [vmem:[%s14233_s1 + $0x1948] ss:$16 sps:$4 sm:$0xff]  }
 0x352   : > { %7322 = vmatpush1.bf16.msra.mxu1 %v10557_v49  ;;  %v6989_v3 = vpop.f32.mrf.mxu0  ;;  %7282 = vmatprep.subr.bf16.mxu0 %v10562_v48  ;;  %v10628_v36 = vld [vmem:[%s14233_s1 + $0x174c] ss:$16 sps:$4 sm:$0xff]   ;;  %v10626_v49 = vld [vmem:[%s14233_s1 + $0x1748] ss:$16 sps:$4 sm:$0xff]  }
 0x353   : > { %v7030_v19 = vpop.f32.mrf.mxu1  ;;  %7323 = vmatprep.subr.bf16.mxu1 %v10565_v45  ;;  %v10631_v53 = vld [vmem:[%s14233_s1 + $0x194c] ss:$16 sps:$4 sm:$0xff]   ;;  %v10632_v45 = vld [vmem:[%s14233_s1 + $0x1728] ss:$16 sps:$4 sm:$0xff]  }
 0x354   : > { %v10634_v39 = vld [vmem:[%s14233_s1 + $0x172c] ss:$16 sps:$4 sm:$0xff]   ;;  %v10635_v59 = vld [vmem:[%s14233_s1 + $0x1928] ss:$16 sps:$4 sm:$0xff]  }
 0x355   : > { %7283 = vmatpush1.bf16.msra.mxu0 %v10560_v42  ;;  %v10637_v48 = vld [vmem:[%s14233_s1 + $0x192c] ss:$16 sps:$4 sm:$0xff]   ;;  %v10638_v42 = vld [vmem:[%s14233_s1 + $0x1708] ss:$16 sps:$4 sm:$0xff]  }
 0x356   : > { %7324 = vmatpush1.bf16.msra.mxu1 %v10563_v58  ;;  %7284 = vmatprep.subr.bf16.mxu0 %v10568_v55  ;;  %v10640_v40 = vld [vmem:[%s14233_s1 + $0x170c] ss:$16 sps:$4 sm:$0xff]   ;;  %v10641_v58 = vld [vmem:[%s14233_s1 + $0x1908] ss:$16 sps:$4 sm:$0xff]  }
 0x357   : > { %7325 = vmatprep.subr.bf16.mxu1 %v10571_v56  ;;  %v10643_v4 = vld [vmem:[%s14233_s1 + $0x190c] ss:$16 sps:$4 sm:$0xff]   ;;  %v10644_v55 = vld [vmem:[%s14233_s1 + $0x1ae8] ss:$16 sps:$4 sm:$0xff]  }
 0x358   : > { %v10646_v3 = vld [vmem:[%s14233_s1 + $0x1aec] ss:$16 sps:$4 sm:$0xff]   ;;  %v10647_v56 = vld [vmem:[%s14233_s1 + $0x1ce8] ss:$16 sps:$4 sm:$0xff]  }
 0x359   : > { %7285 = vmatpush1.bf16.msra.mxu0 %v10566_v43  ;;  %v10649_v19 = vld [vmem:[%s14233_s1 + $0x1cec] ss:$16 sps:$4 sm:$0xff]  }
 0x35a   : > { %7326 = vmatpush1.bf16.msra.mxu1 %v10569_v0  ;;  %7286 = vmatprep.subr.bf16.mxu0 %v10574_v29  ;;  %v10652_v43 = vld [vmem:[%s14233_s1 + $0x1acc] ss:$16 sps:$4 sm:$0xff]  }
 0x35b   : > { %7327 = vmatprep.subr.bf16.mxu1 %v10577_v10  ;;  %v10655_v0 = vld [vmem:[%s14233_s1 + $0x1ccc] ss:$16 sps:$4 sm:$0xff]  }
 0x35d   : > { %7287 = vmatpush1.bf16.msra.mxu0 %v10572_v12 }
 0x35e   : > { %7328 = vmatpush1.bf16.msra.mxu1 %v10575_v13  ;;  %7288 = vmatprep.subr.bf16.mxu0 %v10580_v11  ;;  %v10650_v13 = vld [vmem:[%s14233_s1 + $0x1ac8] ss:$16 sps:$4 sm:$0xff]  }
 0x35f   : > { %7329 = vmatprep.subr.bf16.mxu1 %v10583_v18  ;;  %v10653_v11 = vld [vmem:[%s14233_s1 + $0x1cc8] ss:$16 sps:$4 sm:$0xff]  }
 0x361   : > { %7289 = vmatpush1.bf16.msra.mxu0 %v10578_v20 }
 0x362   : > { %7330 = vmatpush1.bf16.msra.mxu1 %v10581_v62  ;;  %7290 = vmatprep.subr.bf16.mxu0 %v10586_v5 }
 0x363   : > { %7331 = vmatprep.subr.bf16.mxu1 %v10589_v17 }
 0x365   : > { %7291 = vmatpush1.bf16.msra.mxu0 %v10584_v38 }
 0x366   : > { %7332 = vmatpush1.bf16.msra.mxu1 %v10587_v21  ;;  %7292 = vmatprep.subr.bf16.mxu0 %v10592_v26  ;;  %v10656_v21 = vld [vmem:[%s14233_s1 + $0x1aa8] ss:$16 sps:$4 sm:$0xff]  }
 0x367   : > { %7333 = vmatprep.subr.bf16.mxu1 %v10595_v27  ;;  %v10659_v26 = vld [vmem:[%s14233_s1 + $0x1ca8] ss:$16 sps:$4 sm:$0xff]  }
 0x369   : > { %7293 = vmatpush1.bf16.msra.mxu0 %v10590_v14  ;;  %v10662_v14 = vld [vmem:[%s14233_s1 + $0x1a88] ss:$16 sps:$4 sm:$0xff]  }
 0x36a   : > { %7334 = vmatpush1.bf16.msra.mxu1 %v10593_v30  ;;  %7294 = vmatprep.subr.bf16.mxu0 %v10598_v6  ;;  %v10665_v30 = vld [vmem:[%s14233_s1 + $0x1c88] ss:$16 sps:$4 sm:$0xff]   ;;  %v10670_v6 = vld [vmem:[%s14233_s1 + $0x1a6c] ss:$16 sps:$4 sm:$0xff]  }
 0x36b   : > { %7335 = vmatprep.subr.bf16.mxu1 %v10601_v60  ;;  %v10673_v60 = vld [vmem:[%s14233_s1 + $0x1c6c] ss:$16 sps:$4 sm:$0xff]  }
 0x36d   : > { %7295 = vmatpush2.bf16.msra.mxu0 %v10596_v46  ;;  %v10668_v46 = vld [vmem:[%s14233_s1 + $0x1a68] ss:$16 sps:$4 sm:$0xff]  }
 0x36e   : > { %7336 = vmatpush2.bf16.msra.mxu1 %v10599_v35  ;;  %7296 = vmatprep.subr.bf16.mxu0 %v10604_v25  ;;  %v10671_v35 = vld [vmem:[%s14233_s1 + $0x1c68] ss:$16 sps:$4 sm:$0xff]   ;;  %v10676_v25 = vld [vmem:[%s14233_s1 + $0x1a4c] ss:$16 sps:$4 sm:$0xff]  }
 0x36f   : > { %7337 = vmatprep.subr.bf16.mxu1 %v10607_v23  ;;  %v10679_v23 = vld [vmem:[%s14233_s1 + $0x1c4c] ss:$16 sps:$4 sm:$0xff]  }
 0x371   : > { %7297 = vmatpush2.bf16.msra.mxu0 %v10602_v7  ;;  %v10674_v7 = vld [vmem:[%s14233_s1 + $0x1a48] ss:$16 sps:$4 sm:$0xff]  }
 0x372   : > { %7338 = vmatpush2.bf16.msra.mxu1 %v10605_v16  ;;  %7298 = vmatprep.subr.bf16.mxu0 %v10610_v31  ;;  %v10677_v16 = vld [vmem:[%s14233_s1 + $0x1c48] ss:$16 sps:$4 sm:$0xff]   ;;  %v10682_v31 = vld [vmem:[%s14233_s1 + $0x1a2c] ss:$16 sps:$4 sm:$0xff]  }
 0x373   : > { %7339 = vmatprep.subr.bf16.mxu1 %v10613_v63  ;;  %v10685_v63 = vld [vmem:[%s14233_s1 + $0x1c2c] ss:$16 sps:$4 sm:$0xff]  }
 0x375   : > { %7299 = vmatpush2.bf16.msra.mxu0 %v10608_v1  ;;  %v10680_v1 = vld [vmem:[%s14233_s1 + $0x1a28] ss:$16 sps:$4 sm:$0xff]  }
 0x376   : > { %7340 = vmatpush2.bf16.msra.mxu1 %v10611_v54  ;;  %7300 = vmatprep.subr.bf16.mxu0 %v10616_v32  ;;  %v10683_v54 = vld [vmem:[%s14233_s1 + $0x1c28] ss:$16 sps:$4 sm:$0xff]   ;;  %v10688_v32 = vld [vmem:[%s14233_s1 + $0x1a0c] ss:$16 sps:$4 sm:$0xff]  }
 0x377   : > { %7341 = vmatprep.subr.bf16.mxu1 %v10619_v33  ;;  %v10691_v33 = vld [vmem:[%s14233_s1 + $0x1c0c] ss:$16 sps:$4 sm:$0xff]  }
 0x379   : > { %7301 = vmatpush2.bf16.msra.mxu0 %v10614_v28  ;;  %v10686_v28 = vld [vmem:[%s14233_s1 + $0x1a08] ss:$16 sps:$4 sm:$0xff]  }
 0x37a   : > { %7342 = vmatpush2.bf16.msra.mxu1 %v10617_v34  ;;  %7302 = vmatprep.subr.bf16.mxu0 %v10622_v22  ;;  %v10689_v34 = vld [vmem:[%s14233_s1 + $0x1c08] ss:$16 sps:$4 sm:$0xff]   ;;  %v10694_v22 = vld [vmem:[%s14233_s1 + $0x1bec] ss:$16 sps:$4 sm:$0xff]  }
 0x37b   : > { %7343 = vmatprep.subr.bf16.mxu1 %v10625_v37  ;;  %v10697_v37 = vld [vmem:[%s14233_s1 + $0x1dec] ss:$16 sps:$4 sm:$0xff]  }
 0x37d   : > { %7303 = vmatpush2.bf16.msra.mxu0 %v10620_v24  ;;  %v10692_v24 = vld [vmem:[%s14233_s1 + $0x1be8] ss:$16 sps:$4 sm:$0xff]  }
 0x37e   : > { %7344 = vmatpush2.bf16.msra.mxu1 %v10623_v51  ;;  %7304 = vmatprep.subr.bf16.mxu0 %v10628_v36  ;;  %v10695_v51 = vld [vmem:[%s14233_s1 + $0x1de8] ss:$16 sps:$4 sm:$0xff]   ;;  %v10700_v36 = vld [vmem:[%s14233_s1 + $0x1bcc] ss:$16 sps:$4 sm:$0xff]  }
 0x37f   : > { %7345 = vmatprep.subr.bf16.mxu1 %v10631_v53  ;;  %v10703_v53 = vld [vmem:[%s14233_s1 + $0x1dcc] ss:$16 sps:$4 sm:$0xff]  }
 0x381   : > { %7305 = vmatpush2.bf16.msra.mxu0 %v10626_v49  ;;  %v7448_v49 = vrot.slane %v13255_v47, 4 }
 0x382   : > { %7346 = vmatpush2.bf16.msra.mxu1 %v10629_v50  ;;  %7306 = vmatprep.subr.bf16.mxu0 %v10634_v39  ;;  %v10698_v50 = vld [vmem:[%s14233_s1 + $0x1bc8] ss:$16 sps:$4 sm:$0xff]  }
 0x383   : > { %7347 = vmatprep.subr.bf16.mxu1 %v10637_v48  ;;  %v10701_v39 = vld [vmem:[%s14233_s1 + $0x1dc8] ss:$16 sps:$4 sm:$0xff]   ;;  %v10706_v48 = vld [vmem:[%s14233_s1 + $0x1bac] ss:$16 sps:$4 sm:$0xff]  }
 0x385   : > { %7307 = vmatpush2.bf16.msra.mxu0 %v10632_v45  ;;  %v10709_v45 = vld [vmem:[%s14233_s1 + $0x1dac] ss:$16 sps:$4 sm:$0xff]  }
 0x386   : > { %7348 = vmatpush2.bf16.msra.mxu1 %v10635_v59  ;;  %7308 = vmatprep.subr.bf16.mxu0 %v10640_v40  ;;  %v7449_v59 = vmax.f32 %v13255_v47, %v7448_v49  ;;  %v10704_v40 = vld [vmem:[%s14233_s1 + $0x1ba8] ss:$16 sps:$4 sm:$0xff]   ;;  %v10715_v47 = vld [vmem:[%s14233_s1 + $0x1d8c] ss:$16 sps:$4 sm:$0xff]   ;;  %v10758_v49 = vld [vmem:[%s14235_s3 + $0xf0] sm:$0xff]  }
 0x387   : > { %7349 = vmatprep.subr.bf16.mxu1 %v10643_v4  ;;  %v10707_v4 = vld [vmem:[%s14233_s1 + $0x1da8] ss:$16 sps:$4 sm:$0xff]  }
 0x389   : > { %7309 = vmatpush2.bf16.msra.mxu0 %v10638_v42  ;;  %v10712_v42 = vld [vmem:[%s14233_s1 + $0x1b8c] ss:$16 sps:$4 sm:$0xff]  }
 0x38a   : > { %7350 = vmatpush2.bf16.msra.mxu1 %v10641_v58  ;;  %7360 = vmatprep.subr.bf16.mxu0 %v10646_v3  ;;  %v7450_v58 = vrot.slane %v7449_v59, 2  ;;  %v10710_v3 = vld [vmem:[%s14233_s1 + $0x1b88] ss:$16 sps:$4 sm:$0xff]  }
 0x38b   : > { %7401 = vmatprep.subr.bf16.mxu1 %v10649_v19  ;;  %v10713_v19 = vld [vmem:[%s14233_s1 + $0x1d88] ss:$16 sps:$4 sm:$0xff]  }
 0x38c   : > { %v7066_v29 = vpop.f32.mrf.mxu0  ;;  %7311 = vmatmul.mubr.bf16.vlgmr.msra.gmra.mxu0 %v12185_v52  ;;  %v10658_v52 = vld [vmem:[%s14233_s1 + $0x1aac] ss:$16 sps:$4 sm:$0xff]  }
 0x38d   : > { %v7107_v10 = vpop.f32.mrf.mxu1  ;;  %7352 = vmatmul.mubr.bf16.vlgmr.msra.gmra.mxu1 %v12405_v41  ;;  %v7067_v12 = vadd.f32 %v7066_v29, %v13656_v44  ;;  %7361 = vmatpush1.bf16.msra.mxu0 %v10644_v55  ;;  %v10661_v41 = vld [vmem:[%s14233_s1 + $0x1cac] ss:$16 sps:$4 sm:$0xff]   ;;  %v7468_v55 = vlaneseq  ;;  %v10716_v29 = vld [vmem:[%s14233_s1 + $0x1b68] ss:$16 sps:$4 sm:$0xff]  }
 0x38e   : > { %7402 = vmatpush1.bf16.msra.mxu1 %v10647_v56  ;;  %v7068_v18 = vpop.f32.mrf.mxu0  ;;  %7362 = vmatprep.subr.bf16.mxu0 %v10652_v43  ;;  %v10718_v56 = vld [vmem:[%s14233_s1 + $0x1b6c] ss:$16 sps:$4 sm:$0xff]  }
 0x38f   : > { %v7109_v20 = vpop.f32.mrf.mxu1  ;;  %7403 = vmatprep.subr.bf16.mxu1 %v10655_v0  ;;  %v13858_v44 = vadd.f32 %v7107_v10, %v7067_v12  ;;  %v7069_v62 = vadd.f32 %v7068_v18, %v13661_v8  ;;  %7392 = vmatprep.mubr.bf16.mxu0 %v12208_v57  ;;  %v10664_v57 = vld [vmem:[%s14233_s1 + $0x1a8c] ss:$16 sps:$4 sm:$0xff]   ;;  %v7451_v0 = vmax.f32 %v7449_v59, %v7450_v58  ;;  %v10719_v10 = vld [vmem:[%s14233_s1 + $0x1d68] ss:$16 sps:$4 sm:$0xff]   ;;  %v13993_v12 = vshrl.u32 %v7468_v55, 7 }
 0x390   : > { %7433 = vmatprep.mubr.bf16.mxu1 %v12425_v9  ;;  %v7070_v5 = vpop.f32.mrf.mxu0  ;;  %v10667_v9 = vld [vmem:[%s14233_s1 + $0x1c8c] ss:$16 sps:$4 sm:$0xff]  }
 0x391   : > { %v7111_v17 = vpop.f32.mrf.mxu1  ;;  %v13863_v38 = vadd.f32 %v7109_v20, %v7069_v62  ;;  %7363 = vmatpush1.bf16.msra.mxu0 %v10650_v13  ;;  %v10721_v43 = vld [vmem:[%s14233_s1 + $0x1d6c] ss:$16 sps:$4 sm:$0xff]   ;;  %v7452_v18 = vrot.slane %v7451_v0, 1  ;;  %v7474_v20 = vsub.s32 1, %v13993_v12 }
 0x392   : > { %7404 = vmatpush1.bf16.msra.mxu1 %v10653_v11  ;;  %v7071_v27 = vpop.f32.mrf.mxu0  ;;  %7364 = vmatprep.subr.bf16.mxu0 %v10658_v52  ;;  %v10724_v13 = vld [vmem:[%s14233_s1 + $0x1b4c] ss:$16 sps:$4 sm:$0xff]   ;;  %v10722_v52 = vld [vmem:[%s14233_s1 + $0x1b48] ss:$16 sps:$4 sm:$0xff]   ;;  %v14017_v17 = vld [vmem:[%s14234_s2] sm:$0xf] }
 0x393   : > { %v7112_v8 = vpop.f32.mrf.mxu1  ;;  %7405 = vmatprep.subr.bf16.mxu1 %v10661_v41  ;;  %v10727_v11 = vld [vmem:[%s14233_s1 + $0x1d4c] ss:$16 sps:$4 sm:$0xff]   ;;  %v10725_v41 = vld [vmem:[%s14233_s1 + $0x1d48] ss:$16 sps:$4 sm:$0xff]  }
 0x394   : > { %v10730_v62 = vld [vmem:[%s14233_s1 + $0x1b2c] ss:$16 sps:$4 sm:$0xff]   ;;  %v10728_v27 = vld [vmem:[%s14233_s1 + $0x1b28] ss:$16 sps:$4 sm:$0xff]  }
 0x395   : > { %7365 = vmatpush1.bf16.msra.mxu0 %v10656_v21  ;;  %v10733_v5 = vld [vmem:[%s14233_s1 + $0x1d2c] ss:$16 sps:$4 sm:$0xff]   ;;  %v7453_v21 = vmax.f32 %v7451_v0, %v7452_v18  ;;  %v10731_v8 = vld [vmem:[%s14233_s1 + $0x1d28] ss:$16 sps:$4 sm:$0xff]   ;;  %v10755_v0 = vld [vmem:[%s14235_s3] sm:$0xff]  }
 0x396   : > { %7406 = vmatpush1.bf16.msra.mxu1 %v10659_v26  ;;  %7366 = vmatprep.subr.bf16.mxu0 %v10664_v57  ;;  %v7475_v26 = vrot.slane %v14017_v17, %v7474_v20  ;;  %v10736_v57 = vld [vmem:[%s14233_s1 + $0x1b0c] ss:$16 sps:$4 sm:$0xff]  }
 0x397   : > { %7407 = vmatprep.subr.bf16.mxu1 %v10667_v9  ;;  %v10739_v9 = vld [vmem:[%s14233_s1 + $0x1d0c] ss:$16 sps:$4 sm:$0xff]  }
 0x398   : > { %v10749_v59 = vld [vmem:[%s14235_s3 + $0x18] sm:$0xff]   ;;  %v10753_v55 = vld [vmem:[%s14235_s3 + $0x8] sm:$0xff]  }
 0x399   : > { %7367 = vmatpush1.bf16.msra.mxu0 %v10662_v14  ;;  %v7489_v14 = vadd.f32 %v7475_v26, %v7453_v21  ;;  %v10760_v18 = vld [vmem:[%s14235_s3 + $0xe8] sm:$0xff]  }
 0x39a   : > { %7408 = vmatpush1.bf16.msra.mxu1 %v10665_v30  ;;  %7368 = vmatprep.subr.bf16.mxu0 %v10670_v6  ;;  %v10734_v30 = vld [vmem:[%s14233_s1 + $0x1b08] ss:$16 sps:$4 sm:$0xff]  }
 0x39b   : > { %7409 = vmatprep.subr.bf16.mxu1 %v10673_v60  ;;  %v10737_v6 = vld [vmem:[%s14233_s1 + $0x1d08] ss:$16 sps:$4 sm:$0xff]  }
 0x39c   : > { %v10740_v60 = vld [vmem:[%s14235_s3 + $0x78] sm:$0xff]  }
 0x39d   : > { %7369 = vmatpush1.bf16.msra.mxu0 %v10668_v46  ;;  %v7493_v46 = vmax.f32 %v7489_v14, 0.0 }
 0x39e   : > { %7410 = vmatpush1.bf16.msra.mxu1 %v10671_v35  ;;  %7370 = vmatprep.subr.bf16.mxu0 %v10676_v25  ;;  %v10741_v35 = vld [vmem:[%s14235_s3 + $0x38] sm:$0xff]   ;;  %v7442_v25 = vrot.slane %v13238_v61, 4 }
 0x39f   : > { %7411 = vmatprep.subr.bf16.mxu1 %v10679_v23  ;;  %v10742_v23 = vld [vmem:[%s14235_s3 + $0x70] sm:$0xff]  }
 0x3a1   : > { %7371 = vmatpush1.bf16.msra.mxu0 %v10674_v7  ;;  %v7497_v7 = vpack.c.bf16 %v7493_v46, %v7493_v46  ;;  %v10766_v46 = vld [vmem:[%s14235_s3 + $0xd0] sm:$0xff]  }
 0x3a2   : > { %7412 = vmatpush1.bf16.msra.mxu1 %v10677_v16  ;;  %7372 = vmatprep.subr.bf16.mxu0 %v10682_v31 }
 0x3a3   : > { %7413 = vmatprep.subr.bf16.mxu1 %v10685_v63 }
 0x3a5   : > { %7373 = vmatpush1.bf16.msra.mxu0 %v10680_v1  ;;  %v10743_v1 = vld [vmem:[%s14235_s3 + $0x30] sm:$0xff]  }
 0x3a6   : > { %7414 = vmatpush1.bf16.msra.mxu1 %v10683_v54  ;;  %7374 = vmatprep.subr.bf16.mxu0 %v10688_v32  ;;  %v7443_v54 = vmax.f32 %v13238_v61, %v7442_v25  ;;  %v10746_v61 = vld [vmem:[%s14235_s3 + $0x60] sm:$0xff]   ;;  %v10768_v25 = vld [vmem:[%s14235_s3 + $0xc8] sm:$0xff]  }
 0x3a7   : > { %7415 = vmatprep.subr.bf16.mxu1 %v10691_v33 }
 0x3a9   : > { %7375 = vmatpush1.bf16.msra.mxu0 %v10686_v28  ;;  %v10744_v28 = vld [vmem:[%s14235_s3 + $0x68] sm:$0xff]  }
 0x3aa   : > { %7416 = vmatpush1.bf16.msra.mxu1 %v10689_v34  ;;  %7376 = vmatprep.subr.bf16.mxu0 %v10694_v22 }
 0x3ab   : > { %7417 = vmatprep.subr.bf16.mxu1 %v10697_v37  ;;  %v10745_v37 = vld [vmem:[%s14235_s3 + $0x28] sm:$0xff]  }
 0x3ad   : > { %7377 = vmatpush2.bf16.msra.mxu0 %v10692_v24  ;;  %v7444_v24 = vrot.slane %v7443_v54, 2 }
 0x3ae   : > { %7418 = vmatpush2.bf16.msra.mxu1 %v10695_v51  ;;  %7378 = vmatprep.subr.bf16.mxu0 %v10700_v36 }
 0x3af   : > { %7419 = vmatprep.subr.bf16.mxu1 %v10703_v53  ;;  %v10757_v53 = vld [vmem:[%s14235_s3 + $0xb8] sm:$0xff]  }
 0x3b1   : > { %7379 = vmatpush2.bf16.msra.mxu0 %v10698_v50  ;;  %v10747_v50 = vld [vmem:[%s14235_s3 + $0x20] sm:$0xff]  }
 0x3b2   : > { %7420 = vmatpush2.bf16.msra.mxu1 %v10701_v39  ;;  %7380 = vmatprep.subr.bf16.mxu0 %v10706_v48  ;;  %v10759_v39 = vld [vmem:[%s14235_s3 + $0xb0] sm:$0xff]   ;;  %v7445_v48 = vmax.f32 %v7443_v54, %v7444_v24  ;;  %v10774_v54 = vld [vmem:[%s14237_s5 + $0x28] sm:$0xff]  }
 0x3b3   : > { %7421 = vmatprep.subr.bf16.mxu1 %v10709_v45  ;;  %v10748_v45 = vld [vmem:[%s14235_s3 + $0x58] sm:$0xff]  }
 0x3b5   : > { %7381 = vmatpush2.bf16.msra.mxu0 %v10704_v40  ;;  %v7446_v40 = vrot.slane %v7445_v48, 1 }
 0x3b6   : > { %7422 = vmatpush2.bf16.msra.mxu1 %v10707_v4  ;;  %7382 = vmatprep.subr.bf16.mxu0 %v10712_v42  ;;  %v10750_v4 = vld [vmem:[%s14235_s3 + $0x50] sm:$0xff]   ;;  %v7470_v42 = vsub.s32 0, %v13993_v12 }
 0x3b7   : > { %7423 = vmatprep.subr.bf16.mxu1 %v10715_v47  ;;  %v10751_v47 = vld [vmem:[%s14235_s3 + $0x10] sm:$0xff]   ;;  %v7447_v58 = vmax.f32 %v7445_v48, %v7446_v40 }
 0x3b9   : > { %7383 = vmatpush2.bf16.msra.mxu0 %v10710_v3  ;;  %v10752_v3 = vld [vmem:[%s14235_s3 + $0x48] sm:$0xff]  }
 0x3ba   : > { %7424 = vmatpush2.bf16.msra.mxu1 %v10713_v19  ;;  %7384 = vmatprep.subr.bf16.mxu0 %v10718_v56  ;;  %v7471_v19 = vrot.slane %v14017_v17, %v7470_v42  ;;  %v10754_v56 = vld [vmem:[%s14235_s3 + $0x40] sm:$0xff]  }
 0x3bb   : > { %7425 = vmatprep.subr.bf16.mxu1 %v10721_v43 }
 0x3bc   : > { %v7488_v43 = vadd.f32 %v7471_v19, %v7447_v58 }
 0x3bd   : > { %7385 = vmatpush2.bf16.msra.mxu0 %v10716_v29 }
 0x3be   : > { %7426 = vmatpush2.bf16.msra.mxu1 %v10719_v10  ;;  %7386 = vmatprep.subr.bf16.mxu0 %v10724_v13  ;;  %v7492_v29 = vmax.f32 %v7488_v43, 0.0 }
 0x3bf   : > { %7427 = vmatprep.subr.bf16.mxu1 %v10727_v11 }
 0x3c0   : > { %v7496_v10 = vpack.c.bf16 %v7492_v29, %v7492_v29  ;;  %v7478_v29 = vsub.s32 2, %v13993_v12 }
 0x3c1   : > { %7387 = vmatpush2.bf16.msra.mxu0 %v10722_v52  ;;  %v10761_v52 = vld [vmem:[%s14235_s3 + $0xa8] sm:$0xff]  }
 0x3c2   : > { %7428 = vmatpush2.bf16.msra.mxu1 %v10725_v41  ;;  %7388 = vmatprep.subr.bf16.mxu0 %v10730_v62 }
 0x3c3   : > { %7429 = vmatprep.subr.bf16.mxu1 %v10733_v5 }
 0x3c5   : > { %7389 = vmatpush2.bf16.msra.mxu0 %v10728_v27 }
 0x3c6   : > { %7430 = vmatpush2.bf16.msra.mxu1 %v10731_v8  ;;  %7390 = vmatprep.subr.bf16.mxu0 %v10736_v57  ;;  %v10762_v8 = vld [vmem:[%s14235_s3 + $0xe0] sm:$0xff]  }
 0x3c7   : > { %7431 = vmatprep.subr.bf16.mxu1 %v10739_v9  ;;  %v10763_v9 = vld [vmem:[%s14235_s3 + $0xa0] sm:$0xff]  }
 0x3c9   : > { %7391 = vmatpush2.bf16.msra.mxu0 %v10734_v30 }
 0x3ca   : > { %7432 = vmatpush2.bf16.msra.mxu1 %v10737_v6  ;;  %9157 = vmatprep.subr.bf16.mxu0 %v10740_v60  ;;  %v10764_v6 = vld [vmem:[%s14235_s3 + $0xd8] sm:$0xff]  }
 0x3cb   : > { %v10765_v60 = vld [vmem:[%s14235_s3 + $0x98] sm:$0xff]  }
 0x3cc   : > { %v7148_v16 = vpop.f32.mrf.mxu0  ;;  %7393 = vmatmul.mubr.bf16.vlgmr.msra.gmra.mxu0 %v12409_v2 }
 0x3cd   : > { %v7189_v31 = vpop.f32.mrf.mxu1  ;;  %7434 = vmatmul.mubr.bf16.vlgmr.msra.gmra.mxu1 %v12619_v15  ;;  %v7149_v63 = vadd.f32 %v7148_v16, %v13858_v44  ;;  %9158 = vmatpush3.bf16.msra.mxu0 %v10741_v35  ;;  %v10767_v35 = vld [vmem:[%s14235_s3 + $0x90] sm:$0xff]   ;;  %v10771_v16 = vld [vmem:[%s14235_s3 + $0x80] sm:$0xff]  }
 0x3ce   : > { %7789 = vmatprep.mubr.bf16.mxu0 %v7497_v7  ;;  %v7150_v32 = vpop.f32.mrf.mxu0  ;;  %9159 = vmatprep.subr.bf16.mxu0 %v10742_v23  ;;  %v10769_v23 = vld [vmem:[%s14235_s3 + $0x88] sm:$0xff]   ;;  %v10770_v7 = vld [vmem:[%s14235_s3 + $0xc0] sm:$0xff]  }
 0x3cf   : > { %v7191_v33 = vpop.f32.mrf.mxu1  ;;  %v7190_v2 = vadd.f32 %v7189_v31, %v7149_v63  ;;  %v7151_v15 = vadd.f32 %v7150_v32, %v13863_v38  ;;  %v10756_v38 = vld [vmem:[%s14235_s3 + $0xf8] sm:$0xff]   ;;  %v10796_v63 = vmov 0.0   ;;  %v10775_v32 = vld [vmem:[%s14237_s5 + $0x20] sm:$0xff]  }
 0x3d0   : > { %v7152_v34 = vpop.f32.mrf.mxu0  ;;  %9179 = vmatprep.subr.bf16.mxu1 %v10756_v38  ;;  %v10772_v31 = vld [vmem:[%s14237_s5 + $0x38] sm:$0xff]  }
 0x3d1   : > { %v7193_v44 = vpop.f32.mrf.mxu1  ;;  %v7192_v22 = vadd.f32 %v7191_v33, %v7151_v15  ;;  %9160 = vmatpush3.bf16.msra.mxu0 %v10743_v1  ;;  %9180 = vmatpush3.bf16.msra.mxu1 %v10757_v53  ;;  %v10773_v1 = vld [vmem:[%s14237_s5 + $0x30] sm:$0xff]   ;;  %v10776_v33 = vld [vmem:[%s14237_s5 + $0x18] sm:$0xff]  }
 0x3d2   : > { %v7153_v51 = vpop.f32.mrf.mxu0  ;;  %9161 = vmatprep.subr.bf16.mxu0 %v10744_v28  ;;  %9181 = vmatprep.subr.bf16.mxu1 %v10758_v49 }
 0x3d3   : > { %v7194_v36 = vpop.f32.mrf.mxu1 }
 0x3d5   : > { %9162 = vmatpush3.bf16.msra.mxu0 %v10745_v37  ;;  %9182 = vmatpush3.bf16.msra.mxu1 %v10759_v39 }
 0x3d6   : > { %9163 = vmatprep.subr.bf16.mxu0 %v10746_v61  ;;  %9183 = vmatprep.subr.bf16.mxu1 %v10760_v18 }
 0x3d9   : > { %9164 = vmatpush3.bf16.msra.mxu0 %v10747_v50  ;;  %9184 = vmatpush3.bf16.msra.mxu1 %v10761_v52  ;;  %v7479_v52 = vrot.slane %v14017_v17, %v7478_v29 }
 0x3da   : > { %9165 = vmatprep.subr.bf16.mxu0 %v10748_v45  ;;  %9185 = vmatprep.subr.bf16.mxu1 %v10762_v8 }
 0x3dd   : > { %9166 = vmatpush3.bf16.msra.mxu0 %v10749_v59  ;;  %9186 = vmatpush3.bf16.msra.mxu1 %v10763_v9 }
 0x3de   : > { %9167 = vmatprep.subr.bf16.mxu0 %v10750_v4  ;;  %9187 = vmatprep.subr.bf16.mxu1 %v10764_v6 }
 0x3e1   : > { %9168 = vmatpush3.bf16.msra.mxu0 %v10751_v47  ;;  %9188 = vmatpush3.bf16.msra.mxu1 %v10765_v60 }
 0x3e2   : > { %9169 = vmatprep.subr.bf16.mxu0 %v10752_v3  ;;  %9189 = vmatprep.subr.bf16.mxu1 %v10766_v46 }
 0x3e5   : > { %9170 = vmatpush3.bf16.msra.mxu0 %v10753_v55  ;;  %9190 = vmatpush3.bf16.msra.mxu1 %v10767_v35 }
 0x3e6   : > { %9171 = vmatprep.subr.bf16.mxu0 %v10754_v56  ;;  %9191 = vmatprep.subr.bf16.mxu1 %v10768_v25  ;;  %v10777_v25 = vld [vmem:[%s14237_s5 + $0x10] sm:$0xff]  }
 0x3e9   : > { %9172 = vmatpush3.bf16.msra.mxu0 %v10755_v0  ;;  %9192 = vmatpush3.bf16.msra.mxu1 %v10769_v23  ;;  %v10779_v23 = vld [vmem:[%s14237_s5] sm:$0xff]  }
 0x3ea   : > { %9193 = vmatprep.subr.bf16.mxu1 %v10770_v7  ;;  %9219 = vmatprep.subr.bf16.mxu0 %v10796_v63  ;;  %v10780_v7 = vld [vmem:[%s14239_s7 + $0x38] sm:$0xff]  }
 0x3ec   : > { %7790 = vmatmul.mubr.bf16.vlgmr.msra.gmra.mxu0 %v7496_v10 }
 0x3ed   : > { %9194 = vmatpush3.bf16.msra.mxu1 %v10771_v16  ;;  %9220 = vmatpush3.bf16.msra.mxu0 %v10772_v31  ;;  %v10781_v16 = vld [vmem:[%s14239_s7 + $0x30] sm:$0xff]   ;;  %v10782_v31 = vld [vmem:[%s14239_s7 + $0x28] sm:$0xff]  }
 0x3ee   : > { %9239 = vmatprep.subr.bf16.mxu1 %v10796_v63  ;;  %9221 = vmatprep.subr.bf16.mxu0 %v10796_v63 }
 0x3ef   : > { %9235 = vmatprep.mubr.msk.bf16.mxu0 %vm10797_vm0, %v10796_v63 }
 0x3f1   : > { %9222 = vmatpush3.bf16.msra.mxu0 %v10773_v1  ;;  %v10783_v1 = vld [vmem:[%s14239_s7 + $0x20] sm:$0xff]  }
 0x3f2   : > { %9223 = vmatprep.subr.bf16.mxu0 %v10796_v63 }
 0x3f5   : > { %9224 = vmatpush3.bf16.msra.mxu0 %v10774_v54  ;;  %v10784_v54 = vld [vmem:[%s14239_s7 + $0x18] sm:$0xff]  }
 0x3f6   : > { %9225 = vmatprep.subr.bf16.mxu0 %v10796_v63 }
 0x3f9   : > { %9226 = vmatpush3.bf16.msra.mxu0 %v10775_v32  ;;  %v10785_v32 = vld [vmem:[%s14239_s7 + $0x10] sm:$0xff]  }
 0x3fa   : > { %9227 = vmatprep.subr.bf16.mxu0 %v10796_v63 }
 0x3fd   : > { %9228 = vmatpush3.bf16.msra.mxu0 %v10776_v33  ;;  %v7564_v33 = vld [vmem:[%s14236_s4] sm:$0x1] }
 0x3fe   : > { %9229 = vmatprep.subr.bf16.mxu0 %v10796_v63 }
 0x401   : > { %9230 = vmatpush3.bf16.msra.mxu0 %v10777_v25 }
 0x402   : > { %9231 = vmatprep.subr.bf16.mxu0 %v10796_v63 }
 0x40c   : > { %v7230_v13 = vpop.f32.mrf.mxu0 }
 0x40d   : > { %v7271_v11 = vpop.f32.mrf.mxu1  ;;  %v7231_v20 = vadd.f32 %v7230_v13, %v7190_v2 }
 0x40e   : > { %v7232_v41 = vpop.f32.mrf.mxu0 }
 0x40f   : > { %v7273_v62 = vpop.f32.mrf.mxu1  ;;  %v7272_v5 = vadd.f32 %v7271_v11, %v7231_v20  ;;  %v7233_v21 = vadd.f32 %v7232_v41, %v7192_v22  ;;  %v7482_v11 = vsub.s32 3, %v13993_v12 }
 0x410   : > { %v7234_v26 = vpop.f32.mrf.mxu0 }
 0x411   : > { %v7275_v27 = vpop.f32.mrf.mxu1  ;;  %v7274_v57 = vadd.f32 %v7273_v62, %v7233_v21 }
 0x412   : > { %v7235_v14 = vpop.f32.mrf.mxu0 }
 0x413   : > { %v7276_v30 = vpop.f32.mrf.mxu1 }
 0x44c   : > { %v7312_v28 = vpop.f32.mrf.mxu0 }
 0x44d   : > { %v7353_v2 = vpop.f32.mrf.mxu1  ;;  %v7313_v15 = vadd.f32 %v7312_v28, %v7272_v5  ;;  %v7483_v5 = vrot.slane %v14017_v17, %v7482_v11  ;;  %v10778_v17 = vld [vmem:[%s14237_s5 + $0x8] sm:$0xff]  }
 0x44e   : > { %v7314_v34 = vpop.f32.mrf.mxu0  ;;  %9232 = vmatpush3.bf16.msra.mxu0 %v10778_v17 }
 0x44f   : > { %v7355_v44 = vpop.f32.mrf.mxu1  ;;  %v7354_v22 = vadd.f32 %v7353_v2, %v7313_v15  ;;  %v7315_v36 = vadd.f32 %v7314_v34, %v7274_v57  ;;  %9233 = vmatprep.subr.bf16.mxu0 %v10796_v63 }
 0x450   : > { %v7316_v37 = vpop.f32.mrf.mxu0 }
 0x451   : > { %v7357_v61 = vpop.f32.mrf.mxu1  ;;  %v7356_v49 = vadd.f32 %v7355_v44, %v7315_v36  ;;  %v10787_v36 = vld [vmem:[%s14239_s7] sm:$0xff]  }
 0x452   : > { %v7317_v24 = vpop.f32.mrf.mxu0  ;;  %9234 = vmatpush3.bf16.msra.mxu0 %v10779_v23 }
 0x453   : > { %v7358_v51 = vpop.f32.mrf.mxu1 }
 0x454   : > { %v10786_v51 = vld [vmem:[%s14239_s7 + $0x8] sm:$0xff]  }
 0x48c   : > { %v7394_v38 = vpop.f32.mrf.mxu0 }
 0x48d   : > { %v7435_v53 = vpop.f32.mrf.mxu1  ;;  %v7395_v50 = vadd.f32 %v7394_v38, %v7354_v22  ;;  %v7855_v38 = vld [vmem:[%s14238_s6] sm:$0x1] }
 0x48e   : > { %v7396_v39 = vpop.f32.mrf.mxu0 }
 0x48f   : > { %v7437_v48 = vpop.f32.mrf.mxu1  ;;  %v7436_v45 = vadd.f32 %v7435_v53, %v7395_v50  ;;  %v7397_v59 = vadd.f32 %v7396_v39, %v7356_v49 }
 0x490   : > { %v7398_v40 = vpop.f32.mrf.mxu0 }
 0x491   : > { %v7439_v4 = vpop.f32.mrf.mxu1  ;;  %v7454_v47 = vrot.slane %v7436_v45, 4  ;;  %v7438_v58 = vadd.f32 %v7437_v48, %v7397_v59 }
 0x492   : > { %v7399_v3 = vpop.f32.mrf.mxu0 }
 0x493   : > { %v7440_v19 = vpop.f32.mrf.mxu1  ;;  %v7455_v55 = vmax.f32 %v7436_v45, %v7454_v47  ;;  %v7460_v56 = vrot.slane %v7438_v58, 4 }
 0x495   : > { %v7456_v43 = vrot.slane %v7455_v55, 2  ;;  %v7461_v0 = vmax.f32 %v7438_v58, %v7460_v56 }
 0x497   : > { %v7457_v10 = vmax.f32 %v7455_v55, %v7456_v43  ;;  %v7462_v13 = vrot.slane %v7461_v0, 2 }
 0x499   : > { %v7458_v18 = vrot.slane %v7457_v10, 1  ;;  %v7463_v20 = vmax.f32 %v7461_v0, %v7462_v13 }
 0x49b   : > { %v7459_v41 = vmax.f32 %v7457_v10, %v7458_v18  ;;  %v7464_v62 = vrot.slane %v7463_v20, 1 }
 0x49d   : > { %v7465_v21 = vmax.f32 %v7463_v20, %v7464_v62  ;;  %v7490_v26 = vadd.f32 %v7479_v52, %v7459_v41 }
 0x49f   : > { %v7491_v27 = vadd.f32 %v7483_v5, %v7465_v21  ;;  %v7494_v8 = vmax.f32 %v7490_v26, 0.0 }
 0x4a1   : > { %v7495_v57 = vmax.f32 %v7491_v27, 0.0  ;;  %v7498_v14 = vpack.c.bf16 %v7494_v8, %v7494_v8 }
 0x4a3   : > { %v7499_v9 = vpack.c.bf16 %v7495_v57, %v7495_v57 }
 0x4a5   : > { %7829 = vmatprep.mubr.bf16.mxu1 %v7499_v9 }
 0x4a6   : > { %7830 = vmatmul.mubr.bf16.vlgmr.msra.gmra.mxu1 %v7498_v14 }
 0x4a7   : > { %9255 = vmatprep.mubr.msk.bf16.mxu1 %vm10797_vm0, %v10796_v63  ;;  %9240 = vmatpush3.bf16.msra.mxu1 %v10780_v7 }
 0x4a8   : > { %9241 = vmatprep.subr.bf16.mxu1 %v10796_v63 }
 0x4ab   : > { %9242 = vmatpush3.bf16.msra.mxu1 %v10781_v16 }
 0x4ac   : > { %v9173_v30 = vpop.f32.mrf.mxu0  ;;  %9243 = vmatprep.subr.bf16.mxu1 %v10796_v63 }
 0x4ae   : > { %v9174_v6 = vpop.f32.mrf.mxu0 }
 0x4af   : > { %v9175_v60 = vadd.f32 %v9174_v6, %v9173_v30  ;;  %9244 = vmatpush3.bf16.msra.mxu1 %v10782_v31 }
 0x4b0   : > { %v9176_v46 = vpop.f32.mrf.mxu0  ;;  %9245 = vmatprep.subr.bf16.mxu1 %v10796_v63 }
 0x4b1   : > { %v7792_v15 = vadd.f32 %v9175_v60, %v7564_v33 }
 0x4b2   : > { %v9177_v35 = vpop.f32.mrf.mxu0 }
 0x4b3   : > { %9246 = vmatpush3.bf16.msra.mxu1 %v10783_v1 }
 0x4b4   : > { %9247 = vmatprep.subr.bf16.mxu1 %v10796_v63 }
 0x4b7   : > { %9248 = vmatpush3.bf16.msra.mxu1 %v10784_v54 }
 0x4b8   : > { %9249 = vmatprep.subr.bf16.mxu1 %v10796_v63 }
 0x4bb   : > { %9250 = vmatpush3.bf16.msra.mxu1 %v10785_v32 }
 0x4bc   : > { %9251 = vmatprep.subr.bf16.mxu1 %v10796_v63 }
 0x4bf   : > { %9252 = vmatpush3.bf16.msra.mxu1 %v10786_v51 }
 0x4c0   : > { %9253 = vmatprep.subr.bf16.mxu1 %v10796_v63  ;;  %v7962_v63 = vld [vmem:[%s14240_s8] sm:$0x1] }
 0x4c3   : > { %9254 = vmatpush3.bf16.msra.mxu1 %v10787_v36 }
 0x566   : > { %v9195_v28 = vpop.f32.mrf.mxu1 }
 0x568   : > { %v9196_v2 = vpop.f32.mrf.mxu1 }
 0x569   : > { %v9197_v34 = vadd.f32 %v9196_v2, %v9195_v28 }
 0x56a   : > { %v9198_v44 = vpop.f32.mrf.mxu1 }
 0x56b   : > { %v7832_v22 = vadd.f32 %v9197_v34, %v7792_v15 }
 0x56c   : > { %v9199_v37 = vpop.f32.mrf.mxu1 }
 0x56d   : > { %v7837_v61 = vmax.f32 %v7832_v22, 0.0 }
 0x56f   : > { %v7838_v24 = vpack.c.bf16 %v7837_v61, %v7837_v61 }
 0x571   : > { %9236 = vmatmul.mubr.bf16.vlgmr.msra.gmra.mxu0 %v7838_v24 }
 0x631   : > { %v7938_v53 = vpop.f32.mrf.mxu0 }
 0x632   : > { %v7939_v49 = vadd.f32 %v7938_v53, %v7855_v38 }
 0x633   : > { %v9237_v50 = vpop.f32.mrf.mxu0 }
 0x634   : > { %v7944_v39 = vmax.f32 %v7939_v49, 0.0 }
 0x635   : > { %v7941_v48 = vpop.f32.mrf.mxu0 }
 0x636   : > { %v7945_v45 = vpack.c.bf16 %v7944_v39, %v7944_v39 }
 0x637   : > { %v9238_v59 = vpop.f32.mrf.mxu0 }
 0x638   : > { %9256 = vmatmul.mubr.bf16.vlgmr.msra.gmra.mxu1 %v7945_v45 }
 0x6f8   : > { %v8045_v40 = vpop.f32.mrf.mxu1 }
 0x6f9   : > { %v8046_v4 = vadd.f32 %v8045_v40, %v7962_v63 }
 0x6fa   : > { %v9257_v47 = vpop.f32.mrf.mxu1 }
 0x6fb   : > { %v8051_v58 = vmax.f32 %v8046_v4, 0.0 }
 0x6fc   : > { %v8048_v3 = vpop.f32.mrf.mxu1 }
 0x6fd   : > { %v8055_v19 = vrot.slane %v8051_v58, %v7470_v42 }
 0x6fe   : > { %v9258_v55 = vpop.f32.mrf.mxu1 }
 0x6ff   : > { %8056 = vst [vmem:[%s330_s15] sm:$0xff] %v8055_v19 }
 0x700 PF: > { %s19_s30 = sadd.s32 1, %s10794_s30  }
 0x701   : > { %p16_p4 = scmp.ge.s32.totalorder %s19_s30, 4  }
 0x703   :  { %18 = sbr.rel (!%p16_p4) target bundleno = 1 (0x1), region = 86 }

</bundles_post_ra>
